<compile_context>
chip_gen: v7x
topology: tpu7x:2x2x1
jax: 0.10.0
libtpu: 0.0.40
codegen_flags: <defaults>
</compile_context>

<pallas_src>
import functools

import numpy as np

import jax
import jax.numpy as jnp
from jax import lax
from jax.experimental import pallas as pl
from jax.experimental.pallas import tpu as pltpu


# ------------------------------ in-kernel helpers ------------------------------

def _rot_rows_up1(x):
    """Circular 1-row rotate: result[i] = x[i+1].  Unit-stride slices + concat (the
    pltpu.roll(-1, axis=0) pattern, written explicitly for unambiguous direction)."""
    n = x.shape[0]
    return jnp.concatenate([x[1:n, :], x[0:1, :]], axis=0)


def _rot_rows_down1(x):
    """Circular 1-row rotate: result[i] = x[i-1]."""
    n = x.shape[0]
    return jnp.concatenate([x[n - 1:n, :], x[0:n - 1, :]], axis=0)


def _bn_relu_pool(y, scale, shift, sel):
    """(conv bias + BN) per-channel affine + ReLU + MaxPool1d(2,2), value-level.

    Pairwise max of adjacent rows, then row compaction (and, for the last layer,
    reordering to time-major) via a 0/1 selection matmul -- no VMEM scratch round trip.
    """
    y = jnp.maximum(y * scale + shift, 0.0)                     # f32
    pairmax = jnp.maximum(y, _rot_rows_up1(y))                  # row 2j = max(y[2j], y[2j+1])
    return jnp.dot(sel, pairmax.astype(jnp.bfloat16),
                   preferred_element_type=jnp.float32)


def _shifted_conv3(h, w_ref, seq_len, n_batch):
    """kernel_size=3, padding=1 Conv1d as three shifted matmuls on a batch-major
    (n_batch*seq_len, Cin) f32 slab.  w_ref rows are [k=0 | k=1 | k=2] blocks of Cin."""
    f32, bf16 = jnp.float32, jnp.bfloat16
    n, c = h.shape
    row = lax.broadcasted_iota(jnp.int32, (n, c), 0)
    not_first = row != 0                                         # zero-pad at l == 0
    not_last = row != seq_len - 1                                # zero-pad at l == L-1
    for b in range(1, n_batch):
        not_first = not_first & (row != b * seq_len)
        not_last = not_last & (row != (b + 1) * seq_len - 1)
    h_c = h.astype(bf16)
    h_prev = jnp.where(not_first, _rot_rows_down1(h), 0.0).astype(bf16)   # x[l-1]
    h_next = jnp.where(not_last, _rot_rows_up1(h), 0.0).astype(bf16)      # x[l+1]
    y = jnp.dot(h_prev, w_ref[0:c, :], preferred_element_type=f32)
    y += jnp.dot(h_c, w_ref[c:2 * c, :], preferred_element_type=f32)
    y += jnp.dot(h_next, w_ref[2 * c:3 * c, :], preferred_element_type=f32)
    return y


# --------------------------------- fused kernel ---------------------------------

def _fused_cnn_lstm_kernel(cols1_ref, w1_ref, w2_ref, wfc_ref, aux_ref, sels_ref,
                           w3_hbm, wih_hbm, whh_hbm,
                           out_ref,
                           w3_buf, wih_buf, whh_buf, sem):
    f32, bf16 = jnp.float32, jnp.bfloat16
    B = out_ref.shape[0]
    H = whh_buf.shape[0]
    C1, C2, C3 = w1_ref.shape[1], w2_ref.shape[1], w3_buf.shape[1]
    N0 = cols1_ref.shape[0]                    # B * L0
    L0 = N0 // B
    L1, L2, T = L0 // 2, L0 // 4, L0 // 8
    N1, N2 = B * L1, B * L2
    N0h, N1h, N2h = N0 // 2, N1 // 2, N2 // 2

    # ---- prefetch the big (conv3 / LSTM) weights; DMAs overlap conv1/conv2 compute ----
    cp_w3 = pltpu.make_async_copy(w3_hbm, w3_buf, sem.at[0]); cp_w3.start()
    cp_ih = pltpu.make_async_copy(wih_hbm, wih_buf, sem.at[1]); cp_ih.start()
    cp_hh = pltpu.make_async_copy(whh_hbm, whh_buf, sem.at[2]); cp_hh.start()

    # Pool-compaction 0/1 selection matrices (constants built in the wrapper).
    sel1 = sels_ref[0:N0h, 0:N0]                              # (B*L1, B*L0) even rows
    sel2 = sels_ref[N0h:N0h + N1h, 0:N1]                      # (B*L2, B*L1) even rows
    sel3 = sels_ref[N0h + N1h:N0h + N1h + N2h, 0:N2]          # (B*T,  B*L2) even rows, TIME-major

    # ---- conv block 1 (Cin=1; im2col built in the wrapper, taps zero-padded to 8) ----
    s1 = aux_ref[0:1, 0:C1]
    t1 = aux_ref[1:2, 0:C1]
    y1 = jnp.dot(cols1_ref[...], w1_ref[...], preferred_element_type=f32)
    h1 = _bn_relu_pool(y1, s1, t1, sel1)                      # (B*L1, C1) f32

    # ---- conv block 2 ----
    s2 = aux_ref[2:3, 0:C2]
    t2 = aux_ref[3:4, 0:C2]
    y2 = _shifted_conv3(h1, w2_ref, L1, B)
    h2 = _bn_relu_pool(y2, s2, t2, sel2)                      # (B*L2, C2) f32

    # ---- conv block 3 (weights arrive via the manual DMA) ----
    cp_w3.wait()
    s3 = aux_ref[4:5, 0:C3]
    t3 = aux_ref[5:6, 0:C3]
    y3 = _shifted_conv3(h2, w3_buf, L2, B)
    h3 = _bn_relu_pool(y3, s3, t3, sel3)                      # (B*T, C3) f32, TIME-major rows

    # TODO(synk): Dropout(0.3)/Dropout(0.5) are stochastic train-time ops; identity here.

    # ---- LSTM: input projection hoisted out of the recurrence, kept in vregs ----
    cp_ih.wait()
    b_all = aux_ref[6:7, 0:4 * H]                             # b_ih + b_hh (folded)
    gx = jnp.dot(h3.astype(bf16), wih_buf[...],
                 preferred_element_type=f32) + b_all          # (B*T, 4H), time-major rows

    cp_hh.wait()
    h_t = jnp.zeros((B, H), f32)
    c_t = jnp.zeros((B, H), f32)
    # TODO(synk): hold Whh stationary across the unrolled steps (pltpu.matmul_push_rhs /
    # matmul_acc_lhs / matmul_pop) once per-generation MXU tile config is plumbed; the
    # portable jnp.dot re-streams Whh each step.
    for t in range(T):                                        # static unroll, T is tiny
        xg = gx[t * B:(t + 1) * B, :]                         # contiguous (B, 4H) slice
        gates = xg + jnp.dot(h_t.astype(bf16), whh_buf[...],
                             preferred_element_type=f32)      # (B, 4H)
        i = jax.nn.sigmoid(gates[:, 0:H])
        f = jax.nn.sigmoid(gates[:, H:2 * H])
        g = jnp.tanh(gates[:, 2 * H:3 * H])
        o = jax.nn.sigmoid(gates[:, 3 * H:4 * H])
        c_t = f * c_t + i * g
        h_t = o * jnp.tanh(c_t)

    # ---- final FC on the last hidden state (lane-padded to 128 -> dense store) ----
    bfc = aux_ref[7:8, 0:out_ref.shape[1]]
    out_ref[...] = jnp.dot(h_t.astype(bf16), wfc_ref[...],
                           preferred_element_type=f32) + bfc


# ------------------------------------ wrapper ------------------------------------

def _pool_selectors_np(B, L0):
    """0/1 selection matrices for the three MaxPool compactions, packed in one slab.

    sel1/sel2 pick even rows (batch-major).  sel3 additionally permutes the output to
    time-major order (row r = t*B + b picks pooled row b*L2 + 2t) so the LSTM steps read
    contiguous (B, 4H) slices of the hoisted gate projection.
    """
    N0, N1, N2 = B * L0, B * L0 // 2, B * L0 // 4
    L2 = L0 // 4
    s1 = np.zeros((N0 // 2, N0), np.float32)
    s1[np.arange(N0 // 2), 2 * np.arange(N0 // 2)] = 1.0
    s2 = np.zeros((N1 // 2, N1), np.float32)
    s2[np.arange(N1 // 2), 2 * np.arange(N1 // 2)] = 1.0
    p3 = np.zeros((N2 // 2, N2), np.float32)
    r = np.arange(N2 // 2)
    p3[r, (r % B) * L2 + 2 * (r // B)] = 1.0
    sels = np.zeros((N0 // 2 + N1 // 2 + N2 // 2, N0), np.float32)
    sels[0:N0 // 2, 0:N0] = s1
    sels[N0 // 2:N0 // 2 + N1 // 2, 0:N1] = s2
    sels[N0 // 2 + N1 // 2:, 0:N2] = p3
    return sels


@functools.partial(jax.jit, static_argnames=("num_classes",))
def cnn_lstm_forward(x, kp, num_classes):
    """x: (B, input_size) f32 -> (B, num_classes) f32."""
    B, L0 = x.shape
    assert L0 % 8 == 0, "input_size must be divisible by 8 (three MaxPool1d(2) stages)"
    nc_pad = kp["wfc"].shape[1]
    k1 = kp["w1"].shape[0]                       # first-layer taps (zero-padded to 8)

    # First-layer (Cin == 1) im2col built here so the kernel never sees lane-sparse data.
    xp = jnp.pad(x, ((0, 0), (1, 1)))                                   # padding=1
    cols1 = jnp.stack([xp[:, k:k + L0] for k in range(3)], axis=-1)     # (B, L0, 3)
    cols1 = jnp.pad(cols1, ((0, 0), (0, 0), (0, k1 - 3)))
    cols1 = cols1.reshape(B * L0, k1).astype(jnp.bfloat16)

    sels = jnp.asarray(_pool_selectors_np(B, L0), jnp.bfloat16)

    vmem = pl.BlockSpec(memory_space=pltpu.MemorySpace.VMEM)
    hbm = pl.BlockSpec(memory_space=pl.ANY)                   # prefetched in-kernel

    out = pl.pallas_call(
        _fused_cnn_lstm_kernel,
        out_shape=jax.ShapeDtypeStruct((B, nc_pad), jnp.float32),
        in_specs=[vmem, vmem, vmem, vmem, vmem, vmem, hbm, hbm, hbm],
        out_specs=vmem,
        scratch_shapes=[
            pltpu.VMEM(kp["w3"].shape, jnp.bfloat16),          # conv3 weight buffer
            pltpu.VMEM(kp["wih"].shape, jnp.bfloat16),         # LSTM W_ih buffer
            pltpu.VMEM(kp["whh"].shape, jnp.bfloat16),         # LSTM W_hh buffer
            pltpu.SemaphoreType.DMA((3,)),
        ],
        compiler_params=pltpu.CompilerParams(vmem_limit_bytes=32 * 1024 * 1024),
    )(cols1, kp["w1"], kp["w2"], kp["wfc"], kp["aux"], sels,
      kp["w3"], kp["wih"], kp["whh"])
    return out[:, :num_classes]


# ------------------------------ parameters & packing ------------------------------

def init_params(key, num_classes=1):
    """Canonical f32 parameters (BN running stats + conv bias folded into scale/shift)."""
    H = 256
    chans = [(1, 128), (128, 256), (256, 512)]
    ks = iter(jax.random.split(key, 32))
    eps = 1e-5
    conv = []
    for cin, cout in chans:
        w = 0.05 * jax.random.normal(next(ks), (3, cin, cout), jnp.float32)
        bias = 0.05 * jax.random.normal(next(ks), (cout,), jnp.float32)
        gamma = 1.0 + 0.1 * jax.random.normal(next(ks), (cout,), jnp.float32)
        beta = 0.1 * jax.random.normal(next(ks), (cout,), jnp.float32)
        mean = 0.1 * jax.random.normal(next(ks), (cout,), jnp.float32)
        var = 0.5 + 0.5 * jnp.abs(jax.random.normal(next(ks), (cout,), jnp.float32))
        scale = gamma / jnp.sqrt(var + eps)                 # BN folded (inference)
        shift = (bias - mean) * scale + beta                # conv bias folded in
        conv.append((w, scale, shift))
    wih = 0.05 * jax.random.normal(next(ks), (512, 4 * H), jnp.float32)
    whh = 0.05 * jax.random.normal(next(ks), (H, 4 * H), jnp.float32)
    b = (0.05 * jax.random.normal(next(ks), (4 * H,), jnp.float32)
         + 0.05 * jax.random.normal(next(ks), (4 * H,), jnp.float32))   # b_ih + b_hh
    wfc = 0.05 * jax.random.normal(next(ks), (H, num_classes), jnp.float32)
    bfc = 0.05 * jax.random.normal(next(ks), (num_classes,), jnp.float32)
    return {"conv": conv, "wih": wih, "whh": whh, "b": b, "wfc": wfc, "bfc": bfc}


def pack_params(params):
    """Kernel operand forms: tap-major flattened conv weights, bf16 matmul operands,
    lane-padded FC, and all tiny per-channel vectors consolidated into one f32 slab."""
    bf16 = jnp.bfloat16
    (w1, s1, t1), (w2, s2, t2), (w3, s3, t3) = params["conv"]
    kp = {}

    # conv1: (3, 1, C1) -> (8, C1) with the 3 taps zero-padded to 8 contraction rows
    w1f = w1.reshape(3, -1)
    kp["w1"] = jnp.concatenate(
        [w1f, jnp.zeros((8 - 3, w1f.shape[1]), w1f.dtype)], axis=0).astype(bf16)
    # conv2/3: (3, Cin, Cout) -> (3*Cin, Cout), rows = [k=0 | k=1 | k=2] blocks of Cin
    kp["w2"] = w2.reshape(-1, w2.shape[2]).astype(bf16)
    kp["w3"] = w3.reshape(-1, w3.shape[2]).astype(bf16)

    H = params["whh"].shape[0]
    nc = params["wfc"].shape[1]
    nc_pad = ((nc + 127) // 128) * 128
    kp["wih"] = params["wih"].astype(bf16)
    kp["whh"] = params["whh"].astype(bf16)
    kp["wfc"] = (jnp.zeros((H, nc_pad), jnp.float32)
                 .at[:, :nc].set(params["wfc"]).astype(bf16))

    # Consolidated small operands -> one lane-padded f32 slab (single DMA):
    # rows: [s1, t1, s2, t2, s3, t3, lstm bias, fc bias]
    width = max(4 * H, s3.shape[0], nc_pad)
    aux = jnp.zeros((8, width), jnp.float32)
    aux = aux.at[0, :s1.shape[0]].set(s1).at[1, :t1.shape[0]].set(t1)
    aux = aux.at[2, :s2.shape[0]].set(s2).at[3, :t2.shape[0]].set(t2)
    aux = aux.at[4, :s3.shape[0]].set(s3).at[5, :t3.shape[0]].set(t3)
    aux = aux.at[6, :4 * H].set(params["b"])
    aux = aux.at[7, :nc].set(params["bfc"])
    kp["aux"] = aux
    return kp, nc


# ------------------------------ pure-JAX reference ------------------------------

def reference_forward(x, params):
    """Reference with matched numerics (bf16 matmul operands, f32 accumulation)."""
    bf16 = jnp.bfloat16
    h = x[:, :, None]                                       # (B, L, 1) channels-last
    for (w, scale, shift) in params["conv"]:
        y = lax.conv_general_dilated(
            h.astype(bf16), w.astype(bf16),
            window_strides=(1,), padding=((1, 1),),
            dimension_numbers=("NWC", "WIO", "NWC"),
            preferred_element_type=jnp.float32)
        y = jnp.maximum(y * scale + shift, 0.0)
        B_, L_, C_ = y.shape
        h = y.reshape(B_, L_ // 2, 2, C_).max(axis=2)       # MaxPool1d(2, 2)
    x_tm = jnp.transpose(h, (1, 0, 2))                      # (T, B, 512)
    H = params["whh"].shape[0]
    B = x.shape[0]
    wih = params["wih"].astype(bf16)
    whh = params["whh"].astype(bf16)

    def step(carry, xt):
        hh, cc = carry
        gates = (jnp.dot(xt.astype(bf16), wih, preferred_element_type=jnp.float32)
                 + jnp.dot(hh.astype(bf16), whh, preferred_element_type=jnp.float32)
                 + params["b"])
        i = jax.nn.sigmoid(gates[:, :H])
        f = jax.nn.sigmoid(gates[:, H:2 * H])
        g = jnp.tanh(gates[:, 2 * H:3 * H])
        o = jax.nn.sigmoid(gates[:, 3 * H:])
        cc = f * cc + i * g
        hh = o * jnp.tanh(cc)
        return (hh, cc), None

    init = (jnp.zeros((B, H), jnp.float32), jnp.zeros((B, H), jnp.float32))
    (hh, _), _ = lax.scan(step, init, x_tm)
    return (jnp.dot(hh.astype(bf16), params["wfc"].astype(bf16),
                    preferred_element_type=jnp.float32) + params["bfc"])


if __name__ == "__main__":
    key = jax.random.PRNGKey(0)
    kx, kw = jax.random.split(key)
    B, input_size = 2, 32                    # seq after three MaxPool(2) stages: 32/8 = 4
    x = jax.random.normal(kx, (B, input_size), jnp.float32)

    params = init_params(kw, num_classes=1)
    kp, num_classes = pack_params(params)

    out = cnn_lstm_forward(x, kp, num_classes=num_classes)
    out = jax.block_until_ready(out)
    assert out.shape == (B, num_classes), out.shape

    ref = reference_forward(x, params)
    if not jnp.allclose(out, ref, rtol=1e-2, atol=1e-2):
        raise AssertionError(f"mismatch: pallas={out} ref={ref}")

    print("KERNEL_OK")
</pallas_src>

<mosaic_0001>
module attributes {stable_mosaic.version = 11 : i64} {
  func.func @_fused_cnn_lstm_kernel(%arg0: memref<64x8xbf16, #tpu.memory_space<vmem>>, %arg1: memref<8x128xbf16, #tpu.memory_space<vmem>>, %arg2: memref<384x256xbf16, #tpu.memory_space<vmem>>, %arg3: memref<256x128xbf16, #tpu.memory_space<vmem>>, %arg4: memref<8x1024xf32, #tpu.memory_space<vmem>>, %arg5: memref<56x64xbf16, #tpu.memory_space<vmem>>, %arg6: memref<768x512xbf16, #tpu.memory_space<any>>, %arg7: memref<512x1024xbf16, #tpu.memory_space<any>>, %arg8: memref<256x1024xbf16, #tpu.memory_space<any>>, %arg9: memref<2x128xf32, #tpu.memory_space<vmem>>, %arg10: memref<768x512xbf16, #tpu.memory_space<vmem>>, %arg11: memref<512x1024xbf16, #tpu.memory_space<vmem>>, %arg12: memref<256x1024xbf16, #tpu.memory_space<vmem>>, %arg13: memref<3x!tpu.dma_semaphore, #tpu.memory_space<semaphore_mem>>) attributes {dimension_semantics = [], scalar_prefetch = 0 : i64, scratch_operands = 4 : i64, tpu.core_type = #tpu.core_type<tc>} {
    %c0_i32 = arith.constant 0 : i32
    %0 = tpu.memref_slice %arg13[%c0_i32] : memref<3x!tpu.dma_semaphore, #tpu.memory_space<semaphore_mem>> -> memref<1x!tpu.dma_semaphore, #tpu.memory_space<semaphore_mem>>
    %1 = tpu.memref_squeeze %0 : memref<1x!tpu.dma_semaphore, #tpu.memory_space<semaphore_mem>> -> memref<!tpu.dma_semaphore, #tpu.memory_space<semaphore_mem>>
    tpu.enqueue_dma source(%arg6 : memref<768x512xbf16, #tpu.memory_space<any>>) target(%arg10 : memref<768x512xbf16, #tpu.memory_space<vmem>>) target_semaphore(%1 : memref<!tpu.dma_semaphore, #tpu.memory_space<semaphore_mem>>)
    %c1_i32 = arith.constant 1 : i32
    %2 = tpu.memref_slice %arg13[%c1_i32] : memref<3x!tpu.dma_semaphore, #tpu.memory_space<semaphore_mem>> -> memref<1x!tpu.dma_semaphore, #tpu.memory_space<semaphore_mem>>
    %3 = tpu.memref_squeeze %2 : memref<1x!tpu.dma_semaphore, #tpu.memory_space<semaphore_mem>> -> memref<!tpu.dma_semaphore, #tpu.memory_space<semaphore_mem>>
    tpu.enqueue_dma source(%arg7 : memref<512x1024xbf16, #tpu.memory_space<any>>) target(%arg11 : memref<512x1024xbf16, #tpu.memory_space<vmem>>) target_semaphore(%3 : memref<!tpu.dma_semaphore, #tpu.memory_space<semaphore_mem>>)
    %c2_i32 = arith.constant 2 : i32
    %4 = tpu.memref_slice %arg13[%c2_i32] : memref<3x!tpu.dma_semaphore, #tpu.memory_space<semaphore_mem>> -> memref<1x!tpu.dma_semaphore, #tpu.memory_space<semaphore_mem>>
    %5 = tpu.memref_squeeze %4 : memref<1x!tpu.dma_semaphore, #tpu.memory_space<semaphore_mem>> -> memref<!tpu.dma_semaphore, #tpu.memory_space<semaphore_mem>>
    tpu.enqueue_dma source(%arg8 : memref<256x1024xbf16, #tpu.memory_space<any>>) target(%arg12 : memref<256x1024xbf16, #tpu.memory_space<vmem>>) target_semaphore(%5 : memref<!tpu.dma_semaphore, #tpu.memory_space<semaphore_mem>>)
    %c0 = arith.constant 0 : index
    %c0_0 = arith.constant 0 : index
    %6 = vector.load %arg5[%c0, %c0_0] : memref<56x64xbf16, #tpu.memory_space<vmem>>, vector<32x64xbf16>
    %c32 = arith.constant 32 : index
    %c0_1 = arith.constant 0 : index
    %7 = vector.load %arg5[%c32, %c0_1] : memref<56x64xbf16, #tpu.memory_space<vmem>>, vector<16x32xbf16>
    %c48 = arith.constant 48 : index
    %c0_2 = arith.constant 0 : index
    %8 = vector.load %arg5[%c48, %c0_2] : memref<56x64xbf16, #tpu.memory_space<vmem>>, vector<8x16xbf16>
    %c0_3 = arith.constant 0 : index
    %c0_4 = arith.constant 0 : index
    %9 = vector.load %arg4[%c0_3, %c0_4] : memref<8x1024xf32, #tpu.memory_space<vmem>>, vector<1x128xf32>
    %c1 = arith.constant 1 : index
    %c0_5 = arith.constant 0 : index
    %10 = vector.load %arg4[%c1, %c0_5] : memref<8x1024xf32, #tpu.memory_space<vmem>>, vector<1x128xf32>
    %c0_6 = arith.constant 0 : index
    %c0_7 = arith.constant 0 : index
    %11 = vector.load %arg0[%c0_6, %c0_7] : memref<64x8xbf16, #tpu.memory_space<vmem>>, vector<64x8xbf16>
    %c0_8 = arith.constant 0 : index
    %c0_9 = arith.constant 0 : index
    %12 = vector.load %arg1[%c0_8, %c0_9] : memref<8x128xbf16, #tpu.memory_space<vmem>>, vector<8x128xbf16>
    %cst = arith.constant dense<0.000000e+00> : vector<64x128xf32>
    %13 = tpu.matmul %11, %12, %cst {dimension_numbers = #tpu.dot_dimension_numbers<[1], [0], [0], [1], [0, 0, 1, 1], [], []>} : vector<64x8xbf16>, vector<8x128xbf16>, vector<64x128xf32> -> vector<64x128xf32>
    %14 = vector.broadcast %9 : vector<1x128xf32> to vector<64x128xf32>
    %15 = arith.mulf %13, %14 : vector<64x128xf32>
    %16 = vector.broadcast %10 : vector<1x128xf32> to vector<64x128xf32>
    %17 = arith.addf %15, %16 : vector<64x128xf32>
    %cst_10 = arith.constant 0.000000e+00 : f32
    %18 = vector.broadcast %cst_10 : f32 to vector<64x128xf32>
    %19 = arith.maximumf %17, %18 : vector<64x128xf32>
    %20 = vector.extract_strided_slice %19 {offsets = [1, 0], sizes = [63, 128], strides = [1, 1]} : vector<64x128xf32> to vector<63x128xf32>
    %21 = vector.extract_strided_slice %19 {offsets = [0, 0], sizes = [1, 128], strides = [1, 1]} : vector<64x128xf32> to vector<1x128xf32>
    %22 = tpu.concatenate %20, %21 in 0 : vector<63x128xf32>, vector<1x128xf32> -> vector<64x128xf32>
    %23 = arith.maximumf %19, %22 : vector<64x128xf32>
    %24 = arith.truncf %23 : vector<64x128xf32> to vector<64x128xbf16>
    %cst_11 = arith.constant dense<0.000000e+00> : vector<32x128xf32>
    %25 = tpu.matmul %6, %24, %cst_11 {dimension_numbers = #tpu.dot_dimension_numbers<[1], [0], [0], [1], [0, 0, 1, 1], [], []>} : vector<32x64xbf16>, vector<64x128xbf16>, vector<32x128xf32> -> vector<32x128xf32>
    %c2 = arith.constant 2 : index
    %c0_12 = arith.constant 0 : index
    %26 = vector.load %arg4[%c2, %c0_12] : memref<8x1024xf32, #tpu.memory_space<vmem>>, vector<1x256xf32>
    %c3 = arith.constant 3 : index
    %c0_13 = arith.constant 0 : index
    %27 = vector.load %arg4[%c3, %c0_13] : memref<8x1024xf32, #tpu.memory_space<vmem>>, vector<1x256xf32>
    %28 = tpu.iota {dimensions = array<i32: 0>} : vector<32x128xi32>
    %c0_i32_14 = arith.constant 0 : i32
    %29 = vector.broadcast %c0_i32_14 : i32 to vector<32x128xi32>
    %30 = arith.cmpi ne, %28, %29 : vector<32x128xi32>
    %c15_i32 = arith.constant 15 : i32
    %31 = vector.broadcast %c15_i32 : i32 to vector<32x128xi32>
    %32 = arith.cmpi ne, %28, %31 : vector<32x128xi32>
    %c16_i32 = arith.constant 16 : i32
    %33 = vector.broadcast %c16_i32 : i32 to vector<32x128xi32>
    %34 = arith.cmpi ne, %28, %33 : vector<32x128xi32>
    %35 = arith.andi %30, %34 : vector<32x128xi1>
    %c31_i32 = arith.constant 31 : i32
    %36 = vector.broadcast %c31_i32 : i32 to vector<32x128xi32>
    %37 = arith.cmpi ne, %28, %36 : vector<32x128xi32>
    %38 = arith.andi %32, %37 : vector<32x128xi1>
    %39 = arith.truncf %25 : vector<32x128xf32> to vector<32x128xbf16>
    %40 = vector.extract_strided_slice %25 {offsets = [31, 0], sizes = [1, 128], strides = [1, 1]} : vector<32x128xf32> to vector<1x128xf32>
    %41 = vector.extract_strided_slice %25 {offsets = [0, 0], sizes = [31, 128], strides = [1, 1]} : vector<32x128xf32> to vector<31x128xf32>
    %42 = tpu.concatenate %40, %41 in 0 : vector<1x128xf32>, vector<31x128xf32> -> vector<32x128xf32>
    %cst_15 = arith.constant 0.000000e+00 : f32
    %43 = vector.broadcast %cst_15 : f32 to vector<32x128xf32>
    %44 = arith.select %35, %42, %43 : vector<32x128xi1>, vector<32x128xf32>
    %45 = arith.truncf %44 : vector<32x128xf32> to vector<32x128xbf16>
    %46 = vector.extract_strided_slice %25 {offsets = [1, 0], sizes = [31, 128], strides = [1, 1]} : vector<32x128xf32> to vector<31x128xf32>
    %47 = vector.extract_strided_slice %25 {offsets = [0, 0], sizes = [1, 128], strides = [1, 1]} : vector<32x128xf32> to vector<1x128xf32>
    %48 = tpu.concatenate %46, %47 in 0 : vector<31x128xf32>, vector<1x128xf32> -> vector<32x128xf32>
    %cst_16 = arith.constant 0.000000e+00 : f32
    %49 = vector.broadcast %cst_16 : f32 to vector<32x128xf32>
    %50 = arith.select %38, %48, %49 : vector<32x128xi1>, vector<32x128xf32>
    %51 = arith.truncf %50 : vector<32x128xf32> to vector<32x128xbf16>
    %c0_17 = arith.constant 0 : index
    %c0_18 = arith.constant 0 : index
    %52 = vector.load %arg2[%c0_17, %c0_18] : memref<384x256xbf16, #tpu.memory_space<vmem>>, vector<128x256xbf16>
    %cst_19 = arith.constant dense<0.000000e+00> : vector<32x256xf32>
    %53 = tpu.matmul %45, %52, %cst_19 {dimension_numbers = #tpu.dot_dimension_numbers<[1], [0], [0], [1], [0, 0, 1, 1], [], []>} : vector<32x128xbf16>, vector<128x256xbf16>, vector<32x256xf32> -> vector<32x256xf32>
    %c128 = arith.constant 128 : index
    %c0_20 = arith.constant 0 : index
    %54 = vector.load %arg2[%c128, %c0_20] : memref<384x256xbf16, #tpu.memory_space<vmem>>, vector<128x256xbf16>
    %cst_21 = arith.constant dense<0.000000e+00> : vector<32x256xf32>
    %55 = tpu.matmul %39, %54, %cst_21 {dimension_numbers = #tpu.dot_dimension_numbers<[1], [0], [0], [1], [0, 0, 1, 1], [], []>} : vector<32x128xbf16>, vector<128x256xbf16>, vector<32x256xf32> -> vector<32x256xf32>
    %56 = arith.addf %53, %55 : vector<32x256xf32>
    %c256 = arith.constant 256 : index
    %c0_22 = arith.constant 0 : index
    %57 = vector.load %arg2[%c256, %c0_22] : memref<384x256xbf16, #tpu.memory_space<vmem>>, vector<128x256xbf16>
    %cst_23 = arith.constant dense<0.000000e+00> : vector<32x256xf32>
    %58 = tpu.matmul %51, %57, %cst_23 {dimension_numbers = #tpu.dot_dimension_numbers<[1], [0], [0], [1], [0, 0, 1, 1], [], []>} : vector<32x128xbf16>, vector<128x256xbf16>, vector<32x256xf32> -> vector<32x256xf32>
    %59 = arith.addf %56, %58 : vector<32x256xf32>
    %60 = vector.broadcast %26 : vector<1x256xf32> to vector<32x256xf32>
    %61 = arith.mulf %59, %60 : vector<32x256xf32>
    %62 = vector.broadcast %27 : vector<1x256xf32> to vector<32x256xf32>
    %63 = arith.addf %61, %62 : vector<32x256xf32>
    %cst_24 = arith.constant 0.000000e+00 : f32
    %64 = vector.broadcast %cst_24 : f32 to vector<32x256xf32>
    %65 = arith.maximumf %63, %64 : vector<32x256xf32>
    %66 = vector.extract_strided_slice %65 {offsets = [1, 0], sizes = [31, 256], strides = [1, 1]} : vector<32x256xf32> to vector<31x256xf32>
    %67 = vector.extract_strided_slice %65 {offsets = [0, 0], sizes = [1, 256], strides = [1, 1]} : vector<32x256xf32> to vector<1x256xf32>
    %68 = tpu.concatenate %66, %67 in 0 : vector<31x256xf32>, vector<1x256xf32> -> vector<32x256xf32>
    %69 = arith.maximumf %65, %68 : vector<32x256xf32>
    %70 = arith.truncf %69 : vector<32x256xf32> to vector<32x256xbf16>
    %cst_25 = arith.constant dense<0.000000e+00> : vector<16x256xf32>
    %71 = tpu.matmul %7, %70, %cst_25 {dimension_numbers = #tpu.dot_dimension_numbers<[1], [0], [0], [1], [0, 0, 1, 1], [], []>} : vector<16x32xbf16>, vector<32x256xbf16>, vector<16x256xf32> -> vector<16x256xf32>
    %c0_i32_26 = arith.constant 0 : i32
    %72 = tpu.memref_slice %arg13[%c0_i32_26] : memref<3x!tpu.dma_semaphore, #tpu.memory_space<semaphore_mem>> -> memref<1x!tpu.dma_semaphore, #tpu.memory_space<semaphore_mem>>
    %73 = tpu.memref_squeeze %72 : memref<1x!tpu.dma_semaphore, #tpu.memory_space<semaphore_mem>> -> memref<!tpu.dma_semaphore, #tpu.memory_space<semaphore_mem>>
    tpu.wait_dma2 semaphore(%73 : memref<!tpu.dma_semaphore, #tpu.memory_space<semaphore_mem>>) src(%arg6 : memref<768x512xbf16, #tpu.memory_space<any>>) dst(%arg10 : memref<768x512xbf16, #tpu.memory_space<vmem>>)
    %c4 = arith.constant 4 : index
    %c0_27 = arith.constant 0 : index
    %74 = vector.load %arg4[%c4, %c0_27] : memref<8x1024xf32, #tpu.memory_space<vmem>>, vector<1x512xf32>
    %c5 = arith.constant 5 : index
    %c0_28 = arith.constant 0 : index
    %75 = vector.load %arg4[%c5, %c0_28] : memref<8x1024xf32, #tpu.memory_space<vmem>>, vector<1x512xf32>
    %76 = tpu.iota {dimensions = array<i32: 0>} : vector<16x256xi32>
    %c0_i32_29 = arith.constant 0 : i32
    %77 = vector.broadcast %c0_i32_29 : i32 to vector<16x256xi32>
    %78 = arith.cmpi ne, %76, %77 : vector<16x256xi32>
    %c7_i32 = arith.constant 7 : i32
    %79 = vector.broadcast %c7_i32 : i32 to vector<16x256xi32>
    %80 = arith.cmpi ne, %76, %79 : vector<16x256xi32>
    %c8_i32 = arith.constant 8 : i32
    %81 = vector.broadcast %c8_i32 : i32 to vector<16x256xi32>
    %82 = arith.cmpi ne, %76, %81 : vector<16x256xi32>
    %83 = arith.andi %78, %82 : vector<16x256xi1>
    %c15_i32_30 = arith.constant 15 : i32
    %84 = vector.broadcast %c15_i32_30 : i32 to vector<16x256xi32>
    %85 = arith.cmpi ne, %76, %84 : vector<16x256xi32>
    %86 = arith.andi %80, %85 : vector<16x256xi1>
    %87 = arith.truncf %71 : vector<16x256xf32> to vector<16x256xbf16>
    %88 = vector.extract_strided_slice %71 {offsets = [15, 0], sizes = [1, 256], strides = [1, 1]} : vector<16x256xf32> to vector<1x256xf32>
    %89 = vector.extract_strided_slice %71 {offsets = [0, 0], sizes = [15, 256], strides = [1, 1]} : vector<16x256xf32> to vector<15x256xf32>
    %90 = tpu.concatenate %88, %89 in 0 : vector<1x256xf32>, vector<15x256xf32> -> vector<16x256xf32>
    %cst_31 = arith.constant 0.000000e+00 : f32
    %91 = vector.broadcast %cst_31 : f32 to vector<16x256xf32>
    %92 = arith.select %83, %90, %91 : vector<16x256xi1>, vector<16x256xf32>
    %93 = arith.truncf %92 : vector<16x256xf32> to vector<16x256xbf16>
    %94 = vector.extract_strided_slice %71 {offsets = [1, 0], sizes = [15, 256], strides = [1, 1]} : vector<16x256xf32> to vector<15x256xf32>
    %95 = vector.extract_strided_slice %71 {offsets = [0, 0], sizes = [1, 256], strides = [1, 1]} : vector<16x256xf32> to vector<1x256xf32>
    %96 = tpu.concatenate %94, %95 in 0 : vector<15x256xf32>, vector<1x256xf32> -> vector<16x256xf32>
    %cst_32 = arith.constant 0.000000e+00 : f32
    %97 = vector.broadcast %cst_32 : f32 to vector<16x256xf32>
    %98 = arith.select %86, %96, %97 : vector<16x256xi1>, vector<16x256xf32>
    %99 = arith.truncf %98 : vector<16x256xf32> to vector<16x256xbf16>
    %c0_33 = arith.constant 0 : index
    %c0_34 = arith.constant 0 : index
    %100 = vector.load %arg10[%c0_33, %c0_34] : memref<768x512xbf16, #tpu.memory_space<vmem>>, vector<256x512xbf16>
    %cst_35 = arith.constant dense<0.000000e+00> : vector<16x512xf32>
    %101 = tpu.matmul %93, %100, %cst_35 {dimension_numbers = #tpu.dot_dimension_numbers<[1], [0], [0], [1], [0, 0, 1, 1], [], []>} : vector<16x256xbf16>, vector<256x512xbf16>, vector<16x512xf32> -> vector<16x512xf32>
    %c256_36 = arith.constant 256 : index
    %c0_37 = arith.constant 0 : index
    %102 = vector.load %arg10[%c256_36, %c0_37] : memref<768x512xbf16, #tpu.memory_space<vmem>>, vector<256x512xbf16>
    %cst_38 = arith.constant dense<0.000000e+00> : vector<16x512xf32>
    %103 = tpu.matmul %87, %102, %cst_38 {dimension_numbers = #tpu.dot_dimension_numbers<[1], [0], [0], [1], [0, 0, 1, 1], [], []>} : vector<16x256xbf16>, vector<256x512xbf16>, vector<16x512xf32> -> vector<16x512xf32>
    %104 = arith.addf %101, %103 : vector<16x512xf32>
    %c512 = arith.constant 512 : index
    %c0_39 = arith.constant 0 : index
    %105 = vector.load %arg10[%c512, %c0_39] : memref<768x512xbf16, #tpu.memory_space<vmem>>, vector<256x512xbf16>
    %cst_40 = arith.constant dense<0.000000e+00> : vector<16x512xf32>
    %106 = tpu.matmul %99, %105, %cst_40 {dimension_numbers = #tpu.dot_dimension_numbers<[1], [0], [0], [1], [0, 0, 1, 1], [], []>} : vector<16x256xbf16>, vector<256x512xbf16>, vector<16x512xf32> -> vector<16x512xf32>
    %107 = arith.addf %104, %106 : vector<16x512xf32>
    %108 = vector.broadcast %74 : vector<1x512xf32> to vector<16x512xf32>
    %109 = arith.mulf %107, %108 : vector<16x512xf32>
    %110 = vector.broadcast %75 : vector<1x512xf32> to vector<16x512xf32>
    %111 = arith.addf %109, %110 : vector<16x512xf32>
    %cst_41 = arith.constant 0.000000e+00 : f32
    %112 = vector.broadcast %cst_41 : f32 to vector<16x512xf32>
    %113 = arith.maximumf %111, %112 : vector<16x512xf32>
    %114 = vector.extract_strided_slice %113 {offsets = [1, 0], sizes = [15, 512], strides = [1, 1]} : vector<16x512xf32> to vector<15x512xf32>
    %115 = vector.extract_strided_slice %113 {offsets = [0, 0], sizes = [1, 512], strides = [1, 1]} : vector<16x512xf32> to vector<1x512xf32>
    %116 = tpu.concatenate %114, %115 in 0 : vector<15x512xf32>, vector<1x512xf32> -> vector<16x512xf32>
    %117 = arith.maximumf %113, %116 : vector<16x512xf32>
    %118 = arith.truncf %117 : vector<16x512xf32> to vector<16x512xbf16>
    %cst_42 = arith.constant dense<0.000000e+00> : vector<8x512xf32>
    %119 = tpu.matmul %8, %118, %cst_42 {dimension_numbers = #tpu.dot_dimension_numbers<[1], [0], [0], [1], [0, 0, 1, 1], [], []>} : vector<8x16xbf16>, vector<16x512xbf16>, vector<8x512xf32> -> vector<8x512xf32>
    %c1_i32_43 = arith.constant 1 : i32
    %120 = tpu.memref_slice %arg13[%c1_i32_43] : memref<3x!tpu.dma_semaphore, #tpu.memory_space<semaphore_mem>> -> memref<1x!tpu.dma_semaphore, #tpu.memory_space<semaphore_mem>>
    %121 = tpu.memref_squeeze %120 : memref<1x!tpu.dma_semaphore, #tpu.memory_space<semaphore_mem>> -> memref<!tpu.dma_semaphore, #tpu.memory_space<semaphore_mem>>
    tpu.wait_dma2 semaphore(%121 : memref<!tpu.dma_semaphore, #tpu.memory_space<semaphore_mem>>) src(%arg7 : memref<512x1024xbf16, #tpu.memory_space<any>>) dst(%arg11 : memref<512x1024xbf16, #tpu.memory_space<vmem>>)
    %c6 = arith.constant 6 : index
    %c0_44 = arith.constant 0 : index
    %122 = vector.load %arg4[%c6, %c0_44] : memref<8x1024xf32, #tpu.memory_space<vmem>>, vector<1x1024xf32>
    %123 = arith.truncf %119 : vector<8x512xf32> to vector<8x512xbf16>
    %c0_45 = arith.constant 0 : index
    %c0_46 = arith.constant 0 : index
    %124 = vector.load %arg11[%c0_45, %c0_46] : memref<512x1024xbf16, #tpu.memory_space<vmem>>, vector<512x1024xbf16>
    %cst_47 = arith.constant dense<0.000000e+00> : vector<8x1024xf32>
    %125 = tpu.matmul %123, %124, %cst_47 {dimension_numbers = #tpu.dot_dimension_numbers<[1], [0], [0], [1], [0, 0, 1, 1], [], []>} : vector<8x512xbf16>, vector<512x1024xbf16>, vector<8x1024xf32> -> vector<8x1024xf32>
    %126 = vector.broadcast %122 : vector<1x1024xf32> to vector<8x1024xf32>
    %127 = arith.addf %125, %126 : vector<8x1024xf32>
    %c2_i32_48 = arith.constant 2 : i32
    %128 = tpu.memref_slice %arg13[%c2_i32_48] : memref<3x!tpu.dma_semaphore, #tpu.memory_space<semaphore_mem>> -> memref<1x!tpu.dma_semaphore, #tpu.memory_space<semaphore_mem>>
    %129 = tpu.memref_squeeze %128 : memref<1x!tpu.dma_semaphore, #tpu.memory_space<semaphore_mem>> -> memref<!tpu.dma_semaphore, #tpu.memory_space<semaphore_mem>>
    tpu.wait_dma2 semaphore(%129 : memref<!tpu.dma_semaphore, #tpu.memory_space<semaphore_mem>>) src(%arg8 : memref<256x1024xbf16, #tpu.memory_space<any>>) dst(%arg12 : memref<256x1024xbf16, #tpu.memory_space<vmem>>)
    %cst_49 = arith.constant 0.000000e+00 : f32
    %130 = vector.broadcast %cst_49 : f32 to vector<2x256xf32>
    %cst_50 = arith.constant 0.000000e+00 : f32
    %131 = vector.broadcast %cst_50 : f32 to vector<2x256xf32>
    %132 = vector.extract_strided_slice %127 {offsets = [0, 0], sizes = [2, 1024], strides = [1, 1]} : vector<8x1024xf32> to vector<2x1024xf32>
    %133 = arith.truncf %130 : vector<2x256xf32> to vector<2x256xbf16>
    %c0_51 = arith.constant 0 : index
    %c0_52 = arith.constant 0 : index
    %134 = vector.load %arg12[%c0_51, %c0_52] : memref<256x1024xbf16, #tpu.memory_space<vmem>>, vector<256x1024xbf16>
    %cst_53 = arith.constant dense<0.000000e+00> : vector<2x1024xf32>
    %135 = tpu.matmul %133, %134, %cst_53 {dimension_numbers = #tpu.dot_dimension_numbers<[1], [0], [0], [1], [0, 0, 1, 1], [], []>} : vector<2x256xbf16>, vector<256x1024xbf16>, vector<2x1024xf32> -> vector<2x1024xf32>
    %136 = arith.addf %132, %135 : vector<2x1024xf32>
    %137 = vector.extract_strided_slice %136 {offsets = [0, 0], sizes = [2, 256], strides = [1, 1]} : vector<2x1024xf32> to vector<2x256xf32>
    %138 = arith.negf %137 : vector<2x256xf32>
    %139 = math.exp %138 : vector<2x256xf32>
    %cst_54 = arith.constant 1.000000e+00 : f32
    %140 = vector.broadcast %cst_54 : f32 to vector<2x256xf32>
    %141 = arith.addf %140, %139 : vector<2x256xf32>
    %142 = arith.divf %140, %141 : vector<2x256xf32>
    %143 = vector.extract_strided_slice %136 {offsets = [0, 256], sizes = [2, 256], strides = [1, 1]} : vector<2x1024xf32> to vector<2x256xf32>
    %144 = arith.negf %143 : vector<2x256xf32>
    %145 = math.exp %144 : vector<2x256xf32>
    %cst_55 = arith.constant 1.000000e+00 : f32
    %146 = vector.broadcast %cst_55 : f32 to vector<2x256xf32>
    %147 = arith.addf %146, %145 : vector<2x256xf32>
    %148 = arith.divf %146, %147 : vector<2x256xf32>
    %149 = vector.extract_strided_slice %136 {offsets = [0, 512], sizes = [2, 256], strides = [1, 1]} : vector<2x1024xf32> to vector<2x256xf32>
    %150 = math.tanh %149 : vector<2x256xf32>
    %151 = vector.extract_strided_slice %136 {offsets = [0, 768], sizes = [2, 256], strides = [1, 1]} : vector<2x1024xf32> to vector<2x256xf32>
    %152 = arith.negf %151 : vector<2x256xf32>
    %153 = math.exp %152 : vector<2x256xf32>
    %cst_56 = arith.constant 1.000000e+00 : f32
    %154 = vector.broadcast %cst_56 : f32 to vector<2x256xf32>
    %155 = arith.addf %154, %153 : vector<2x256xf32>
    %156 = arith.divf %154, %155 : vector<2x256xf32>
    %157 = arith.mulf %148, %131 : vector<2x256xf32>
    %158 = arith.mulf %142, %150 : vector<2x256xf32>
    %159 = arith.addf %157, %158 : vector<2x256xf32>
    %160 = math.tanh %159 : vector<2x256xf32>
    %161 = arith.mulf %156, %160 : vector<2x256xf32>
    %162 = vector.extract_strided_slice %127 {offsets = [2, 0], sizes = [2, 1024], strides = [1, 1]} : vector<8x1024xf32> to vector<2x1024xf32>
    %163 = arith.truncf %161 : vector<2x256xf32> to vector<2x256xbf16>
    %c0_57 = arith.constant 0 : index
    %c0_58 = arith.constant 0 : index
    %164 = vector.load %arg12[%c0_57, %c0_58] : memref<256x1024xbf16, #tpu.memory_space<vmem>>, vector<256x1024xbf16>
    %cst_59 = arith.constant dense<0.000000e+00> : vector<2x1024xf32>
    %165 = tpu.matmul %163, %164, %cst_59 {dimension_numbers = #tpu.dot_dimension_numbers<[1], [0], [0], [1], [0, 0, 1, 1], [], []>} : vector<2x256xbf16>, vector<256x1024xbf16>, vector<2x1024xf32> -> vector<2x1024xf32>
    %166 = arith.addf %162, %165 : vector<2x1024xf32>
    %167 = vector.extract_strided_slice %166 {offsets = [0, 0], sizes = [2, 256], strides = [1, 1]} : vector<2x1024xf32> to vector<2x256xf32>
    %168 = arith.negf %167 : vector<2x256xf32>
    %169 = math.exp %168 : vector<2x256xf32>
    %cst_60 = arith.constant 1.000000e+00 : f32
    %170 = vector.broadcast %cst_60 : f32 to vector<2x256xf32>
    %171 = arith.addf %170, %169 : vector<2x256xf32>
    %172 = arith.divf %170, %171 : vector<2x256xf32>
    %173 = vector.extract_strided_slice %166 {offsets = [0, 256], sizes = [2, 256], strides = [1, 1]} : vector<2x1024xf32> to vector<2x256xf32>
    %174 = arith.negf %173 : vector<2x256xf32>
    %175 = math.exp %174 : vector<2x256xf32>
    %cst_61 = arith.constant 1.000000e+00 : f32
    %176 = vector.broadcast %cst_61 : f32 to vector<2x256xf32>
    %177 = arith.addf %176, %175 : vector<2x256xf32>
    %178 = arith.divf %176, %177 : vector<2x256xf32>
    %179 = vector.extract_strided_slice %166 {offsets = [0, 512], sizes = [2, 256], strides = [1, 1]} : vector<2x1024xf32> to vector<2x256xf32>
    %180 = math.tanh %179 : vector<2x256xf32>
    %181 = vector.extract_strided_slice %166 {offsets = [0, 768], sizes = [2, 256], strides = [1, 1]} : vector<2x1024xf32> to vector<2x256xf32>
    %182 = arith.negf %181 : vector<2x256xf32>
    %183 = math.exp %182 : vector<2x256xf32>
    %cst_62 = arith.constant 1.000000e+00 : f32
    %184 = vector.broadcast %cst_62 : f32 to vector<2x256xf32>
    %185 = arith.addf %184, %183 : vector<2x256xf32>
    %186 = arith.divf %184, %185 : vector<2x256xf32>
    %187 = arith.mulf %178, %159 : vector<2x256xf32>
    %188 = arith.mulf %172, %180 : vector<2x256xf32>
    %189 = arith.addf %187, %188 : vector<2x256xf32>
    %190 = math.tanh %189 : vector<2x256xf32>
    %191 = arith.mulf %186, %190 : vector<2x256xf32>
    %192 = vector.extract_strided_slice %127 {offsets = [4, 0], sizes = [2, 1024], strides = [1, 1]} : vector<8x1024xf32> to vector<2x1024xf32>
    %193 = arith.truncf %191 : vector<2x256xf32> to vector<2x256xbf16>
    %c0_63 = arith.constant 0 : index
    %c0_64 = arith.constant 0 : index
    %194 = vector.load %arg12[%c0_63, %c0_64] : memref<256x1024xbf16, #tpu.memory_space<vmem>>, vector<256x1024xbf16>
    %cst_65 = arith.constant dense<0.000000e+00> : vector<2x1024xf32>
    %195 = tpu.matmul %193, %194, %cst_65 {dimension_numbers = #tpu.dot_dimension_numbers<[1], [0], [0], [1], [0, 0, 1, 1], [], []>} : vector<2x256xbf16>, vector<256x1024xbf16>, vector<2x1024xf32> -> vector<2x1024xf32>
    %196 = arith.addf %192, %195 : vector<2x1024xf32>
    %197 = vector.extract_strided_slice %196 {offsets = [0, 0], sizes = [2, 256], strides = [1, 1]} : vector<2x1024xf32> to vector<2x256xf32>
    %198 = arith.negf %197 : vector<2x256xf32>
    %199 = math.exp %198 : vector<2x256xf32>
    %cst_66 = arith.constant 1.000000e+00 : f32
    %200 = vector.broadcast %cst_66 : f32 to vector<2x256xf32>
    %201 = arith.addf %200, %199 : vector<2x256xf32>
    %202 = arith.divf %200, %201 : vector<2x256xf32>
    %203 = vector.extract_strided_slice %196 {offsets = [0, 256], sizes = [2, 256], strides = [1, 1]} : vector<2x1024xf32> to vector<2x256xf32>
    %204 = arith.negf %203 : vector<2x256xf32>
    %205 = math.exp %204 : vector<2x256xf32>
    %cst_67 = arith.constant 1.000000e+00 : f32
    %206 = vector.broadcast %cst_67 : f32 to vector<2x256xf32>
    %207 = arith.addf %206, %205 : vector<2x256xf32>
    %208 = arith.divf %206, %207 : vector<2x256xf32>
    %209 = vector.extract_strided_slice %196 {offsets = [0, 512], sizes = [2, 256], strides = [1, 1]} : vector<2x1024xf32> to vector<2x256xf32>
    %210 = math.tanh %209 : vector<2x256xf32>
    %211 = vector.extract_strided_slice %196 {offsets = [0, 768], sizes = [2, 256], strides = [1, 1]} : vector<2x1024xf32> to vector<2x256xf32>
    %212 = arith.negf %211 : vector<2x256xf32>
    %213 = math.exp %212 : vector<2x256xf32>
    %cst_68 = arith.constant 1.000000e+00 : f32
    %214 = vector.broadcast %cst_68 : f32 to vector<2x256xf32>
    %215 = arith.addf %214, %213 : vector<2x256xf32>
    %216 = arith.divf %214, %215 : vector<2x256xf32>
    %217 = arith.mulf %208, %189 : vector<2x256xf32>
    %218 = arith.mulf %202, %210 : vector<2x256xf32>
    %219 = arith.addf %217, %218 : vector<2x256xf32>
    %220 = math.tanh %219 : vector<2x256xf32>
    %221 = arith.mulf %216, %220 : vector<2x256xf32>
    %222 = vector.extract_strided_slice %127 {offsets = [6, 0], sizes = [2, 1024], strides = [1, 1]} : vector<8x1024xf32> to vector<2x1024xf32>
    %223 = arith.truncf %221 : vector<2x256xf32> to vector<2x256xbf16>
    %c0_69 = arith.constant 0 : index
    %c0_70 = arith.constant 0 : index
    %224 = vector.load %arg12[%c0_69, %c0_70] : memref<256x1024xbf16, #tpu.memory_space<vmem>>, vector<256x1024xbf16>
    %cst_71 = arith.constant dense<0.000000e+00> : vector<2x1024xf32>
    %225 = tpu.matmul %223, %224, %cst_71 {dimension_numbers = #tpu.dot_dimension_numbers<[1], [0], [0], [1], [0, 0, 1, 1], [], []>} : vector<2x256xbf16>, vector<256x1024xbf16>, vector<2x1024xf32> -> vector<2x1024xf32>
    %226 = arith.addf %222, %225 : vector<2x1024xf32>
    %227 = vector.extract_strided_slice %226 {offsets = [0, 0], sizes = [2, 256], strides = [1, 1]} : vector<2x1024xf32> to vector<2x256xf32>
    %228 = arith.negf %227 : vector<2x256xf32>
    %229 = math.exp %228 : vector<2x256xf32>
    %cst_72 = arith.constant 1.000000e+00 : f32
    %230 = vector.broadcast %cst_72 : f32 to vector<2x256xf32>
    %231 = arith.addf %230, %229 : vector<2x256xf32>
    %232 = arith.divf %230, %231 : vector<2x256xf32>
    %233 = vector.extract_strided_slice %226 {offsets = [0, 256], sizes = [2, 256], strides = [1, 1]} : vector<2x1024xf32> to vector<2x256xf32>
    %234 = arith.negf %233 : vector<2x256xf32>
    %235 = math.exp %234 : vector<2x256xf32>
    %cst_73 = arith.constant 1.000000e+00 : f32
    %236 = vector.broadcast %cst_73 : f32 to vector<2x256xf32>
    %237 = arith.addf %236, %235 : vector<2x256xf32>
    %238 = arith.divf %236, %237 : vector<2x256xf32>
    %239 = vector.extract_strided_slice %226 {offsets = [0, 512], sizes = [2, 256], strides = [1, 1]} : vector<2x1024xf32> to vector<2x256xf32>
    %240 = math.tanh %239 : vector<2x256xf32>
    %241 = vector.extract_strided_slice %226 {offsets = [0, 768], sizes = [2, 256], strides = [1, 1]} : vector<2x1024xf32> to vector<2x256xf32>
    %242 = arith.negf %241 : vector<2x256xf32>
    %243 = math.exp %242 : vector<2x256xf32>
    %cst_74 = arith.constant 1.000000e+00 : f32
    %244 = vector.broadcast %cst_74 : f32 to vector<2x256xf32>
    %245 = arith.addf %244, %243 : vector<2x256xf32>
    %246 = arith.divf %244, %245 : vector<2x256xf32>
    %247 = arith.mulf %238, %219 : vector<2x256xf32>
    %248 = arith.mulf %232, %240 : vector<2x256xf32>
    %249 = arith.addf %247, %248 : vector<2x256xf32>
    %250 = math.tanh %249 : vector<2x256xf32>
    %251 = arith.mulf %246, %250 : vector<2x256xf32>
    %c7 = arith.constant 7 : index
    %c0_75 = arith.constant 0 : index
    %252 = vector.load %arg4[%c7, %c0_75] : memref<8x1024xf32, #tpu.memory_space<vmem>>, vector<1x128xf32>
    %253 = arith.truncf %251 : vector<2x256xf32> to vector<2x256xbf16>
    %c0_76 = arith.constant 0 : index
    %c0_77 = arith.constant 0 : index
    %254 = vector.load %arg3[%c0_76, %c0_77] : memref<256x128xbf16, #tpu.memory_space<vmem>>, vector<256x128xbf16>
    %cst_78 = arith.constant dense<0.000000e+00> : vector<2x128xf32>
    %255 = tpu.matmul %253, %254, %cst_78 {dimension_numbers = #tpu.dot_dimension_numbers<[1], [0], [0], [1], [0, 0, 1, 1], [], []>} : vector<2x256xbf16>, vector<256x128xbf16>, vector<2x128xf32> -> vector<2x128xf32>
    %256 = vector.broadcast %252 : vector<1x128xf32> to vector<2x128xf32>
    %257 = arith.addf %255, %256 : vector<2x128xf32>
    %c0_79 = arith.constant 0 : index
    %c0_80 = arith.constant 0 : index
    %258 = vector.load %arg9[%c0_79, %c0_80] : memref<2x128xf32, #tpu.memory_space<vmem>>, vector<2x128xf32>
    tpu.vector_store %arg9[%c0_79, %c0_80], %257 {strides = array<i32>} : memref<2x128xf32, #tpu.memory_space<vmem>>, vector<2x128xf32>,
    return
  }
}

</mosaic_0001>

<bundles_post_ra>
// kernel: cnn_lstm_forward.1
= control target key start
LH: loop header
LB: loop body
LE: loop exit
PB: predicated region body
PF: predicated region fallthrough
CT: control target
= control target key end

     0   :  { %14 = vsyncpa [#allocation7], 0  ;;  %s5700_s0 = inlined_call_operand.vmem [shape: bf16[64,8], index: 0, kind: input, shape index: {}]   ;;  %s5701_s1 = inlined_call_operand.hbm [shape: bf16[8,128], index: 1, kind: input, shape index: {}]   ;;  %s5702_s2 = inlined_call_operand.hbm [shape: bf16[384,256], index: 2, kind: input, shape index: {}]   ;;  %s5703_s3 = inlined_call_operand.vmem [shape: bf16[256,128], index: 3, kind: input, shape index: {}]   ;;  %s5704_s4 = inlined_call_operand.hbm [shape: f32[8,1024], index: 4, kind: input, shape index: {}]   ;;  %s5705_s5 = inlined_call_operand.vmem [shape: bf16[56,64], index: 5, kind: input, shape index: {}]   ;;  %s5706_s6 = inlined_call_operand.hbm [shape: bf16[768,512], index: 6, kind: input, shape index: {}]   ;;  %s5707_s7 = inlined_call_operand.hbm [shape: bf16[512,1024], index: 7, kind: input, shape index: {}]   ;;  %s5708_s8 = inlined_call_operand.hbm [shape: bf16[256,1024], index: 8, kind: input, shape index: {}]   ;;  %s5709_s9 = inlined_call_operand.vmem [shape: f32[2,128], index: 9, kind: output, shape index: {}]  }
   0x1   :  { %15 = vsyncpa [#allocation9], 0  ;;  %s4493_s30 = smov [#allocation8]   ;;  %s4417_s13 = scalar_lea.hbm %s5702_s2, 6144 }
   0x2   :  { %s33_s10 = sshll.u32 %s4493_s30, 4  ;;  %p4418_p0 = scmp.ne.s32.totalorder %s5702_s2, %s4417_s13  ;;  %s34_s10 = int_to_ptr.vmem [resolvable:$true] %s33_s10 }
   0x3   :  { %p4421_p1 = scmp.lt.u32.totalorder %s4417_s13, %s5702_s2 }
   0x5   :  { %p4423_p2 = pnand %p4421_p1, %p4418_p0 }
   0x7   :  { %4426 = shalt.err (!%p4423_p2)
}
   0x8   :  { %s4427_s18 = scalar_lea.vmem %s34_s10, 6144  ;;  %p4432_p4 = scmp.lt.s32.totalorder %s34_s10, %s34_s10 }
   0x9   :  { %p4428_p3 = scmp.ne.s32.totalorder %s34_s10, %s4427_s18  ;;  %p4433_p5 = scmp.lt.s32.totalorder %s4427_s18, %s4427_s18 }
   0xb   :  { %p4434_p6 = por %p4433_p5, %p4432_p4 }
   0xd   :  { %p4435_p7 = pnand %p4434_p6, %p4428_p3 }
   0xf   :  { %4438 = shalt.err (!%p4435_p7)
}
  0x10   :  { %s4494_s19 = smov 128   ;;  %s4495_s20 = smov 8  }
  0x11   :  { %39 = dma.hbm_to_vmem [thread:$0]  %s5702_s2, 6144, %s34_s10, [#allocation9], %s4494_s19, %s4494_s19, %s4495_s20  }
  0x12   :  { %s4496_s23 = smov [#allocation6]   ;;  %s4497_s25 = smov [#allocation10]  }
  0x13   :  { %s24_s24 = sshll.u32 %s4496_s23, 4  ;;  %s48_s26 = sshll.u32 %s4497_s25, 4  ;;  %s25_s24 = int_to_ptr.vmem [resolvable:$true] %s24_s24  ;;  %s49_s26 = int_to_ptr.vmem [resolvable:$true] %s48_s26 }
  0x14   :  { %s4439_s29 = scalar_lea.hbm %s5701_s1, 64 }
  0x15   :  { %p4440_p8 = scmp.ne.s32.totalorder %s5701_s1, %s4439_s29  ;;  %p4443_p9 = scmp.lt.u32.totalorder %s4439_s29, %s5701_s1 }
  0x17   :  { %p4445_p10 = pnand %p4443_p9, %p4440_p8 }
  0x19   :  { %4448 = shalt.err (!%p4445_p10)
}
  0x1a   :  { %s4449_s2 = scalar_lea.vmem %s25_s24, 64  ;;  %p4454_p12 = scmp.lt.s32.totalorder %s25_s24, %s25_s24 }
  0x1b   :  { %p4450_p11 = scmp.ne.s32.totalorder %s25_s24, %s4449_s2  ;;  %p4455_p13 = scmp.lt.s32.totalorder %s4449_s2, %s4449_s2 }
  0x1d   :  { %p4456_p0 = por %p4455_p13, %p4454_p12 }
  0x1f   :  { %p4457_p1 = pnand %p4456_p0, %p4450_p11 }
  0x21   :  { %4460 = shalt.err (!%p4457_p1)
}
  0x22   :  { %27 = dma.hbm_to_vmem [thread:$0]  %s5701_s1, 64, %s25_s24, [#allocation7]  }
  0x23   :  { %s4461_s17 = scalar_lea.hbm %s5704_s4, 1024 }
  0x24   :  { %p4462_p2 = scmp.ne.s32.totalorder %s5704_s4, %s4461_s17  ;;  %p4465_p3 = scmp.lt.u32.totalorder %s4461_s17, %s5704_s4 }
  0x26   :  { %p4467_p4 = pnand %p4465_p3, %p4462_p2 }
  0x28   :  { %4470 = shalt.err (!%p4467_p4)
}
  0x29   :  { %s4471_s25 = scalar_lea.vmem %s49_s26, 1024  ;;  %p4476_p6 = scmp.lt.s32.totalorder %s49_s26, %s49_s26 }
  0x2a   :  { %p4472_p5 = scmp.ne.s32.totalorder %s49_s26, %s4471_s25  ;;  %p4477_p7 = scmp.lt.s32.totalorder %s4471_s25, %s4471_s25 }
  0x2c   :  { %p4478_p8 = por %p4477_p7, %p4476_p6 }
  0x2e   :  { %p4479_p9 = pnand %p4478_p8, %p4472_p5 }
  0x30   :  { %4482 = shalt.err (!%p4479_p9)
}
  0x31   :  { %51 = dma.hbm_to_vmem [thread:$0]  %s5704_s4, 1024, %s49_s26, [#allocation9]  }
  0x32   :  { %4483 = dma.done.wait [#allocation7], 64  }
  0x33   :  { %4484 = vsyncadd [#allocation7], 4294967232 }
  0x34   :  { %4485 = dma.done.wait [#allocation9], 7168  }
  0x35   :  { %4486 = vsyncadd [#allocation9], 4294960128  ;;  %s68_s27 = sld [smem:[#allocation0]]   ;;  %s4498_s28 = smov 64   ;;  %vm220_vm0 = vcmask 1043456   ;;  %vm207_vm1 = vcmask 64512  }
  0x36   :  { %86 = sst [smem:[#allocation12 + $0x3]] %s4498_s28  ;;  %s4499_s29 = smov 256   ;;  %vm369_vm2 = vcmask 523264   ;;  %vm321_vm3 = vcmask 1046528   ;;  %vm466_vm4 = vcmask 1040384   ;;  %vm4514_vm6 = vmmov 1  }
  0x37   :  { %88 = sst [smem:[#allocation12 + $0x4]] %s4494_s19  ;;  %s4500_s30 = smov [#allocation2]   ;;  %vm1055_vm14 = vcmask 261120  }
  0x38   :  { %92 = sst [smem:[#allocation12 + $0x6]] %s4499_s29  ;;  %s76_s11 = sshll.u32 %s4500_s30, 4  ;;  %s77_s11 = int_to_ptr.vmem [resolvable:$true] %s76_s11 }
  0x39   :  { %94 = sst [smem:[#allocation12 + $0x7]] %s4498_s28  ;;  %s4501_s12 = smov 512  }
  0x3a   :  { %80 = sst [smem:[#allocation12]] %s4501_s12  ;;  %s4502_s13 = smov 4  }
  0x3b   :  { %s3783_s4 = sshll.u32 %s68_s27, 26  ;;  %82 = sst [smem:[#allocation12 + $0x1]] %s4501_s12 }
  0x3c   :  { %s4609_s26 = sadd.s32 134217728, %s3783_s4  ;;  %84 = sst [smem:[#allocation12 + $0x2]] %s4502_s13 }
  0x3d   :  { %s4503_s2 = smov 2   ;;  %96 = sst [smem:[#allocation12 + $0x8]] %s4502_s13 }
  0x3e   :  { %90 = sst [smem:[#allocation12 + $0x5]] %s4503_s2  ;;  %s4504_s10 = smov [#allocation5]  }
  0x3f   :  { %s4505_s14 = smov [#allocation11]   ;;  %s4506_s17 = smov 1024  }
  0x40   :  { %98 = dma.general %s5706_s6, 24576, %s77_s11, %s4504_s10, %s4505_s14, [#allocation12], %s4609_s26, 0  }
  0x41   :  { %119 = sst [smem:[#allocation14 + $0x2]] %s4495_s20  ;;  %s4507_s18 = smov [#allocation3]  }
  0x42   :  { %115 = sst [smem:[#allocation14]] %s4506_s17  ;;  %s111_s21 = sshll.u32 %s4507_s18, 4  ;;  %s112_s21 = int_to_ptr.vmem [resolvable:$true] %s111_s21 }
  0x43   :  { %117 = sst [smem:[#allocation14 + $0x1]] %s4506_s17  ;;  %s4508_s6 = smov [#allocation5 + $0x1]  }
  0x44   :  { %121 = sst [smem:[#allocation14 + $0x3]] %s4498_s28  ;;  %s4509_s22 = smov [#allocation13]  }
  0x45   :  { %123 = sst [smem:[#allocation14 + $0x4]] %s4494_s19  ;;  %s4510_s1 = smov [#allocation4]  }
  0x46   :  { %125 = sst [smem:[#allocation14 + $0x5]] %s4503_s2  ;;  %s146_s24 = sshll.u32 %s4510_s1, 4  ;;  %s147_s24 = int_to_ptr.vmem [resolvable:$true] %s146_s24 }
  0x47   :  { %127 = sst [smem:[#allocation14 + $0x6]] %s4501_s12  ;;  %s4512_s27 = smov [#allocation15]  }
  0x48   :  { %129 = sst [smem:[#allocation14 + $0x7]] %s4498_s28 }
  0x49   :  { %131 = sst [smem:[#allocation14 + $0x8]] %s4502_s13 }
  0x4a   :  { %133 = dma.general %s5707_s7, 32768, %s112_s21, %s4508_s6, %s4509_s22, [#allocation14], %s4609_s26, 0  }
  0x4b   :  { %150 = sst [smem:[#allocation16]] %s4506_s17  ;;  %s4511_s7 = smov [#allocation5 + $0x2]  }
  0x4c   :  { %152 = sst [smem:[#allocation16 + $0x1]] %s4506_s17 }
  0x4d   :  { %154 = sst [smem:[#allocation16 + $0x2]] %s4495_s20 }
  0x4e   :  { %156 = sst [smem:[#allocation16 + $0x3]] %s4498_s28 }
  0x4f   :  { %158 = sst [smem:[#allocation16 + $0x4]] %s4494_s19 }
  0x50   :  { %160 = sst [smem:[#allocation16 + $0x5]] %s4503_s2 }
  0x51   :  { %162 = sst [smem:[#allocation16 + $0x6]] %s4501_s12 }
  0x52   :  { %164 = sst [smem:[#allocation16 + $0x7]] %s4498_s28 }
  0x53   :  { %166 = sst [smem:[#allocation16 + $0x8]] %s4502_s13 }
  0x54   :  { %168 = dma.general %s5708_s8, 16384, %s147_s24, %s4511_s7, %s4512_s27, [#allocation16], %s4609_s26, 0  }
  0x55   :  { %v4643_v0 = vld [vmem:[%s5705_s5 + $0x18] sm:$0xf]  ;;  %v186_v1 = vld [vmem:[#allocation6] sm:$0xf]  ;;  %v4067_v4 = vld [vmem:[%s5700_s0 + $0x8] sm:$0xff]  }
  0x56   :  { %4043 = vmatprep.subr.msk.bf16.mxu0 %vm220_vm0, %v186_v1  ;;  %v222_v2 = vsel %vm220_vm0, %v186_v1, 0  ;;  %v4066_v3 = vld [vmem:[%s5700_s0] sm:$0xff]   ;;  %v4068_v5 = vld [vmem:[%s5700_s0 + $0x10] sm:$0xff]   ;;  %v4069_v6 = vld [vmem:[%s5700_s0 + $0x18] sm:$0xff]  }
  0x57   :  { %3966 = vmatpush3.bf16.msra.mxu0 %v222_v2  ;;  %3967 = vmatprep.mubr.msk.bf16.mxu0 %vm207_vm1, %v4066_v3  ;;  %v4070_v7 = vld [vmem:[%s5705_s5] sm:$0xff]   ;;  %v4074_v9 = vld [vmem:[#allocation8 + $0x84] ss:$8 sps:$4 sm:$0xff]   ;;  %v4075_v11 = vld [vmem:[#allocation8 + $0x90] ss:$8 sps:$4 sm:$0xff]  }
  0x58   :  { %3983 = vmatprep.mubr.msk.bf16.mxu1 %vm369_vm2, %v4070_v7  ;;  %v4072_v8 = vld [vmem:[#allocation8 + $0x80] ss:$8 sps:$4 sm:$0xff]   ;;  %v4077_v10 = vld [vmem:[#allocation8 + $0x94] ss:$8 sps:$4 sm:$0xff]   ;;  %615 = vmatprep.subr.bf16.mxu0 %v4074_v9  ;;  %v4080_v12 = vld [vmem:[#allocation8 + $0xa4] ss:$8 sps:$4 sm:$0xff]  }
  0x59   :  { %v4078_v13 = vld [vmem:[#allocation8 + $0xa0] ss:$8 sps:$4 sm:$0xff]   ;;  %v4083_v14 = vld [vmem:[#allocation8 + $0xb4] ss:$8 sps:$4 sm:$0xff]   ;;  %v4081_v15 = vld [vmem:[#allocation8 + $0xb0] ss:$8 sps:$4 sm:$0xff]  }
  0x5a   :  { %3968 = vmatmul.mubr.msk.bf16.vlgmr.msra.gmra.mrb[0].mxu0 %vm207_vm1, %v4067_v4  ;;  %v4086_v16 = vld [vmem:[#allocation8 + $0xc4] ss:$8 sps:$4 sm:$0xff]   ;;  %v4084_v17 = vld [vmem:[#allocation8 + $0xc0] ss:$8 sps:$4 sm:$0xff]   ;;  %v4089_v18 = vld [vmem:[#allocation8 + $0xd4] ss:$8 sps:$4 sm:$0xff]  }
  0x5b   :  { %3971 = vmatprep.mubr.msk.bf16.mxu0 %vm207_vm1, %v4068_v5  ;;  %616 = vmatpush1.bf16.msra.mxu0 %v4072_v8  ;;  %v4087_v19 = vld [vmem:[#allocation8 + $0xd0] ss:$8 sps:$4 sm:$0xff]   ;;  %v4092_v20 = vld [vmem:[#allocation8 + $0xe4] ss:$8 sps:$4 sm:$0xff]   ;;  %v4090_v21 = vld [vmem:[#allocation8 + $0xe0] ss:$8 sps:$4 sm:$0xff]  }
  0x5c   :  { %617 = vmatprep.subr.bf16.mxu0 %v4077_v10  ;;  %v176_v22 = vld [vmem:[#allocation10] ss:$0 sm:$0xff]  ;;  %v177_v23 = vld [vmem:[#allocation10 + $0x1] ss:$0 sm:$0xff] }
  0x5f   :  { %618 = vmatpush1.bf16.msra.mxu0 %v4075_v11 }
  0x60   :  { %619 = vmatprep.subr.bf16.mxu0 %v4080_v12 }
  0x62   :  { %3972 = vmatmul.mubr.msk.bf16.gmra.mrb[4].mxu0 %vm207_vm1, %v4069_v6 }
  0x63   :  { %620 = vmatpush1.bf16.msra.mxu0 %v4078_v13 }
  0x64   :  { %621 = vmatprep.subr.bf16.mxu0 %v4083_v14 }
  0x67   :  { %622 = vmatpush1.bf16.msra.mxu0 %v4081_v15 }
  0x68   :  { %623 = vmatprep.subr.bf16.mxu0 %v4086_v16 }
  0x6b   :  { %624 = vmatpush1.bf16.msra.mxu0 %v4084_v17 }
  0x6c   :  { %625 = vmatprep.subr.bf16.mxu0 %v4089_v18 }
  0x6f   :  { %626 = vmatpush1.bf16.msra.mxu0 %v4087_v19 }
  0x70   :  { %627 = vmatprep.subr.bf16.mxu0 %v4092_v20 }
  0x73   :  { %628 = vmatpush1.bf16.msra.mxu0 %v4090_v21  ;;  %v4071_v21 = vld [vmem:[%s5705_s5 + $0x8] sm:$0xff]  }
 0x12d   :  { %v3969_v24 = vpop.f32.mrb[0].mxu0 }
 0x12e   :  { %v291_v25 = vmul.f32 %v3969_v24, %v176_v22  ;;  %v258_v26 = vpop.f32.mrb[1].mxu0  ;;  %v4098_v24 = vld [vmem:[#allocation8 + $0x4] ss:$8 sps:$4 sm:$0xff]  }
 0x12f   :  { %v289_v27 = vmul.f32 %v258_v26, %v176_v22  ;;  %v3970_v28 = vpop.f32.mrb[2].mxu0 }
 0x130   :  { %v299_v29 = vadd.f32 %v291_v25, %v177_v23  ;;  %v292_v30 = vmul.f32 %v3970_v28, %v176_v22  ;;  %v261_v31 = vpop.f32.mrb[3].mxu0  ;;  %v5710_v25 = vmov 0  }
 0x131   :  { %v297_v32 = vadd.f32 %v289_v27, %v177_v23  ;;  %v290_v33 = vmul.f32 %v261_v31, %v176_v22  ;;  %647 = vmatprep.mubr.bf16.mxu0 %v5710_v25 }
 0x132   :  { %v307_v34 = vmax.f32 %v299_v29, 0.0  ;;  %v300_v35 = vadd.f32 %v292_v30, %v177_v23 }
 0x133   :  { %v305_v36 = vmax.f32 %v297_v32, 0.0  ;;  %v298_v37 = vadd.f32 %v290_v33, %v177_v23 }
 0x134   :  { %v308_v38 = vmax.f32 %v300_v35, 0.0  ;;  %v325_v41 = vrot.slane %v307_v34, 1 }
 0x135   :  { %v306_v39 = vmax.f32 %v298_v37, 0.0  ;;  %v3973_v40 = vpop.f32.mrb[4].mxu0  ;;  %v322_v45 = vrot.slane %v305_v36, 1  ;;  %v4096_v37 = vld [vmem:[#allocation8] ss:$8 sps:$4 sm:$0xff]  }
 0x136   :  { %v327_v42 = vrot.slane %v308_v38, 1  ;;  %v295_v43 = vmul.f32 %v3973_v40, %v176_v22  ;;  %v274_v44 = vpop.f32.mrb[5].mxu0 }
 0x137   :  { %v323_v46 = vrot.slane %v306_v39, 1  ;;  %v293_v47 = vmul.f32 %v274_v44, %v176_v22  ;;  %v3974_v48 = vpop.f32.mrb[6].mxu0 }
 0x138   :  { %v303_v49 = vadd.f32 %v295_v43, %v177_v23  ;;  %v296_v50 = vmul.f32 %v3974_v48, %v176_v22  ;;  %v277_v51 = vpop.f32.mrb[7].mxu0  ;;  %v328_v52 = vsel %vm321_vm3, %v325_v41, %v327_v42 }
 0x139   :  { %v301_v53 = vadd.f32 %v293_v47, %v177_v23  ;;  %v294_v54 = vmul.f32 %v277_v51, %v176_v22  ;;  %v324_v55 = vsel %vm321_vm3, %v322_v45, %v323_v46  ;;  %v326_v56 = vsel %vm321_vm3, %v323_v46, %v325_v41  ;;  %v4095_v22 = vld [vmem:[#allocation8 + $0xf4] ss:$8 sps:$4 sm:$0xff]  }
 0x13a   :  { %v311_v57 = vmax.f32 %v303_v49, 0.0  ;;  %v304_v58 = vadd.f32 %v296_v50, %v177_v23  ;;  %v347_v59 = vmax.f32 %v305_v36, %v324_v55  ;;  %v348_v60 = vmax.f32 %v306_v39, %v326_v56  ;;  %629 = vmatprep.subr.bf16.mxu0 %v4095_v22  ;;  %v4101_v41 = vld [vmem:[#allocation8 + $0x14] ss:$8 sps:$4 sm:$0xff]   ;;  %v4102_v56 = vld [vmem:[#allocation8 + $0x20] ss:$8 sps:$4 sm:$0xff]  }
 0x13b   :  { %v309_v61 = vmax.f32 %v301_v53, 0.0  ;;  %v302_v62 = vadd.f32 %v294_v54, %v177_v23  ;;  %v349_v63 = vmax.f32 %v307_v34, %v328_v52  ;;  %v4093_v23 = vld [vmem:[#allocation8 + $0xf0] ss:$8 sps:$4 sm:$0xff]   ;;  %v4104_v54 = vld [vmem:[#allocation8 + $0x24] ss:$8 sps:$4 sm:$0xff]  }
 0x13c   :  { %v312_v1 = vmax.f32 %v304_v58, 0.0  ;;  %v355_v2 = vpack.c.bf16 %v348_v60, %v347_v59  ;;  %v333_v5 = vrot.slane %v311_v57, 1  ;;  %630 = vmatpush1.bf16.msra.mxu0 %v4093_v23  ;;  %v4099_v52 = vld [vmem:[#allocation8 + $0x10] ss:$8 sps:$4 sm:$0xff]   ;;  %v4110_v59 = vld [vmem:[#allocation8 + $0x44] ss:$8 sps:$4 sm:$0xff]  }
 0x13d   :  { %v329_v3 = vrot.slane %v309_v61, 1  ;;  %v310_v4 = vmax.f32 %v302_v62, 0.0  ;;  %748 = vmatprep.subr.bf16.mxu0 %v4098_v24  ;;  %v4105_v58 = vld [vmem:[#allocation8 + $0x30] ss:$8 sps:$4 sm:$0xff]   ;;  %v4108_v60 = vld [vmem:[#allocation8 + $0x40] ss:$8 sps:$4 sm:$0xff]  }
 0x13e   :  { %v335_v6 = vrot.slane %v312_v1, 1  ;;  %3975 = vmatprep.subr.bf16.mxu1 %v355_v2  ;;  %v4111_v62 = vld [vmem:[#allocation8 + $0x50] ss:$8 sps:$4 sm:$0xff]  }
 0x13f   :  { %v331_v7 = vrot.slane %v310_v4, 1  ;;  %3976 = vmatpush3.bf16.msra.mxu1 %v355_v2  ;;  %v330_v8 = vsel %vm321_vm3, %v327_v42, %v329_v3  ;;  %v4114_v2 = vld [vmem:[#allocation8 + $0x60] ss:$8 sps:$4 sm:$0xff]   ;;  %v4141_v23 = vld [vmem:[#allocation8 + $0x170] ss:$8 sps:$4 sm:$0xff]  }
 0x140   :  { %v346_v9 = vsel %vm321_vm3, %v335_v6, %v322_v45  ;;  %v350_v10 = vmax.f32 %v308_v38, %v330_v8  ;;  %v336_v11 = vsel %vm321_vm3, %v333_v5, %v335_v6  ;;  %v4122_v6 = vld [vmem:[#allocation8 + $0x104] ss:$8 sps:$4 sm:$0xff]   ;;  %v4125_v8 = vld [vmem:[#allocation8 + $0x114] ss:$8 sps:$4 sm:$0xff]  }
 0x141   :  { %v354_v12 = vmax.f32 %v312_v1, %v346_v9  ;;  %v334_v13 = vsel %vm321_vm3, %v331_v7, %v333_v5  ;;  %v332_v14 = vsel %vm321_vm3, %v329_v3, %v331_v7  ;;  %v353_v15 = vmax.f32 %v311_v57, %v336_v11  ;;  %v4107_v57 = vld [vmem:[#allocation8 + $0x34] ss:$8 sps:$4 sm:$0xff]   ;;  %v4117_v5 = vld [vmem:[#allocation8 + $0x70] ss:$8 sps:$4 sm:$0xff]   ;;  %v4120_v7 = vld [vmem:[#allocation8 + $0x100] ss:$8 sps:$4 sm:$0xff]  }
 0x142   :  { %v352_v16 = vmax.f32 %v310_v4, %v334_v13  ;;  %v356_v17 = vpack.c.bf16 %v350_v10, %v349_v63  ;;  %v351_v18 = vmax.f32 %v309_v61, %v332_v14  ;;  %v4113_v61 = vld [vmem:[#allocation8 + $0x54] ss:$8 sps:$4 sm:$0xff]   ;;  %v4116_v63 = vld [vmem:[#allocation8 + $0x64] ss:$8 sps:$4 sm:$0xff]   ;;  %v429_v1 = vlaneseq  ;;  %v4123_v10 = vld [vmem:[#allocation8 + $0x110] ss:$8 sps:$4 sm:$0xff]  }
 0x143   :  { %v358_v19 = vpack.c.bf16 %v354_v12, %v353_v15  ;;  %v4119_v3 = vld [vmem:[#allocation8 + $0x74] ss:$8 sps:$4 sm:$0xff]   ;;  %v4128_v11 = vld [vmem:[#allocation8 + $0x124] ss:$8 sps:$4 sm:$0xff]   ;;  %v4126_v12 = vld [vmem:[#allocation8 + $0x120] ss:$8 sps:$4 sm:$0xff]  }
 0x144   :  { %3977 = vmatprep.subr.bf16.mxu1 %v356_v17  ;;  %v357_v20 = vpack.c.bf16 %v352_v16, %v351_v18  ;;  %v4700_v4 = vshrl.u32 %v429_v1, 7  ;;  %v4131_v13 = vld [vmem:[#allocation8 + $0x134] ss:$8 sps:$4 sm:$0xff]   ;;  %v4129_v14 = vld [vmem:[#allocation8 + $0x130] ss:$8 sps:$4 sm:$0xff]  }
 0x145   :  { %3978 = vmatpush3.bf16.msra.mxu1 %v356_v17  ;;  %v4134_v15 = vld [vmem:[#allocation8 + $0x144] ss:$8 sps:$4 sm:$0xff]   ;;  %v4132_v16 = vld [vmem:[#allocation8 + $0x140] ss:$8 sps:$4 sm:$0xff]   ;;  %v4137_v17 = vld [vmem:[#allocation8 + $0x154] ss:$8 sps:$4 sm:$0xff]  }
 0x146   :  { %3979 = vmatprep.subr.bf16.mxu1 %v357_v20  ;;  %vm434_vm5 = vcmp.ne.s32.totalorder %v4700_v4, 0  ;;  %v432_v9 = vadd.s32 16, %v4700_v4  ;;  %v4135_v18 = vld [vmem:[#allocation8 + $0x150] ss:$8 sps:$4 sm:$0xff]   ;;  %v4711_v22 = vadd.s32 8, %v4700_v4  ;;  %v433_v24 = vadd.s32 24, %v4700_v4 }
 0x147   :  { %vm3833_vm7 = vmpackc.low %vm4514_vm6, %vm434_vm5 }
 0x148   :  { %vm444_vm8 = vcmp.ne.s32.totalorder %v432_v9, 16  ;;  %vm439_vm10 = vcmp.ne.s32.totalorder %v4711_v22, 15  ;;  %vm453_vm12 = vcmp.ne.s32.totalorder %v433_v24, 31 }
 0x149   :  { %3980 = vmatpush3.bf16.msra.mxu1 %v357_v20  ;;  %vm3836_vm9 = vmpackc.low %vm4514_vm6, %vm444_vm8  ;;  %v4138_v20 = vld [vmem:[#allocation8 + $0x160] ss:$8 sps:$4 sm:$0xff]  }
 0x14a   :  { %3981 = vmatprep.subr.bf16.mxu1 %v358_v19  ;;  %vm3855_vm11 = vmpackc.low %vm439_vm10, %vm4514_vm6 }
 0x14b   :  { %vm3858_vm13 = vmpackc.low %vm453_vm12, %vm4514_vm6 }
 0x14d   :  { %3982 = vmatpush3.bf16.msra.mxu1 %v358_v19  ;;  %v4140_v19 = vld [vmem:[#allocation8 + $0x164] ss:$8 sps:$4 sm:$0xff]  }
 0x150   :  { %3984 = vmatmul.mubr.msk.bf16.vlgmr.msra.gmra.mrb[0].mxu1 %vm369_vm2, %v4071_v21  ;;  %v4143_v21 = vld [vmem:[#allocation8 + $0x174] ss:$8 sps:$4 sm:$0xff]  }
 0x151   :  { %1091 = vmatprep.mubr.bf16.mxu1 %v5710_v25 }
 0x223   :  { %v3985_v26 = vpop.f32.mrb[0].mxu1 }
 0x224   :  { %v410_v27 = vpop.f32.mrb[1].mxu1  ;;  %v470_v28 = vrot.slane %v3985_v26, 7  ;;  %v487_v32 = vrot.slane %v3985_v26, 1 }
 0x225   :  { %v467_v29 = vrot.slane %v410_v27, 7  ;;  %v484_v30 = vrot.slane %v410_v27, 1  ;;  %v3986_v31 = vpop.f32.mrb[2].mxu1 }
 0x226   :  { %v459_v33 = vpack.c.bf16 %v3986_v31, %v3985_v26  ;;  %v461_v34 = vrot.slane %v3986_v31, 7  ;;  %v489_v35 = vrot.slane %v3986_v31, 1  ;;  %v413_v36 = vpop.f32.mrb[3].mxu1  ;;  %v4727_v26 = vsub.s32 0, %v4700_v4 }
 0x227   :  { %v458_v38 = vpack.c.bf16 %v413_v36, %v410_v27  ;;  %v468_v39 = vrot.slane %v413_v36, 7  ;;  %v485_v40 = vrot.slane %v413_v36, 1  ;;  %v426_v27 = vld [vmem:[#allocation10 + $0x2] ss:$8 sm:$0x3] }
 0x228   :  { %v4676_v42 = vsel %vm466_vm4, %v470_v28, %v461_v34  ;;  %v477_v43 = vsel %vm466_vm4, %v461_v34, %v467_v29  ;;  %v4680_v44 = vsel %vm321_vm3, %v487_v32, %v489_v35  ;;  %v4683_v45 = vsel %vm321_vm3, %v489_v35, %v484_v30 }
 0x229   :  { %v469_v46 = vsel %vm466_vm4, %v467_v29, %v468_v39  ;;  %v471_v47 = vsel %vm466_vm4, %v468_v39, %v470_v28  ;;  %v4688_v48 = vsel %vm321_vm3, %v484_v30, %v485_v40  ;;  %v4691_v49 = vsel %vm321_vm3, %v485_v40, %v487_v32  ;;  %648 = vmatmul.mubr.bf16.vlgmr.msra.gmra.mrb[8].mxu0 %v458_v38  ;;  %v428_v29 = vld [vmem:[#allocation10 + $0x3] ss:$8 sm:$0x3] }
 0x22a   :  { %v3834_v50 = vpack.c.bf16 %v469_v46, %v477_v43  ;;  %v3856_v51 = vpack.c.bf16 %v4691_v49, %v4688_v48  ;;  %749 = vmatpush1.bf16.msra.mxu0 %v4096_v37  ;;  %657 = vmatprep.mubr.bf16.mxu0 %v5710_v25  ;;  %v3837_v53 = vpack.c.bf16 %v4676_v42, %v471_v47  ;;  %v4730_v28 = vsub.s32 1, %v4700_v4 }
 0x22b   :  { %750 = vmatprep.subr.bf16.mxu0 %v4101_v41  ;;  %v3859_v55 = vpack.c.bf16 %v4683_v45, %v4680_v44  ;;  %v962_v30 = vrot.slane %v426_v27, %v4727_v26  ;;  %v981_v32 = vrot.slane %v428_v29, %v4727_v26 }
 0x22c   :  { %v966_v31 = vrot.slane %v426_v27, %v4730_v28  ;;  %v985_v34 = vrot.slane %v428_v29, %v4730_v28 }
 0x22e   :  { %751 = vmatpush1.bf16.msra.mxu0 %v4099_v52 }
 0x22f   :  { %752 = vmatprep.subr.bf16.mxu0 %v4104_v54 }
 0x231   :  { %658 = vmatmul.mubr.bf16.gmra.mrb[12].mxu0 %v459_v33 }
 0x232   :  { %753 = vmatpush1.bf16.msra.mxu0 %v4102_v56  ;;  %780 = vmatprep.mubr.bf16.mxu0 %v5710_v25 }
 0x233   :  { %754 = vmatprep.subr.bf16.mxu0 %v4107_v57 }
 0x236   :  { %755 = vmatpush1.bf16.msra.mxu0 %v4105_v58 }
 0x237   :  { %756 = vmatprep.subr.bf16.mxu0 %v4110_v59 }
 0x23a   :  { %757 = vmatpush1.bf16.msra.mxu0 %v4108_v60 }
 0x23b   :  { %758 = vmatprep.subr.bf16.mxu0 %v4113_v61 }
 0x23e   :  { %759 = vmatpush1.bf16.msra.mxu0 %v4111_v62 }
 0x23f   :  { %760 = vmatprep.subr.bf16.mxu0 %v4116_v63 }
 0x242   :  { %761 = vmatpush1.bf16.msra.mxu0 %v4114_v2 }
 0x243   :  { %762 = vmatprep.subr.bf16.mxu0 %v4119_v3 }
 0x246   :  { %763 = vmatpush1.bf16.msra.mxu0 %v4117_v5 }
 0x247   :  { %897 = vmatprep.subr.bf16.mxu0 %v4122_v6 }
 0x249   :  { %3835 = vmatmul.mubr.msk.bf16.vlgmr.msra.gmra.mrb[8].mxu0 %vm3833_vm7, %v3834_v50 }
 0x24a   :  { %898 = vmatpush1.bf16.msra.mxu0 %v4120_v7  ;;  %790 = vmatprep.mubr.bf16.mxu0 %v5710_v25 }
 0x24b   :  { %899 = vmatprep.subr.bf16.mxu0 %v4125_v8 }
 0x24e   :  { %900 = vmatpush1.bf16.msra.mxu0 %v4123_v10 }
 0x24f   :  { %901 = vmatprep.subr.bf16.mxu0 %v4128_v11 }
 0x251   :  { %3838 = vmatmul.mubr.msk.bf16.gmra.mrb[12].mxu0 %vm3836_vm9, %v3837_v53 }
 0x252   :  { %902 = vmatpush1.bf16.msra.mxu0 %v4126_v12  ;;  %929 = vmatprep.mubr.bf16.mxu0 %v5710_v25 }
 0x253   :  { %903 = vmatprep.subr.bf16.mxu0 %v4131_v13 }
 0x256   :  { %904 = vmatpush1.bf16.msra.mxu0 %v4129_v14 }
 0x257   :  { %905 = vmatprep.subr.bf16.mxu0 %v4134_v15 }
 0x25a   :  { %906 = vmatpush1.bf16.msra.mxu0 %v4132_v16 }
 0x25b   :  { %907 = vmatprep.subr.bf16.mxu0 %v4137_v17 }
 0x25e   :  { %908 = vmatpush1.bf16.msra.mxu0 %v4135_v18 }
 0x25f   :  { %909 = vmatprep.subr.bf16.mxu0 %v4140_v19 }
 0x262   :  { %910 = vmatpush1.bf16.msra.mxu0 %v4138_v20 }
 0x263   :  { %911 = vmatprep.subr.bf16.mxu0 %v4143_v21 }
 0x266   :  { %912 = vmatpush1.bf16.msra.mxu0 %v4141_v23 }
 0x269   :  { %3857 = vmatmul.mubr.msk.bf16.vlgmr.msra.gmra.mrb[8].mxu0 %vm3855_vm11, %v3856_v51 }
 0x26a   :  { %939 = vmatprep.mubr.bf16.mxu0 %v5710_v25 }
 0x271   :  { %3860 = vmatmul.mubr.msk.bf16.gmra.mrb[12].mxu0 %vm3858_vm13, %v3859_v55 }
 0x33c   :  { %v931_v33 = vpop.f32.mrb[8].mxu0 }
 0x33d   :  { %v969_v35 = vmul.f32 %v962_v30, %v931_v33  ;;  %v933_v36 = vpop.f32.mrb[9].mxu0 }
 0x33e   :  { %v970_v37 = vmul.f32 %v966_v31, %v933_v36  ;;  %v935_v38 = vpop.f32.mrb[10].mxu0  ;;  %v4144_v36 = vld [vmem:[%s5705_s5 + $0x10] sm:$0xff]  }
 0x33f   :  { %v988_v39 = vadd.f32 %v981_v32, %v969_v35  ;;  %v971_v40 = vmul.f32 %v962_v30, %v935_v38  ;;  %v937_v41 = vpop.f32.mrb[11].mxu0 }
 0x340   :  { %v989_v42 = vadd.f32 %v985_v34, %v970_v37  ;;  %v972_v43 = vmul.f32 %v966_v31, %v937_v41 }
 0x341   :  { %v996_v44 = vmax.f32 %v988_v39, 0.0  ;;  %v990_v45 = vadd.f32 %v981_v32, %v971_v40 }
 0x342   :  { %v997_v46 = vmax.f32 %v989_v42, 0.0  ;;  %v991_v47 = vadd.f32 %v985_v34, %v972_v43 }
 0x343   :  { %v998_v48 = vmax.f32 %v990_v45, 0.0  ;;  %v1012_v51 = vrot.slane %v996_v44, 1 }
 0x344   :  { %v999_v49 = vmax.f32 %v991_v47, 0.0  ;;  %v941_v50 = vpop.f32.mrb[12].mxu0  ;;  %v1015_v55 = vrot.slane %v997_v46, 1 }
 0x345   :  { %v1013_v52 = vrot.slane %v998_v48, 1  ;;  %v973_v53 = vmul.f32 %v962_v30, %v941_v50  ;;  %v943_v54 = vpop.f32.mrb[13].mxu0 }
 0x346   :  { %v1016_v56 = vrot.slane %v999_v49, 1  ;;  %v974_v57 = vmul.f32 %v966_v31, %v943_v54  ;;  %v945_v58 = vpop.f32.mrb[14].mxu0 }
 0x347   :  { %v1014_v59 = vsel %vm321_vm3, %v1012_v51, %v1013_v52  ;;  %v992_v60 = vadd.f32 %v981_v32, %v973_v53  ;;  %v975_v61 = vmul.f32 %v962_v30, %v945_v58  ;;  %v947_v62 = vpop.f32.mrb[15].mxu0 }
 0x348   :  { %v993_v63 = vadd.f32 %v985_v34, %v974_v57  ;;  %v976_v1 = vmul.f32 %v966_v31, %v947_v62  ;;  %v1017_v2 = vsel %vm321_vm3, %v1015_v55, %v1016_v56  ;;  %v1038_v3 = vmax.f32 %v996_v44, %v1014_v59 }
 0x349   :  { %v1000_v5 = vmax.f32 %v992_v60, 0.0  ;;  %v994_v6 = vadd.f32 %v981_v32, %v975_v61  ;;  %v1039_v7 = vmax.f32 %v997_v46, %v1017_v2 }
 0x34a   :  { %v1001_v8 = vmax.f32 %v993_v63, 0.0  ;;  %v995_v9 = vadd.f32 %v985_v34, %v976_v1 }
 0x34b   :  { %v1018_v10 = vrot.slane %v1000_v5, 1  ;;  %v1002_v11 = vmax.f32 %v994_v6, 0.0 }
 0x34c   :  { %v1020_v12 = vrot.slane %v1001_v8, 1  ;;  %v1003_v13 = vmax.f32 %v995_v9, 0.0 }
 0x34d   :  { %v1019_v14 = vsel %vm321_vm3, %v1013_v52, %v1018_v10  ;;  %v1022_v15 = vrot.slane %v1002_v11, 1 }
 0x34e   :  { %v1024_v16 = vrot.slane %v1003_v13, 1  ;;  %v1021_v17 = vsel %vm321_vm3, %v1016_v56, %v1020_v12  ;;  %v1040_v18 = vmax.f32 %v998_v48, %v1019_v14 }
 0x34f   :  { %v1023_v19 = vsel %vm321_vm3, %v1018_v10, %v1022_v15  ;;  %v1036_v20 = vsel %vm321_vm3, %v1022_v15, %v1012_v51  ;;  %v1041_v21 = vmax.f32 %v999_v49, %v1021_v17 }
 0x350   :  { %v1042_v23 = vmax.f32 %v1000_v5, %v1023_v19  ;;  %v1044_v24 = vmax.f32 %v1002_v11, %v1036_v20  ;;  %v1037_v27 = vsel %vm321_vm3, %v1024_v16, %v1015_v55  ;;  %v1046_v29 = vpack.c.bf16 %v1040_v18, %v1038_v3 }
 0x351   :  { %v1045_v30 = vmax.f32 %v1003_v13, %v1037_v27  ;;  %v1047_v31 = vpack.c.bf16 %v1041_v21, %v1039_v7  ;;  %v1025_v32 = vsel %vm321_vm3, %v1020_v12, %v1024_v16 }
 0x352   :  { %v1048_v33 = vpack.c.bf16 %v1044_v24, %v1042_v23  ;;  %v1043_v34 = vmax.f32 %v1001_v8, %v1025_v32 }
 0x353   :  { %1059 = vmatprep.subr.bf16.mxu1 %v1047_v31 }
 0x354   :  { %1060 = vmatpush1.bf16.msra.mxu1 %v1046_v29  ;;  %v1049_v35 = vpack.c.bf16 %v1045_v30, %v1043_v34 }
 0x356   :  { %1061 = vmatprep.subr.bf16.mxu1 %v1049_v35 }
 0x358   :  { %1062 = vmatpush1.bf16.msra.mxu1 %v1048_v33 }
 0x35b   :  { %3862 = vmatmul.mubr.msk.bf16.vlgmr.msra.gmra.mrb[4].mxu1 %vm1055_vm14, %v4144_v36 }
 0x42e   :  { %v4747_v37 = vpop.f32.mrb[4].mxu1 }
 0x42f   :  { %v4749_v38 = vpop.f32.mrb[5].mxu1 }
 0x430   :  { %v4751_v39 = vpop.f32.mrb[6].mxu1 }
 0x431   :  { %v4753_v40 = vpop.f32.mrb[7].mxu1 }
 0x432   :  { %4487 = dma.done.wait [#allocation5], 24576 }
 0x433   :  { %4488 = vsyncadd [#allocation5], 4294942720  ;;  %v4757_v41 = vpack.c.bf16 %v4753_v40, %v4749_v38  ;;  %1772 = vmatprep.mubr.bf16.mxu0 %v5710_v25  ;;  %v1229_v42 = vld [vmem:[#allocation2 + $0x208] sm:$0xff]  ;;  %v1228_v43 = vld [vmem:[#allocation2 + $0x200] sm:$0xff]  ;;  %v4763_v13 = vpack.c.bf16 %v4751_v39, %v4747_v37  ;;  %vm1113_vm15 = vcmp.ne.s32.totalorder %v4711_v22, 8  ;;  %vm1110_vm1 = vcmp.ne.s32.totalorder %v4700_v4, 7 }
 0x434   :  { %v1233_v44 = vld [vmem:[#allocation2 + $0x228] sm:$0xff]  ;;  %1292 = vmatprep.subr.bf16.mxu1 %v1229_v42  ;;  %v1232_v45 = vld [vmem:[#allocation2 + $0x220] sm:$0xff]  ;;  %v1231_v12 = vld [vmem:[#allocation2 + $0x218] sm:$0xff] }
 0x435   :  { %1324 = vmatprep.mubr.bf16.mxu1 %v4757_v41  ;;  %1293 = vmatpush1.bf16.msra.mxu1 %v1228_v43  ;;  %v1237_v46 = vld [vmem:[#allocation2 + $0x248] sm:$0xff]  ;;  %v1236_v47 = vld [vmem:[#allocation2 + $0x240] sm:$0xff]  ;;  %v1230_v14 = vld [vmem:[#allocation2 + $0x210] sm:$0xff] }
 0x436   :  { %1294 = vmatprep.subr.bf16.mxu1 %v1233_v44  ;;  %v1241_v48 = vld [vmem:[#allocation2 + $0x268] sm:$0xff]  ;;  %v1240_v49 = vld [vmem:[#allocation2 + $0x260] sm:$0xff]  ;;  %v1235_v15 = vld [vmem:[#allocation2 + $0x238] sm:$0xff] }
 0x437   :  { %v1245_v50 = vld [vmem:[#allocation2 + $0x288] sm:$0xff]  ;;  %v1244_v51 = vld [vmem:[#allocation2 + $0x280] sm:$0xff]  ;;  %v1234_v16 = vld [vmem:[#allocation2 + $0x230] sm:$0xff] }
 0x438   :  { %v1249_v52 = vld [vmem:[#allocation2 + $0x2a8] sm:$0xff]  ;;  %v1248_v53 = vld [vmem:[#allocation2 + $0x2a0] sm:$0xff]  ;;  %v1239_v17 = vld [vmem:[#allocation2 + $0x258] sm:$0xff] }
 0x439   :  { %1295 = vmatpush1.bf16.msra.mxu1 %v1232_v45  ;;  %v1253_v54 = vld [vmem:[#allocation2 + $0x2c8] sm:$0xff]  ;;  %v1252_v55 = vld [vmem:[#allocation2 + $0x2c0] sm:$0xff]  ;;  %v1238_v18 = vld [vmem:[#allocation2 + $0x250] sm:$0xff] }
 0x43a   :  { %1296 = vmatprep.subr.bf16.mxu1 %v1237_v46  ;;  %v1257_v56 = vld [vmem:[#allocation2 + $0x2e8] sm:$0xff]  ;;  %v1256_v57 = vld [vmem:[#allocation2 + $0x2e0] sm:$0xff]  ;;  %v1243_v19 = vld [vmem:[#allocation2 + $0x278] sm:$0xff] }
 0x43b   :  { %v1261_v58 = vld [vmem:[#allocation2 + $0x308] sm:$0xff]  ;;  %v1260_v59 = vld [vmem:[#allocation2 + $0x300] sm:$0xff]  ;;  %v1242_v20 = vld [vmem:[#allocation2 + $0x270] sm:$0xff] }
 0x43c   :  { %v1265_v60 = vld [vmem:[#allocation2 + $0x328] sm:$0xff]  ;;  %v1264_v61 = vld [vmem:[#allocation2 + $0x320] sm:$0xff]  ;;  %v1247_v21 = vld [vmem:[#allocation2 + $0x298] sm:$0xff] }
 0x43d   :  { %1297 = vmatpush1.bf16.msra.mxu1 %v1236_v47  ;;  %v1269_v62 = vld [vmem:[#allocation2 + $0x348] sm:$0xff]  ;;  %v1268_v63 = vld [vmem:[#allocation2 + $0x340] sm:$0xff]  ;;  %v1246_v23 = vld [vmem:[#allocation2 + $0x290] sm:$0xff] }
 0x43e   :  { %1298 = vmatprep.subr.bf16.mxu1 %v1241_v48  ;;  %v1273_v1 = vld [vmem:[#allocation2 + $0x368] sm:$0xff]  ;;  %v1272_v2 = vld [vmem:[#allocation2 + $0x360] sm:$0xff]  ;;  %v1251_v24 = vld [vmem:[#allocation2 + $0x2b8] sm:$0xff] }
 0x43f   :  { %v1277_v3 = vld [vmem:[#allocation2 + $0x388] sm:$0xff]  ;;  %v1276_v5 = vld [vmem:[#allocation2 + $0x380] sm:$0xff]  ;;  %v1250_v27 = vld [vmem:[#allocation2 + $0x2b0] sm:$0xff] }
 0x440   :  { %v1281_v6 = vld [vmem:[#allocation2 + $0x3a8] sm:$0xff]  ;;  %v1280_v7 = vld [vmem:[#allocation2 + $0x3a0] sm:$0xff]  ;;  %v1255_v29 = vld [vmem:[#allocation2 + $0x2d8] sm:$0xff] }
 0x441   :  { %1299 = vmatpush1.bf16.msra.mxu1 %v1240_v49  ;;  %v1285_v8 = vld [vmem:[#allocation2 + $0x3c8] sm:$0xff]  ;;  %v1284_v9 = vld [vmem:[#allocation2 + $0x3c0] sm:$0xff]  ;;  %v1254_v30 = vld [vmem:[#allocation2 + $0x2d0] sm:$0xff] }
 0x442   :  { %1300 = vmatprep.subr.bf16.mxu1 %v1245_v50  ;;  %v1289_v10 = vld [vmem:[#allocation2 + $0x3e8] sm:$0xff]  ;;  %v1288_v11 = vld [vmem:[#allocation2 + $0x3e0] sm:$0xff]  ;;  %v1259_v31 = vld [vmem:[#allocation2 + $0x2f8] sm:$0xff] }
 0x443   :  { %v1258_v32 = vld [vmem:[#allocation2 + $0x2f0] sm:$0xff]  ;;  %v1263_v33 = vld [vmem:[#allocation2 + $0x318] sm:$0xff]  ;;  %vm4776_vm0 = vmpackc.low %vm1113_vm15, %vm434_vm5 }
 0x444   :  { %v1262_v34 = vld [vmem:[#allocation2 + $0x310] sm:$0xff]  ;;  %v1267_v35 = vld [vmem:[#allocation2 + $0x338] sm:$0xff]  ;;  %vm4805_vm2 = vmpackc.low %vm439_vm10, %vm1110_vm1 }
 0x445   :  { %1301 = vmatpush1.bf16.msra.mxu1 %v1244_v51  ;;  %v1266_v36 = vld [vmem:[#allocation2 + $0x330] sm:$0xff]  ;;  %v1275_v43 = vld [vmem:[#allocation2 + $0x378] sm:$0xff]  ;;  %v1123_v51 = vrot.slane %v4753_v40, 7  ;;  %v1472_v22 = vld [vmem:[#allocation2 + $0x440] sm:$0xff] }
 0x446   :  { %1302 = vmatprep.subr.bf16.mxu1 %v1249_v52  ;;  %v1270_v42 = vld [vmem:[#allocation2 + $0x350] sm:$0xff]  ;;  %v1279_v45 = vld [vmem:[#allocation2 + $0x398] sm:$0xff]  ;;  %v1129_v52 = vrot.slane %v4749_v38, 7 }
 0x447   :  { %v1274_v44 = vld [vmem:[#allocation2 + $0x370] sm:$0xff]  ;;  %v1283_v47 = vld [vmem:[#allocation2 + $0x3b8] sm:$0xff] }
 0x448   :  { %v1278_v46 = vld [vmem:[#allocation2 + $0x390] sm:$0xff]  ;;  %v1287_v49 = vld [vmem:[#allocation2 + $0x3d8] sm:$0xff] }
 0x449   :  { %1303 = vmatpush1.bf16.msra.mxu1 %v1248_v53  ;;  %v1282_v48 = vld [vmem:[#allocation2 + $0x3b0] sm:$0xff]  ;;  %v1291_v53 = vld [vmem:[#allocation2 + $0x3f8] sm:$0xff] }
 0x44a   :  { %1304 = vmatprep.subr.bf16.mxu1 %v1253_v54  ;;  %v1286_v50 = vld [vmem:[#allocation2 + $0x3d0] sm:$0xff] }
 0x44b   :  { %v1290_v54 = vld [vmem:[#allocation2 + $0x3f0] sm:$0xff] }
 0x44d   :  { %1305 = vmatpush1.bf16.msra.mxu1 %v1252_v55  ;;  %v1131_v55 = vsel %vm466_vm4, %v1129_v52, %v1123_v51 }
 0x44e   :  { %1306 = vmatprep.subr.bf16.mxu1 %v1257_v56  ;;  %v1137_v56 = vsel %vm466_vm4, %v1123_v51, %v1129_v52  ;;  %v1182_v51 = vld [vmem:[#allocation2 + $0x90] sm:$0xff]  ;;  %v1187_v52 = vld [vmem:[#allocation2 + $0xb8] sm:$0xff] }
 0x451   :  { %1307 = vmatpush1.bf16.msra.mxu1 %v1256_v57  ;;  %v1165_v57 = vld [vmem:[#allocation2 + $0x8] sm:$0xff] }
 0x452   :  { %1308 = vmatprep.subr.bf16.mxu1 %v1261_v58  ;;  %v4772_v58 = vpack.c.bf16 %v1131_v55, %v1137_v56  ;;  %v1190_v55 = vld [vmem:[#allocation2 + $0xd0] sm:$0xff]  ;;  %v1195_v56 = vld [vmem:[#allocation2 + $0xf8] sm:$0xff] }
 0x455   :  { %1309 = vmatpush1.bf16.msra.mxu1 %v1260_v59  ;;  %v1164_v59 = vld [vmem:[#allocation2] sm:$0xff] }
 0x456   :  { %1310 = vmatprep.subr.bf16.mxu1 %v1265_v60  ;;  %v1480_v60 = vld [vmem:[#allocation2 + $0x480] sm:$0xff] }
 0x459   :  { %1311 = vmatpush1.bf16.msra.mxu1 %v1264_v61  ;;  %v1169_v61 = vld [vmem:[#allocation2 + $0x28] sm:$0xff] }
 0x45a   :  { %1312 = vmatprep.subr.bf16.mxu1 %v1269_v62  ;;  %v1168_v62 = vld [vmem:[#allocation2 + $0x20] sm:$0xff] }
 0x45d   :  { %1313 = vmatpush1.bf16.msra.mxu1 %v1268_v63  ;;  %v1173_v63 = vld [vmem:[#allocation2 + $0x48] sm:$0xff] }
 0x45e   :  { %1314 = vmatprep.subr.bf16.mxu1 %v1273_v1  ;;  %v1172_v1 = vld [vmem:[#allocation2 + $0x40] sm:$0xff] }
 0x461   :  { %1315 = vmatpush1.bf16.msra.mxu1 %v1272_v2  ;;  %v1177_v2 = vld [vmem:[#allocation2 + $0x68] sm:$0xff] }
 0x462   :  { %1316 = vmatprep.subr.bf16.mxu1 %v1277_v3  ;;  %v1176_v3 = vld [vmem:[#allocation2 + $0x60] sm:$0xff] }
 0x465   :  { %1317 = vmatpush1.bf16.msra.mxu1 %v1276_v5  ;;  %v1181_v5 = vld [vmem:[#allocation2 + $0x88] sm:$0xff] }
 0x466   :  { %1318 = vmatprep.subr.bf16.mxu1 %v1281_v6  ;;  %v1180_v6 = vld [vmem:[#allocation2 + $0x80] sm:$0xff] }
 0x469   :  { %1319 = vmatpush1.bf16.msra.mxu1 %v1280_v7  ;;  %v1185_v7 = vld [vmem:[#allocation2 + $0xa8] sm:$0xff] }
 0x46a   :  { %1320 = vmatprep.subr.bf16.mxu1 %v1285_v8  ;;  %v1184_v8 = vld [vmem:[#allocation2 + $0xa0] sm:$0xff] }
 0x46d   :  { %1321 = vmatpush1.bf16.msra.mxu1 %v1284_v9  ;;  %v1189_v9 = vld [vmem:[#allocation2 + $0xc8] sm:$0xff] }
 0x46e   :  { %1322 = vmatprep.subr.bf16.mxu1 %v1289_v10  ;;  %v1188_v10 = vld [vmem:[#allocation2 + $0xc0] sm:$0xff] }
 0x471   :  { %1323 = vmatpush1.bf16.msra.mxu1 %v1288_v11  ;;  %v1193_v11 = vld [vmem:[#allocation2 + $0xe8] sm:$0xff] }
 0x472   :  { %1335 = vmatprep.subr.bf16.mxu1 %v1231_v12  ;;  %v1192_v12 = vld [vmem:[#allocation2 + $0xe0] sm:$0xff] }
 0x474   :  { %1325 = vmatmul.mubr.bf16.vlgmr.msra.gmra.mrb[8].mxu1 %v4763_v13 }
 0x475   :  { %1336 = vmatpush1.bf16.msra.mxu1 %v1230_v14  ;;  %1367 = vmatprep.mubr.bf16.mxu1 %v4757_v41  ;;  %v1271_v41 = vld [vmem:[#allocation2 + $0x358] sm:$0xff]  ;;  %v1196_v14 = vld [vmem:[#allocation2 + $0x100] sm:$0xff] }
 0x476   :  { %1337 = vmatprep.subr.bf16.mxu1 %v1235_v15  ;;  %v1201_v15 = vld [vmem:[#allocation2 + $0x128] sm:$0xff] }
 0x479   :  { %1338 = vmatpush1.bf16.msra.mxu1 %v1234_v16  ;;  %v1200_v16 = vld [vmem:[#allocation2 + $0x120] sm:$0xff] }
 0x47a   :  { %1339 = vmatprep.subr.bf16.mxu1 %v1239_v17  ;;  %v1205_v17 = vld [vmem:[#allocation2 + $0x148] sm:$0xff] }
 0x47d   :  { %1340 = vmatpush1.bf16.msra.mxu1 %v1238_v18  ;;  %v1204_v18 = vld [vmem:[#allocation2 + $0x140] sm:$0xff] }
 0x47e   :  { %1341 = vmatprep.subr.bf16.mxu1 %v1243_v19  ;;  %v1209_v19 = vld [vmem:[#allocation2 + $0x168] sm:$0xff] }
 0x481   :  { %1342 = vmatpush1.bf16.msra.mxu1 %v1242_v20  ;;  %v1208_v20 = vld [vmem:[#allocation2 + $0x160] sm:$0xff] }
 0x482   :  { %1343 = vmatprep.subr.bf16.mxu1 %v1247_v21  ;;  %v1213_v21 = vld [vmem:[#allocation2 + $0x188] sm:$0xff] }
 0x485   :  { %1344 = vmatpush1.bf16.msra.mxu1 %v1246_v23  ;;  %v1212_v23 = vld [vmem:[#allocation2 + $0x180] sm:$0xff] }
 0x486   :  { %1345 = vmatprep.subr.bf16.mxu1 %v1251_v24  ;;  %v1217_v24 = vld [vmem:[#allocation2 + $0x1a8] sm:$0xff] }
 0x489   :  { %1346 = vmatpush1.bf16.msra.mxu1 %v1250_v27  ;;  %v1216_v27 = vld [vmem:[#allocation2 + $0x1a0] sm:$0xff] }
 0x48a   :  { %1347 = vmatprep.subr.bf16.mxu1 %v1255_v29  ;;  %v1221_v29 = vld [vmem:[#allocation2 + $0x1c8] sm:$0xff] }
 0x48d   :  { %1348 = vmatpush1.bf16.msra.mxu1 %v1254_v30  ;;  %v1122_v30 = vrot.slane %v4751_v39, 7 }
 0x48e   :  { %1349 = vmatprep.subr.bf16.mxu1 %v1259_v31  ;;  %v1128_v31 = vrot.slane %v4747_v37, 7 }
 0x491   :  { %1350 = vmatpush1.bf16.msra.mxu1 %v1258_v32  ;;  %v1220_v32 = vld [vmem:[#allocation2 + $0x1c0] sm:$0xff] }
 0x492   :  { %1351 = vmatprep.subr.bf16.mxu1 %v1263_v33  ;;  %v1225_v33 = vld [vmem:[#allocation2 + $0x1e8] sm:$0xff] }
 0x495   :  { %1352 = vmatpush1.bf16.msra.mxu1 %v1262_v34  ;;  %v1130_v34 = vsel %vm466_vm4, %v1128_v31, %v1122_v30 }
 0x496   :  { %1353 = vmatprep.subr.bf16.mxu1 %v1267_v35  ;;  %v1136_v35 = vsel %vm466_vm4, %v1122_v30, %v1128_v31  ;;  %v1484_v30 = vld [vmem:[#allocation2 + $0x4a0] sm:$0xff]  ;;  %v1489_v31 = vld [vmem:[#allocation2 + $0x4c8] sm:$0xff]  ;;  %vm1736_vm4 = vcmask 130048  }
 0x499   :  { %1354 = vmatpush1.bf16.msra.mxu1 %v1266_v36  ;;  %v1224_v36 = vld [vmem:[#allocation2 + $0x1e0] sm:$0xff] }
 0x49a   :  { %1355 = vmatprep.subr.bf16.mxu1 %v1271_v41  ;;  %v1167_v41 = vld [vmem:[#allocation2 + $0x18] sm:$0xff] }
 0x49d   :  { %1356 = vmatpush1.bf16.msra.mxu1 %v1270_v42  ;;  %v4788_v42 = vpack.c.bf16 %v1130_v34, %v1136_v35  ;;  %v1492_v34 = vld [vmem:[#allocation2 + $0x4e0] sm:$0xff]  ;;  %v1497_v35 = vld [vmem:[#allocation2 + $0x508] sm:$0xff] }
 0x49e   :  { %1357 = vmatprep.subr.bf16.mxu1 %v1275_v43  ;;  %v1166_v43 = vld [vmem:[#allocation2 + $0x10] sm:$0xff] }
 0x4a1   :  { %1358 = vmatpush1.bf16.msra.mxu1 %v1274_v44  ;;  %v1171_v44 = vld [vmem:[#allocation2 + $0x38] sm:$0xff] }
 0x4a2   :  { %1359 = vmatprep.subr.bf16.mxu1 %v1279_v45  ;;  %v1170_v45 = vld [vmem:[#allocation2 + $0x30] sm:$0xff] }
 0x4a5   :  { %1360 = vmatpush1.bf16.msra.mxu1 %v1278_v46  ;;  %v1175_v46 = vld [vmem:[#allocation2 + $0x58] sm:$0xff] }
 0x4a6   :  { %1361 = vmatprep.subr.bf16.mxu1 %v1283_v47  ;;  %v1174_v47 = vld [vmem:[#allocation2 + $0x50] sm:$0xff] }
 0x4a9   :  { %1362 = vmatpush1.bf16.msra.mxu1 %v1282_v48  ;;  %v1179_v48 = vld [vmem:[#allocation2 + $0x78] sm:$0xff] }
 0x4aa   :  { %1363 = vmatprep.subr.bf16.mxu1 %v1287_v49  ;;  %v1178_v49 = vld [vmem:[#allocation2 + $0x70] sm:$0xff] }
 0x4ad   :  { %1364 = vmatpush1.bf16.msra.mxu1 %v1286_v50  ;;  %v1183_v50 = vld [vmem:[#allocation2 + $0x98] sm:$0xff] }
 0x4ae   :  { %1365 = vmatprep.subr.bf16.mxu1 %v1291_v53  ;;  %v1186_v53 = vld [vmem:[#allocation2 + $0xb0] sm:$0xff] }
 0x4b1   :  { %1366 = vmatpush1.bf16.msra.mxu1 %v1290_v54  ;;  %v1191_v54 = vld [vmem:[#allocation2 + $0xd8] sm:$0xff] }
 0x4b2   :  { %1378 = vmatprep.subr.bf16.mxu1 %v1165_v57  ;;  %v1194_v57 = vld [vmem:[#allocation2 + $0xf0] sm:$0xff] }
 0x4b4   :  { %1368 = vmatmul.mubr.bf16.vlgmr.msra.gmra.mrb[12].mxu1 %v4763_v13  ;;  %v1197_v13 = vld [vmem:[#allocation2 + $0x108] sm:$0xff] }
 0x4b5   :  { %1379 = vmatpush1.bf16.msra.mxu1 %v1164_v59  ;;  %3865 = vmatprep.mubr.msk.bf16.mxu1 %vm4776_vm0, %v4772_v58  ;;  %v1198_v59 = vld [vmem:[#allocation2 + $0x110] sm:$0xff] }
 0x4b6   :  { %1380 = vmatprep.subr.bf16.mxu1 %v1169_v61  ;;  %v1203_v61 = vld [vmem:[#allocation2 + $0x138] sm:$0xff] }
 0x4b9   :  { %1381 = vmatpush1.bf16.msra.mxu1 %v1168_v62  ;;  %v1202_v62 = vld [vmem:[#allocation2 + $0x130] sm:$0xff] }
 0x4ba   :  { %1382 = vmatprep.subr.bf16.mxu1 %v1173_v63  ;;  %v1207_v63 = vld [vmem:[#allocation2 + $0x158] sm:$0xff] }
 0x4bd   :  { %1383 = vmatpush1.bf16.msra.mxu1 %v1172_v1  ;;  %v1206_v1 = vld [vmem:[#allocation2 + $0x150] sm:$0xff] }
 0x4be   :  { %1384 = vmatprep.subr.bf16.mxu1 %v1177_v2  ;;  %v1211_v2 = vld [vmem:[#allocation2 + $0x178] sm:$0xff] }
 0x4c1   :  { %1385 = vmatpush1.bf16.msra.mxu1 %v1176_v3  ;;  %v1210_v3 = vld [vmem:[#allocation2 + $0x170] sm:$0xff] }
 0x4c2   :  { %1386 = vmatprep.subr.bf16.mxu1 %v1181_v5  ;;  %v1215_v5 = vld [vmem:[#allocation2 + $0x198] sm:$0xff] }
 0x4c5   :  { %1387 = vmatpush1.bf16.msra.mxu1 %v1180_v6  ;;  %v1214_v6 = vld [vmem:[#allocation2 + $0x190] sm:$0xff] }
 0x4c6   :  { %1388 = vmatprep.subr.bf16.mxu1 %v1185_v7  ;;  %v1219_v7 = vld [vmem:[#allocation2 + $0x1b8] sm:$0xff] }
 0x4c9   :  { %1389 = vmatpush1.bf16.msra.mxu1 %v1184_v8  ;;  %v1218_v8 = vld [vmem:[#allocation2 + $0x1b0] sm:$0xff] }
 0x4ca   :  { %1390 = vmatprep.subr.bf16.mxu1 %v1189_v9  ;;  %v1223_v9 = vld [vmem:[#allocation2 + $0x1d8] sm:$0xff] }
 0x4cd   :  { %1391 = vmatpush1.bf16.msra.mxu1 %v1188_v10  ;;  %v1222_v10 = vld [vmem:[#allocation2 + $0x1d0] sm:$0xff] }
 0x4ce   :  { %1392 = vmatprep.subr.bf16.mxu1 %v1193_v11  ;;  %v1147_v11 = vrot.slane %v4749_v38, 1 }
 0x4d1   :  { %1393 = vmatpush1.bf16.msra.mxu1 %v1192_v12  ;;  %v1148_v12 = vrot.slane %v4753_v40, 1  ;;  %v1469_v40 = vld [vmem:[#allocation2 + $0x428] sm:$0xff] }
 0x4d2   :  { %1394 = vmatprep.subr.bf16.mxu1 %v1197_v13  ;;  %v1227_v13 = vld [vmem:[#allocation2 + $0x1f8] sm:$0xff] }
 0x4d5   :  { %1395 = vmatpush1.bf16.msra.mxu1 %v1196_v14  ;;  %v1226_v14 = vld [vmem:[#allocation2 + $0x1f0] sm:$0xff] }
 0x4d6   :  { %1396 = vmatprep.subr.bf16.mxu1 %v1201_v15  ;;  %v1149_v15 = vsel %vm321_vm3, %v1147_v11, %v1148_v12 }
 0x4d9   :  { %1397 = vmatpush1.bf16.msra.mxu1 %v1200_v16  ;;  %v1157_v16 = vsel %vm321_vm3, %v1148_v12, %v1147_v11  ;;  %v1495_v11 = vld [vmem:[#allocation2 + $0x4f8] sm:$0xff]  ;;  %v1494_v12 = vld [vmem:[#allocation2 + $0x4f0] sm:$0xff] }
 0x4da   :  { %1398 = vmatprep.subr.bf16.mxu1 %v1205_v17  ;;  %v1465_v17 = vld [vmem:[#allocation2 + $0x408] sm:$0xff] }
 0x4dd   :  { %1399 = vmatpush1.bf16.msra.mxu1 %v1204_v18  ;;  %v4801_v18 = vpack.c.bf16 %v1157_v16, %v1149_v15  ;;  %v1503_v15 = vld [vmem:[#allocation2 + $0x538] sm:$0xff]  ;;  %v1502_v16 = vld [vmem:[#allocation2 + $0x530] sm:$0xff] }
 0x4de   :  { %1400 = vmatprep.subr.bf16.mxu1 %v1209_v19  ;;  %v1464_v19 = vld [vmem:[#allocation2 + $0x400] sm:$0xff] }
 0x4e1   :  { %1401 = vmatpush1.bf16.msra.mxu1 %v1208_v20  ;;  %v1468_v20 = vld [vmem:[#allocation2 + $0x420] sm:$0xff] }
 0x4e2   :  { %1402 = vmatprep.subr.bf16.mxu1 %v1213_v21  ;;  %v1473_v21 = vld [vmem:[#allocation2 + $0x448] sm:$0xff] }
 0x4e5   :  { %1403 = vmatpush1.bf16.msra.mxu1 %v1212_v23  ;;  %v1477_v23 = vld [vmem:[#allocation2 + $0x468] sm:$0xff] }
 0x4e6   :  { %1404 = vmatprep.subr.bf16.mxu1 %v1217_v24  ;;  %v1476_v24 = vld [vmem:[#allocation2 + $0x460] sm:$0xff] }
 0x4e9   :  { %1405 = vmatpush1.bf16.msra.mxu1 %v1216_v27  ;;  %v1481_v27 = vld [vmem:[#allocation2 + $0x488] sm:$0xff] }
 0x4ea   :  { %1406 = vmatprep.subr.bf16.mxu1 %v1221_v29  ;;  %v1485_v29 = vld [vmem:[#allocation2 + $0x4a8] sm:$0xff] }
 0x4ed   :  { %1407 = vmatpush1.bf16.msra.mxu1 %v1220_v32  ;;  %v1488_v32 = vld [vmem:[#allocation2 + $0x4c0] sm:$0xff] }
 0x4ee   :  { %1408 = vmatprep.subr.bf16.mxu1 %v1225_v33  ;;  %v1493_v33 = vld [vmem:[#allocation2 + $0x4e8] sm:$0xff] }
 0x4f1   :  { %1409 = vmatpush1.bf16.msra.mxu1 %v1224_v36  ;;  %v1496_v36 = vld [vmem:[#allocation2 + $0x500] sm:$0xff] }
 0x4f2   :  { %1421 = vmatprep.subr.bf16.mxu1 %v1167_v41  ;;  %v1501_v41 = vld [vmem:[#allocation2 + $0x528] sm:$0xff] }
 0x4f4   :  { %3868 = vmatmul.mubr.msk.bf16.vlgmr.msra.gmra.mrb[8].mxu1 %vm4776_vm0, %v4788_v42 }
 0x4f5   :  { %1422 = vmatpush1.bf16.msra.mxu1 %v1166_v43  ;;  %3871 = vmatprep.mubr.msk.bf16.mxu1 %vm4776_vm0, %v4772_v58  ;;  %v1199_v58 = vld [vmem:[#allocation2 + $0x118] sm:$0xff]  ;;  %v1505_v43 = vld [vmem:[#allocation2 + $0x548] sm:$0xff] }
 0x4f6   :  { %1423 = vmatprep.subr.bf16.mxu1 %v1171_v44  ;;  %v1504_v44 = vld [vmem:[#allocation2 + $0x540] sm:$0xff] }
 0x4f9   :  { %1424 = vmatpush1.bf16.msra.mxu1 %v1170_v45  ;;  %v1509_v45 = vld [vmem:[#allocation2 + $0x568] sm:$0xff] }
 0x4fa   :  { %1425 = vmatprep.subr.bf16.mxu1 %v1175_v46  ;;  %v1508_v46 = vld [vmem:[#allocation2 + $0x560] sm:$0xff] }
 0x4fd   :  { %1426 = vmatpush1.bf16.msra.mxu1 %v1174_v47  ;;  %v1513_v47 = vld [vmem:[#allocation2 + $0x588] sm:$0xff] }
 0x4fe   :  { %1427 = vmatprep.subr.bf16.mxu1 %v1179_v48  ;;  %v1512_v48 = vld [vmem:[#allocation2 + $0x580] sm:$0xff] }
 0x501   :  { %1428 = vmatpush1.bf16.msra.mxu1 %v1178_v49  ;;  %v1517_v49 = vld [vmem:[#allocation2 + $0x5a8] sm:$0xff] }
 0x502   :  { %1429 = vmatprep.subr.bf16.mxu1 %v1183_v50  ;;  %v1516_v50 = vld [vmem:[#allocation2 + $0x5a0] sm:$0xff] }
 0x505   :  { %1430 = vmatpush1.bf16.msra.mxu1 %v1182_v51  ;;  %v1521_v51 = vld [vmem:[#allocation2 + $0x5c8] sm:$0xff] }
 0x506   :  { %1431 = vmatprep.subr.bf16.mxu1 %v1187_v52  ;;  %v1144_v52 = vrot.slane %v4747_v37, 1  ;;  %v1470_v37 = vld [vmem:[#allocation2 + $0x430] sm:$0xff] }
 0x509   :  { %1432 = vmatpush1.bf16.msra.mxu1 %v1186_v53  ;;  %v1145_v53 = vrot.slane %v4751_v39, 1  ;;  %v1475_v39 = vld [vmem:[#allocation2 + $0x458] sm:$0xff] }
 0x50a   :  { %1433 = vmatprep.subr.bf16.mxu1 %v1191_v54  ;;  %v1520_v54 = vld [vmem:[#allocation2 + $0x5c0] sm:$0xff] }
 0x50d   :  { %1434 = vmatpush1.bf16.msra.mxu1 %v1190_v55  ;;  %v1525_v55 = vld [vmem:[#allocation2 + $0x5e8] sm:$0xff] }
 0x50e   :  { %1435 = vmatprep.subr.bf16.mxu1 %v1195_v56  ;;  %v1146_v56 = vsel %vm321_vm3, %v1144_v52, %v1145_v53 }
 0x511   :  { %1436 = vmatpush1.bf16.msra.mxu1 %v1194_v57  ;;  %v1156_v57 = vsel %vm321_vm3, %v1145_v53, %v1144_v52 }
 0x512   :  { %1437 = vmatprep.subr.bf16.mxu1 %v1199_v58  ;;  %v1524_v58 = vld [vmem:[#allocation2 + $0x5e0] sm:$0xff] }
 0x515   :  { %1438 = vmatpush1.bf16.msra.mxu1 %v1198_v59  ;;  %v1467_v59 = vld [vmem:[#allocation2 + $0x418] sm:$0xff] }
 0x516   :  { %1439 = vmatprep.subr.bf16.mxu1 %v1203_v61  ;;  %v4819_v61 = vpack.c.bf16 %v1156_v57, %v1146_v56 }
 0x519   :  { %1440 = vmatpush1.bf16.msra.mxu1 %v1202_v62  ;;  %v1466_v62 = vld [vmem:[#allocation2 + $0x410] sm:$0xff] }
 0x51a   :  { %1441 = vmatprep.subr.bf16.mxu1 %v1207_v63  ;;  %v1471_v63 = vld [vmem:[#allocation2 + $0x438] sm:$0xff] }
 0x51d   :  { %1442 = vmatpush1.bf16.msra.mxu1 %v1206_v1  ;;  %v1474_v1 = vld [vmem:[#allocation2 + $0x450] sm:$0xff] }
 0x51e   :  { %1443 = vmatprep.subr.bf16.mxu1 %v1211_v2  ;;  %v1479_v2 = vld [vmem:[#allocation2 + $0x478] sm:$0xff] }
 0x521   :  { %1444 = vmatpush1.bf16.msra.mxu1 %v1210_v3  ;;  %v1478_v3 = vld [vmem:[#allocation2 + $0x470] sm:$0xff] }
 0x522   :  { %1445 = vmatprep.subr.bf16.mxu1 %v1215_v5  ;;  %v1483_v5 = vld [vmem:[#allocation2 + $0x498] sm:$0xff] }
 0x525   :  { %1446 = vmatpush1.bf16.msra.mxu1 %v1214_v6  ;;  %v1482_v6 = vld [vmem:[#allocation2 + $0x490] sm:$0xff] }
 0x526   :  { %1447 = vmatprep.subr.bf16.mxu1 %v1219_v7  ;;  %v1487_v7 = vld [vmem:[#allocation2 + $0x4b8] sm:$0xff] }
 0x529   :  { %1448 = vmatpush1.bf16.msra.mxu1 %v1218_v8  ;;  %v1486_v8 = vld [vmem:[#allocation2 + $0x4b0] sm:$0xff] }
 0x52a   :  { %1449 = vmatprep.subr.bf16.mxu1 %v1223_v9  ;;  %v1491_v9 = vld [vmem:[#allocation2 + $0x4d8] sm:$0xff] }
 0x52d   :  { %1450 = vmatpush1.bf16.msra.mxu1 %v1222_v10  ;;  %v1490_v10 = vld [vmem:[#allocation2 + $0x4d0] sm:$0xff] }
 0x52e   :  { %1451 = vmatprep.subr.bf16.mxu1 %v1227_v13  ;;  %v1499_v13 = vld [vmem:[#allocation2 + $0x518] sm:$0xff] }
 0x531   :  { %1452 = vmatpush1.bf16.msra.mxu1 %v1226_v14  ;;  %v1498_v14 = vld [vmem:[#allocation2 + $0x510] sm:$0xff] }
 0x532   :  { %1528 = vmatprep.subr.bf16.mxu1 %v1465_v17  ;;  %v1507_v17 = vld [vmem:[#allocation2 + $0x558] sm:$0xff] }
 0x534   :  { %3874 = vmatmul.mubr.msk.bf16.vlgmr.msra.gmra.mrb[12].mxu1 %vm4776_vm0, %v4788_v42  ;;  %v1500_v42 = vld [vmem:[#allocation2 + $0x520] sm:$0xff] }
 0x535   :  { %1529 = vmatpush1.bf16.msra.mxu1 %v1464_v19  ;;  %3877 = vmatprep.mubr.msk.bf16.mxu1 %vm4805_vm2, %v4801_v18  ;;  %v1511_v19 = vld [vmem:[#allocation2 + $0x578] sm:$0xff] }
 0x536   :  { %1530 = vmatprep.subr.bf16.mxu1 %v1469_v40  ;;  %v1510_v40 = vld [vmem:[#allocation2 + $0x570] sm:$0xff] }
 0x539   :  { %1531 = vmatpush1.bf16.msra.mxu1 %v1468_v20  ;;  %v1515_v20 = vld [vmem:[#allocation2 + $0x598] sm:$0xff] }
 0x53a   :  { %1532 = vmatprep.subr.bf16.mxu1 %v1473_v21  ;;  %v1514_v21 = vld [vmem:[#allocation2 + $0x590] sm:$0xff] }
 0x53d   :  { %1533 = vmatpush1.bf16.msra.mxu1 %v1472_v22  ;;  %v1519_v22 = vld [vmem:[#allocation2 + $0x5b8] sm:$0xff] }
 0x53e   :  { %1534 = vmatprep.subr.bf16.mxu1 %v1477_v23  ;;  %v1518_v23 = vld [vmem:[#allocation2 + $0x5b0] sm:$0xff] }
 0x541   :  { %1535 = vmatpush1.bf16.msra.mxu1 %v1476_v24  ;;  %v1523_v24 = vld [vmem:[#allocation2 + $0x5d8] sm:$0xff] }
 0x542   :  { %1536 = vmatprep.subr.bf16.mxu1 %v1481_v27  ;;  %v1522_v27 = vld [vmem:[#allocation2 + $0x5d0] sm:$0xff] }
 0x545   :  { %1537 = vmatpush1.bf16.msra.mxu1 %v1480_v60  ;;  %v1527_v60 = vld [vmem:[#allocation2 + $0x5f8] sm:$0xff] }
 0x546   :  { %1538 = vmatprep.subr.bf16.mxu1 %v1485_v29  ;;  %v1526_v29 = vld [vmem:[#allocation2 + $0x5f0] sm:$0xff] }
 0x549   :  { %1539 = vmatpush1.bf16.msra.mxu1 %v1484_v30  ;;  %v1107_v30 = vld [vmem:[#allocation10 + $0x4] ss:$8 sm:$0xf] }
 0x54a   :  { %1540 = vmatprep.subr.bf16.mxu1 %v1489_v31  ;;  %v1109_v31 = vld [vmem:[#allocation10 + $0x5] ss:$8 sm:$0xf] }
 0x54d   :  { %1541 = vmatpush1.bf16.msra.mxu1 %v1488_v32  ;;  %v1626_v32 = vrot.slane %v1107_v30, %v4727_v26 }
 0x54e   :  { %1542 = vmatprep.subr.bf16.mxu1 %v1493_v33  ;;  %v1630_v33 = vrot.slane %v1107_v30, %v4730_v28 }
 0x551   :  { %1543 = vmatpush1.bf16.msra.mxu1 %v1492_v34  ;;  %v1655_v34 = vrot.slane %v1109_v31, %v4727_v26 }
 0x552   :  { %1544 = vmatprep.subr.bf16.mxu1 %v1497_v35 }
 0x555   :  { %1545 = vmatpush1.bf16.msra.mxu1 %v1496_v36  ;;  %v1659_v36 = vrot.slane %v1109_v31, %v4730_v28 }
 0x556   :  { %1546 = vmatprep.subr.bf16.mxu1 %v1501_v41 }
 0x559   :  { %1547 = vmatpush1.bf16.msra.mxu1 %v1500_v42 }
 0x55a   :  { %1548 = vmatprep.subr.bf16.mxu1 %v1505_v43 }
 0x55d   :  { %1549 = vmatpush1.bf16.msra.mxu1 %v1504_v44 }
 0x55e   :  { %1550 = vmatprep.subr.bf16.mxu1 %v1509_v45 }
 0x561   :  { %1551 = vmatpush1.bf16.msra.mxu1 %v1508_v46 }
 0x562   :  { %1552 = vmatprep.subr.bf16.mxu1 %v1513_v47 }
 0x565   :  { %1553 = vmatpush1.bf16.msra.mxu1 %v1512_v48 }
 0x566   :  { %1554 = vmatprep.subr.bf16.mxu1 %v1517_v49 }
 0x569   :  { %1555 = vmatpush1.bf16.msra.mxu1 %v1516_v50 }
 0x56a   :  { %1556 = vmatprep.subr.bf16.mxu1 %v1521_v51 }
 0x56d   :  { %1557 = vmatpush1.bf16.msra.mxu1 %v1520_v54 }
 0x56e   :  { %1558 = vmatprep.subr.bf16.mxu1 %v1525_v55 }
 0x571   :  { %1559 = vmatpush1.bf16.msra.mxu1 %v1524_v58 }
 0x572   :  { %1571 = vmatprep.subr.bf16.mxu1 %v1467_v59 }
 0x574   :  { %3880 = vmatmul.mubr.msk.bf16.vlgmr.msra.gmra.mrb[8].mxu1 %vm4805_vm2, %v4819_v61 }
 0x575   :  { %1572 = vmatpush1.bf16.msra.mxu1 %v1466_v62  ;;  %3883 = vmatprep.mubr.msk.bf16.mxu1 %vm4805_vm2, %v4801_v18  ;;  %v1506_v18 = vld [vmem:[#allocation2 + $0x550] sm:$0xff] }
 0x576   :  { %1573 = vmatprep.subr.bf16.mxu1 %v1471_v63 }
 0x579   :  { %1574 = vmatpush1.bf16.msra.mxu1 %v1470_v37 }
 0x57a   :  { %1575 = vmatprep.subr.bf16.mxu1 %v1475_v39 }
 0x57d   :  { %1576 = vmatpush1.bf16.msra.mxu1 %v1474_v1 }
 0x57e   :  { %1577 = vmatprep.subr.bf16.mxu1 %v1479_v2 }
 0x581   :  { %1578 = vmatpush1.bf16.msra.mxu1 %v1478_v3 }
 0x582   :  { %1579 = vmatprep.subr.bf16.mxu1 %v1483_v5 }
 0x585   :  { %1580 = vmatpush1.bf16.msra.mxu1 %v1482_v6  ;;  %v4842_v6 = vsub.s32 2, %v4700_v4 }
 0x586   :  { %1581 = vmatprep.subr.bf16.mxu1 %v1487_v7  ;;  %v4845_v7 = vsub.s32 3, %v4700_v4 }
 0x589   :  { %1582 = vmatpush1.bf16.msra.mxu1 %v1486_v8  ;;  %v1634_v8 = vrot.slane %v1107_v30, %v4842_v6 }
 0x58a   :  { %1583 = vmatprep.subr.bf16.mxu1 %v1491_v9  ;;  %v1638_v9 = vrot.slane %v1107_v30, %v4845_v7 }
 0x58d   :  { %1584 = vmatpush1.bf16.msra.mxu1 %v1490_v10  ;;  %v1663_v10 = vrot.slane %v1109_v31, %v4842_v6 }
 0x58e   :  { %1585 = vmatprep.subr.bf16.mxu1 %v1495_v11 }
 0x591   :  { %1586 = vmatpush1.bf16.msra.mxu1 %v1494_v12  ;;  %v1667_v12 = vrot.slane %v1109_v31, %v4845_v7 }
 0x592   :  { %1587 = vmatprep.subr.bf16.mxu1 %v1499_v13 }
 0x595   :  { %1588 = vmatpush1.bf16.msra.mxu1 %v1498_v14 }
 0x596   :  { %1589 = vmatprep.subr.bf16.mxu1 %v1503_v15 }
 0x599   :  { %1590 = vmatpush1.bf16.msra.mxu1 %v1502_v16 }
 0x59a   :  { %1591 = vmatprep.subr.bf16.mxu1 %v1507_v17 }
 0x59d   :  { %1592 = vmatpush1.bf16.msra.mxu1 %v1506_v18 }
 0x59e   :  { %1593 = vmatprep.subr.bf16.mxu1 %v1511_v19 }
 0x5a1   :  { %1594 = vmatpush1.bf16.msra.mxu1 %v1510_v40 }
 0x5a2   :  { %1595 = vmatprep.subr.bf16.mxu1 %v1515_v20 }
 0x5a5   :  { %1596 = vmatpush1.bf16.msra.mxu1 %v1514_v21 }
 0x5a6   :  { %1597 = vmatprep.subr.bf16.mxu1 %v1519_v22 }
 0x5a9   :  { %1598 = vmatpush1.bf16.msra.mxu1 %v1518_v23 }
 0x5aa   :  { %1599 = vmatprep.subr.bf16.mxu1 %v1523_v24 }
 0x5ad   :  { %1600 = vmatpush1.bf16.msra.mxu1 %v1522_v27 }
 0x5ae   :  { %1601 = vmatprep.subr.bf16.mxu1 %v1527_v60 }
 0x5b1   :  { %1602 = vmatpush1.bf16.msra.mxu1 %v1526_v29 }
 0x5b4   :  { %3886 = vmatmul.mubr.msk.bf16.vlgmr.msra.gmra.mrb[12].mxu1 %vm4805_vm2, %v4819_v61 }
 0x647   :  { %v1562_v35 = vpop.f32.mrb[8].mxu1 }
 0x648   :  { %v1643_v41 = vmul.f32 %v1626_v32, %v1562_v35  ;;  %v1564_v42 = vpop.f32.mrb[9].mxu1 }
 0x649   :  { %v1644_v43 = vmul.f32 %v1630_v33, %v1564_v42  ;;  %v1566_v44 = vpop.f32.mrb[10].mxu1 }
 0x64a   :  { %v1672_v45 = vadd.f32 %v1655_v34, %v1643_v41  ;;  %v1647_v46 = vmul.f32 %v1626_v32, %v1566_v44  ;;  %v1568_v47 = vpop.f32.mrb[11].mxu1 }
 0x64b   :  { %v1673_v38 = vadd.f32 %v1659_v36, %v1644_v43  ;;  %v1648_v48 = vmul.f32 %v1630_v33, %v1568_v47 }
 0x64c   :  { %v1680_v49 = vmax.f32 %v1672_v45, 0.0  ;;  %v1676_v50 = vadd.f32 %v1655_v34, %v1647_v46 }
 0x64d   :  { %v1681_v51 = vmax.f32 %v1673_v38, 0.0  ;;  %v1677_v52 = vadd.f32 %v1659_v36, %v1648_v48 }
 0x64e   :  { %v1684_v53 = vmax.f32 %v1676_v50, 0.0  ;;  %v1696_v55 = vrot.slane %v1680_v49, 1 }
 0x64f   :  { %v1685_v54 = vmax.f32 %v1677_v52, 0.0  ;;  %v1699_v57 = vrot.slane %v1681_v51, 1 }
 0x650   :  { %v1697_v56 = vrot.slane %v1684_v53, 1 }
 0x651   :  { %v1700_v58 = vrot.slane %v1685_v54, 1 }
 0x652   :  { %v1698_v59 = vsel %vm321_vm3, %v1696_v55, %v1697_v56  ;;  %v1720_v61 = vsel %vm321_vm3, %v1697_v56, %v1696_v55 }
 0x653   :  { %v1701_v62 = vsel %vm321_vm3, %v1699_v57, %v1700_v58  ;;  %v1721_v63 = vsel %vm321_vm3, %v1700_v58, %v1699_v57  ;;  %v1724_v37 = vmax.f32 %v1680_v49, %v1698_v59  ;;  %v1728_v39 = vmax.f32 %v1684_v53, %v1720_v61 }
 0x654   :  { %v1725_v1 = vmax.f32 %v1681_v51, %v1701_v62  ;;  %v1729_v2 = vmax.f32 %v1685_v54, %v1721_v63 }
 0x655   :  { %v1732_v3 = vpack.c.bf16 %v1728_v39, %v1724_v37 }
 0x656   :  { %v1733_v5 = vpack.c.bf16 %v1729_v2, %v1725_v1 }
 0x658   :  { %1740 = vmatprep.subr.bf16.mxu0 %v1733_v5 }
 0x659   :  { %1741 = vmatpush1.bf16.msra.mxu0 %v1732_v3 }
 0x65c   :  { %3887 = vmatmul.mubr.msk.bf16.vlgmr.msra.gmra.mrb[16].mxu0 %vm1736_vm4, %v4643_v0 }
 0x65d   :  { %1813 = vmatprep.mubr.bf16.mxu0 %v5710_v25 }
 0x687   :  { %v1605_v11 = vpop.f32.mrb[12].mxu1 }
 0x688   :  { %v1645_v13 = vmul.f32 %v1634_v8, %v1605_v11  ;;  %v1607_v14 = vpop.f32.mrb[13].mxu1 }
 0x689   :  { %v1646_v15 = vmul.f32 %v1638_v9, %v1607_v14  ;;  %v1609_v16 = vpop.f32.mrb[14].mxu1 }
 0x68a   :  { %v1674_v17 = vadd.f32 %v1663_v10, %v1645_v13  ;;  %v1649_v18 = vmul.f32 %v1634_v8, %v1609_v16  ;;  %v1611_v19 = vpop.f32.mrb[15].mxu1 }
 0x68b   :  { %v1675_v40 = vadd.f32 %v1667_v12, %v1646_v15  ;;  %v1650_v20 = vmul.f32 %v1638_v9, %v1611_v19 }
 0x68c   :  { %v1682_v21 = vmax.f32 %v1674_v17, 0.0  ;;  %v1678_v22 = vadd.f32 %v1663_v10, %v1649_v18 }
 0x68d   :  { %v1683_v23 = vmax.f32 %v1675_v40, 0.0  ;;  %v1679_v24 = vadd.f32 %v1667_v12, %v1650_v20 }
 0x68e   :  { %v1686_v27 = vmax.f32 %v1678_v22, 0.0  ;;  %v1702_v29 = vrot.slane %v1682_v21, 1 }
 0x68f   :  { %v1687_v60 = vmax.f32 %v1679_v24, 0.0  ;;  %v1705_v32 = vrot.slane %v1683_v23, 1 }
 0x690   :  { %v1703_v30 = vrot.slane %v1686_v27, 1 }
 0x691   :  { %v1706_v33 = vrot.slane %v1687_v60, 1 }
 0x692   :  { %v1704_v31 = vsel %vm321_vm3, %v1702_v29, %v1703_v30  ;;  %v1722_v34 = vsel %vm321_vm3, %v1703_v30, %v1702_v29 }
 0x693   :  { %v1726_v35 = vmax.f32 %v1682_v21, %v1704_v31  ;;  %v1730_v36 = vmax.f32 %v1686_v27, %v1722_v34  ;;  %v1723_v41 = vsel %vm321_vm3, %v1706_v33, %v1705_v32  ;;  %v1707_v42 = vsel %vm321_vm3, %v1705_v32, %v1706_v33 }
 0x694   :  { %v1731_v43 = vmax.f32 %v1687_v60, %v1723_v41  ;;  %v1727_v44 = vmax.f32 %v1683_v23, %v1707_v42 }
 0x695   :  { %v1734_v45 = vpack.c.bf16 %v1730_v36, %v1726_v35 }
 0x696   :  { %v1735_v46 = vpack.c.bf16 %v1731_v43, %v1727_v44 }
 0x698   :  { %1781 = vmatprep.subr.bf16.mxu0 %v1735_v46 }
 0x699   :  { %1782 = vmatpush1.bf16.msra.mxu0 %v1734_v45 }
 0x69c   :  { %3888 = vmatmul.mubr.msk.bf16.vlgmr.msra.gmra.mrb[20].mxu0 %vm1736_vm4, %v4643_v0 }
 0x72f   :  { %v4857_v47 = vpop.f32.mrb[16].mxu0 }
 0x730   :  { %v1776_v38 = vpop.f32.mrb[17].mxu0 }
 0x731   :  { %v1778_v48 = vpop.f32.mrb[18].mxu0 }
 0x732   :  { %v1779_v49 = vpop.f32.mrb[19].mxu0 }
 0x76f   :  { %v4859_v50 = vpop.f32.mrb[20].mxu0 }
 0x770   :  { %v4861_v51 = vpop.f32.mrb[21].mxu0 }
 0x771   :  { %v1819_v52 = vpop.f32.mrb[22].mxu0 }
 0x772   :  { %v1820_v53 = vpop.f32.mrb[23].mxu0 }
 0x773   :  { %4489 = dma.done.wait [#allocation5 + $0x1], 32768 }
 0x774   :  { %4490 = vsyncadd [#allocation5 + $0x1], 4294934528  ;;  %v4863_v54 = vpack.c.bf16 %v1776_v38, %v1776_v38  ;;  %v1835_v0 = vld [vmem:[#allocation3 + $0x8] sm:$0xff]  ;;  %v1834_v55 = vld [vmem:[#allocation3] sm:$0xff]  ;;  %v4869_v27 = vpack.c.bf16 %v4857_v47, %v4857_v47  ;;  %v4873_v60 = vpack.c.bf16 %v4861_v51, %v4861_v51 }
 0x775   :  { %v1843_v56 = vld [vmem:[#allocation3 + $0x48] sm:$0xff]  ;;  %2131 = vmatprep.subr.bf16.mxu0 %v1835_v0  ;;  %v1842_v57 = vld [vmem:[#allocation3 + $0x40] sm:$0xff]  ;;  %v1841_v29 = vld [vmem:[#allocation3 + $0x38] sm:$0xff] }
 0x776   :  { %2163 = vmatprep.mubr.bf16.mxu0 %v4863_v54  ;;  %2409 = vmatprep.mubr.bf16.mxu1 %v4863_v54  ;;  %v1851_v58 = vld [vmem:[#allocation3 + $0x88] sm:$0xff]  ;;  %v1850_v59 = vld [vmem:[#allocation3 + $0x80] sm:$0xff]  ;;  %v1840_v30 = vld [vmem:[#allocation3 + $0x30] sm:$0xff] }
 0x777   :  { %2132 = vmatpush1.bf16.msra.mxu0 %v1834_v55  ;;  %v1859_v61 = vld [vmem:[#allocation3 + $0xc8] sm:$0xff]  ;;  %v1858_v62 = vld [vmem:[#allocation3 + $0xc0] sm:$0xff]  ;;  %2377 = vmatprep.subr.bf16.mxu1 %v1841_v29  ;;  %v1849_v31 = vld [vmem:[#allocation3 + $0x78] sm:$0xff] }
 0x778   :  { %2133 = vmatprep.subr.bf16.mxu0 %v1843_v56  ;;  %v1867_v63 = vld [vmem:[#allocation3 + $0x108] sm:$0xff]  ;;  %v1866_v37 = vld [vmem:[#allocation3 + $0x100] sm:$0xff]  ;;  %2378 = vmatpush1.bf16.msra.mxu1 %v1840_v30  ;;  %v1848_v34 = vld [vmem:[#allocation3 + $0x70] sm:$0xff] }
 0x779   :  { %v1875_v39 = vld [vmem:[#allocation3 + $0x148] sm:$0xff]  ;;  %v1874_v1 = vld [vmem:[#allocation3 + $0x140] sm:$0xff]  ;;  %2379 = vmatprep.subr.bf16.mxu1 %v1849_v31  ;;  %v1857_v41 = vld [vmem:[#allocation3 + $0xb8] sm:$0xff] }
 0x77a   :  { %v1883_v2 = vld [vmem:[#allocation3 + $0x188] sm:$0xff]  ;;  %v1882_v3 = vld [vmem:[#allocation3 + $0x180] sm:$0xff]  ;;  %v1856_v42 = vld [vmem:[#allocation3 + $0xb0] sm:$0xff] }
 0x77b   :  { %2134 = vmatpush1.bf16.msra.mxu0 %v1842_v57  ;;  %v1891_v5 = vld [vmem:[#allocation3 + $0x1c8] sm:$0xff]  ;;  %v1890_v8 = vld [vmem:[#allocation3 + $0x1c0] sm:$0xff]  ;;  %v1865_v45 = vld [vmem:[#allocation3 + $0xf8] sm:$0xff] }
 0x77c   :  { %2135 = vmatprep.subr.bf16.mxu0 %v1851_v58  ;;  %v1899_v9 = vld [vmem:[#allocation3 + $0x208] sm:$0xff]  ;;  %v1898_v10 = vld [vmem:[#allocation3 + $0x200] sm:$0xff]  ;;  %2380 = vmatpush1.bf16.msra.mxu1 %v1848_v34  ;;  %v1864_v46 = vld [vmem:[#allocation3 + $0xf0] sm:$0xff] }
 0x77d   :  { %v1907_v11 = vld [vmem:[#allocation3 + $0x248] sm:$0xff]  ;;  %v1906_v12 = vld [vmem:[#allocation3 + $0x240] sm:$0xff]  ;;  %2381 = vmatprep.subr.bf16.mxu1 %v1857_v41  ;;  %v1873_v48 = vld [vmem:[#allocation3 + $0x138] sm:$0xff] }
 0x77e   :  { %v1915_v13 = vld [vmem:[#allocation3 + $0x288] sm:$0xff]  ;;  %v1914_v14 = vld [vmem:[#allocation3 + $0x280] sm:$0xff]  ;;  %v1872_v49 = vld [vmem:[#allocation3 + $0x130] sm:$0xff] }
 0x77f   :  { %2136 = vmatpush1.bf16.msra.mxu0 %v1850_v59  ;;  %v1923_v15 = vld [vmem:[#allocation3 + $0x2c8] sm:$0xff]  ;;  %v1922_v16 = vld [vmem:[#allocation3 + $0x2c0] sm:$0xff]  ;;  %v1881_v53 = vld [vmem:[#allocation3 + $0x178] sm:$0xff] }
 0x780   :  { %2137 = vmatprep.subr.bf16.mxu0 %v1859_v61  ;;  %v1931_v17 = vld [vmem:[#allocation3 + $0x308] sm:$0xff]  ;;  %v1930_v18 = vld [vmem:[#allocation3 + $0x300] sm:$0xff]  ;;  %2382 = vmatpush1.bf16.msra.mxu1 %v1856_v42  ;;  %v1880_v0 = vld [vmem:[#allocation3 + $0x170] sm:$0xff] }
 0x781   :  { %v1939_v19 = vld [vmem:[#allocation3 + $0x348] sm:$0xff]  ;;  %v1938_v40 = vld [vmem:[#allocation3 + $0x340] sm:$0xff]  ;;  %2383 = vmatprep.subr.bf16.mxu1 %v1865_v45  ;;  %v1889_v57 = vld [vmem:[#allocation3 + $0x1b8] sm:$0xff] }
 0x782   :  { %v1947_v20 = vld [vmem:[#allocation3 + $0x388] sm:$0xff]  ;;  %v1946_v21 = vld [vmem:[#allocation3 + $0x380] sm:$0xff]  ;;  %v1888_v58 = vld [vmem:[#allocation3 + $0x1b0] sm:$0xff] }
 0x783   :  { %2138 = vmatpush1.bf16.msra.mxu0 %v1858_v62  ;;  %v1955_v22 = vld [vmem:[#allocation3 + $0x3c8] sm:$0xff]  ;;  %v1954_v23 = vld [vmem:[#allocation3 + $0x3c0] sm:$0xff]  ;;  %v1897_v62 = vld [vmem:[#allocation3 + $0x1f8] sm:$0xff] }
 0x784   :  { %2139 = vmatprep.subr.bf16.mxu0 %v1867_v63  ;;  %v1963_v24 = vld [vmem:[#allocation3 + $0x408] sm:$0xff]  ;;  %v1962_v32 = vld [vmem:[#allocation3 + $0x400] sm:$0xff]  ;;  %2384 = vmatpush1.bf16.msra.mxu1 %v1864_v46  ;;  %v1896_v63 = vld [vmem:[#allocation3 + $0x1f0] sm:$0xff] }
 0x785   :  { %v1971_v33 = vld [vmem:[#allocation3 + $0x448] sm:$0xff]  ;;  %v1970_v35 = vld [vmem:[#allocation3 + $0x440] sm:$0xff]  ;;  %2385 = vmatprep.subr.bf16.mxu1 %v1873_v48  ;;  %v1837_v42 = vld [vmem:[#allocation3 + $0x18] sm:$0xff] }
 0x786   :  { %v1979_v36 = vld [vmem:[#allocation3 + $0x488] sm:$0xff]  ;;  %v1978_v43 = vld [vmem:[#allocation3 + $0x480] sm:$0xff]  ;;  %v1968_v45 = vld [vmem:[#allocation3 + $0x430] sm:$0xff] }
 0x787   :  { %2140 = vmatpush1.bf16.msra.mxu0 %v1866_v37  ;;  %v1987_v44 = vld [vmem:[#allocation3 + $0x4c8] sm:$0xff]  ;;  %v1986_v47 = vld [vmem:[#allocation3 + $0x4c0] sm:$0xff]  ;;  %v1836_v46 = vld [vmem:[#allocation3 + $0x10] sm:$0xff] }
 0x788   :  { %2141 = vmatprep.subr.bf16.mxu0 %v1875_v39  ;;  %v1995_v38 = vld [vmem:[#allocation3 + $0x508] sm:$0xff]  ;;  %v1994_v51 = vld [vmem:[#allocation3 + $0x500] sm:$0xff]  ;;  %2386 = vmatpush1.bf16.msra.mxu1 %v1872_v49  ;;  %v1976_v48 = vld [vmem:[#allocation3 + $0x470] sm:$0xff] }
 0x789   :  { %v2003_v52 = vld [vmem:[#allocation3 + $0x548] sm:$0xff]  ;;  %v2002_v55 = vld [vmem:[#allocation3 + $0x540] sm:$0xff]  ;;  %2387 = vmatprep.subr.bf16.mxu1 %v1881_v53  ;;  %v1853_v49 = vld [vmem:[#allocation3 + $0x98] sm:$0xff] }
 0x78a   :  { %v2011_v56 = vld [vmem:[#allocation3 + $0x588] sm:$0xff]  ;;  %v2010_v59 = vld [vmem:[#allocation3 + $0x580] sm:$0xff]  ;;  %v1852_v53 = vld [vmem:[#allocation3 + $0x90] sm:$0xff] }
 0x78b   :  { %2142 = vmatpush1.bf16.msra.mxu0 %v1874_v1  ;;  %v2019_v61 = vld [vmem:[#allocation3 + $0x5c8] sm:$0xff]  ;;  %v2018_v37 = vld [vmem:[#allocation3 + $0x5c0] sm:$0xff]  ;;  %v1905_v1 = vld [vmem:[#allocation3 + $0x238] sm:$0xff] }
 0x78c   :  { %2143 = vmatprep.subr.bf16.mxu0 %v1883_v2  ;;  %2388 = vmatpush1.bf16.msra.mxu1 %v1880_v0  ;;  %v2027_v39 = vld [vmem:[#allocation3 + $0x608] sm:$0xff]  ;;  %v1904_v2 = vld [vmem:[#allocation3 + $0x230] sm:$0xff]  ;;  %v2066_v29 = vld [vmem:[#allocation3 + $0x740] sm:$0xff] }
 0x78d   :  { %2389 = vmatprep.subr.bf16.mxu1 %v1889_v57  ;;  %v2075_v30 = vld [vmem:[#allocation3 + $0x788] sm:$0xff]  ;;  %v2074_v31 = vld [vmem:[#allocation3 + $0x780] sm:$0xff]  ;;  %v1861_v0 = vld [vmem:[#allocation3 + $0xd8] sm:$0xff] }
 0x78e   :  { %v2083_v34 = vld [vmem:[#allocation3 + $0x7c8] sm:$0xff]  ;;  %v2082_v41 = vld [vmem:[#allocation3 + $0x7c0] sm:$0xff]  ;;  %v1860_v57 = vld [vmem:[#allocation3 + $0xd0] sm:$0xff] }
 0x78f   :  { %2144 = vmatpush1.bf16.msra.mxu0 %v1882_v3  ;;  %v2026_v3 = vld [vmem:[#allocation3 + $0x600] sm:$0xff] }
 0x790   :  { %2145 = vmatprep.subr.bf16.mxu0 %v1891_v5  ;;  %2390 = vmatpush1.bf16.msra.mxu1 %v1888_v58  ;;  %v2035_v5 = vld [vmem:[#allocation3 + $0x648] sm:$0xff]  ;;  %v1869_v58 = vld [vmem:[#allocation3 + $0x118] sm:$0xff] }
 0x791   :  { %2391 = vmatprep.subr.bf16.mxu1 %v1897_v62  ;;  %v1868_v62 = vld [vmem:[#allocation3 + $0x110] sm:$0xff] }
 0x793   :  { %2146 = vmatpush1.bf16.msra.mxu0 %v1890_v8  ;;  %v1913_v8 = vld [vmem:[#allocation3 + $0x278] sm:$0xff] }
 0x794   :  { %2147 = vmatprep.subr.bf16.mxu0 %v1899_v9  ;;  %2392 = vmatpush1.bf16.msra.mxu1 %v1896_v63  ;;  %v1912_v9 = vld [vmem:[#allocation3 + $0x270] sm:$0xff]  ;;  %v1877_v63 = vld [vmem:[#allocation3 + $0x158] sm:$0xff] }
 0x795   :  { %2393 = vmatprep.subr.bf16.mxu1 %v1905_v1  ;;  %v1876_v1 = vld [vmem:[#allocation3 + $0x150] sm:$0xff] }
 0x797   :  { %2148 = vmatpush1.bf16.msra.mxu0 %v1898_v10  ;;  %v2034_v10 = vld [vmem:[#allocation3 + $0x640] sm:$0xff] }
 0x798   :  { %2149 = vmatprep.subr.bf16.mxu0 %v1907_v11  ;;  %2394 = vmatpush1.bf16.msra.mxu1 %v1904_v2  ;;  %v2043_v11 = vld [vmem:[#allocation3 + $0x688] sm:$0xff]  ;;  %v1885_v2 = vld [vmem:[#allocation3 + $0x198] sm:$0xff] }
 0x799   :  { %2395 = vmatprep.subr.bf16.mxu1 %v1913_v8  ;;  %v1884_v8 = vld [vmem:[#allocation3 + $0x190] sm:$0xff] }
 0x79b   :  { %2150 = vmatpush1.bf16.msra.mxu0 %v1906_v12  ;;  %v1921_v12 = vld [vmem:[#allocation3 + $0x2b8] sm:$0xff] }
 0x79c   :  { %2151 = vmatprep.subr.bf16.mxu0 %v1915_v13  ;;  %2396 = vmatpush1.bf16.msra.mxu1 %v1912_v9  ;;  %v1920_v13 = vld [vmem:[#allocation3 + $0x2b0] sm:$0xff]  ;;  %v1893_v9 = vld [vmem:[#allocation3 + $0x1d8] sm:$0xff] }
 0x79d   :  { %2397 = vmatprep.subr.bf16.mxu1 %v1921_v12  ;;  %v1892_v12 = vld [vmem:[#allocation3 + $0x1d0] sm:$0xff] }
 0x79f   :  { %2152 = vmatpush1.bf16.msra.mxu0 %v1914_v14  ;;  %v2042_v14 = vld [vmem:[#allocation3 + $0x680] sm:$0xff] }
 0x7a0   :  { %2153 = vmatprep.subr.bf16.mxu0 %v1923_v15  ;;  %v2051_v15 = vld [vmem:[#allocation3 + $0x6c8] sm:$0xff]  ;;  %2398 = vmatpush1.bf16.msra.mxu1 %v1920_v13  ;;  %v1901_v13 = vld [vmem:[#allocation3 + $0x218] sm:$0xff] }
 0x7a3   :  { %2154 = vmatpush1.bf16.msra.mxu0 %v1922_v16  ;;  %v1929_v16 = vld [vmem:[#allocation3 + $0x2f8] sm:$0xff] }
 0x7a4   :  { %2155 = vmatprep.subr.bf16.mxu0 %v1931_v17  ;;  %v1928_v17 = vld [vmem:[#allocation3 + $0x2f0] sm:$0xff]  ;;  %2399 = vmatprep.subr.bf16.mxu1 %v1929_v16 }
 0x7a5   :  { %2400 = vmatpush1.bf16.msra.mxu1 %v1928_v17  ;;  %v1900_v16 = vld [vmem:[#allocation3 + $0x210] sm:$0xff]  ;;  %v1909_v17 = vld [vmem:[#allocation3 + $0x258] sm:$0xff] }
 0x7a7   :  { %2156 = vmatpush1.bf16.msra.mxu0 %v1930_v18  ;;  %v2050_v18 = vld [vmem:[#allocation3 + $0x6c0] sm:$0xff] }
 0x7a8   :  { %2157 = vmatprep.subr.bf16.mxu0 %v1939_v19  ;;  %v2059_v19 = vld [vmem:[#allocation3 + $0x708] sm:$0xff] }
 0x7ab   :  { %2158 = vmatpush1.bf16.msra.mxu0 %v1938_v40  ;;  %v1937_v40 = vld [vmem:[#allocation3 + $0x338] sm:$0xff] }
 0x7ac   :  { %2159 = vmatprep.subr.bf16.mxu0 %v1947_v20  ;;  %v1936_v20 = vld [vmem:[#allocation3 + $0x330] sm:$0xff]  ;;  %2401 = vmatprep.subr.bf16.mxu1 %v1937_v40 }
 0x7ad   :  { %2402 = vmatpush1.bf16.msra.mxu1 %v1936_v20  ;;  %v1908_v40 = vld [vmem:[#allocation3 + $0x250] sm:$0xff]  ;;  %v1917_v20 = vld [vmem:[#allocation3 + $0x298] sm:$0xff] }
 0x7af   :  { %2160 = vmatpush1.bf16.msra.mxu0 %v1946_v21  ;;  %v2058_v21 = vld [vmem:[#allocation3 + $0x700] sm:$0xff] }
 0x7b0   :  { %2161 = vmatprep.subr.bf16.mxu0 %v1955_v22  ;;  %v2067_v22 = vld [vmem:[#allocation3 + $0x748] sm:$0xff] }
 0x7b3   :  { %2162 = vmatpush1.bf16.msra.mxu0 %v1954_v23  ;;  %v1945_v23 = vld [vmem:[#allocation3 + $0x378] sm:$0xff] }
 0x7b4   :  { %2172 = vmatprep.subr.bf16.mxu0 %v1963_v24  ;;  %v1944_v24 = vld [vmem:[#allocation3 + $0x370] sm:$0xff]  ;;  %2403 = vmatprep.subr.bf16.mxu1 %v1945_v23 }
 0x7b5   :  { %2404 = vmatpush1.bf16.msra.mxu1 %v1944_v24  ;;  %v1916_v23 = vld [vmem:[#allocation3 + $0x290] sm:$0xff]  ;;  %v1925_v24 = vld [vmem:[#allocation3 + $0x2d8] sm:$0xff] }
 0x7b6   :  { %2164 = vmatmul.mubr.bf16.vlgmr.msra.gmra.mrb[24].mxu0 %v4869_v27 }
 0x7b7   :  { %2173 = vmatpush1.bf16.msra.mxu0 %v1962_v32  ;;  %2204 = vmatprep.mubr.bf16.mxu0 %v4873_v60  ;;  %v1953_v32 = vld [vmem:[#allocation3 + $0x3b8] sm:$0xff] }
 0x7b8   :  { %2174 = vmatprep.subr.bf16.mxu0 %v1971_v33  ;;  %v1952_v33 = vld [vmem:[#allocation3 + $0x3b0] sm:$0xff]  ;;  %2405 = vmatprep.subr.bf16.mxu1 %v1953_v32 }
 0x7b9   :  { %2406 = vmatpush1.bf16.msra.mxu1 %v1952_v33  ;;  %v1924_v32 = vld [vmem:[#allocation3 + $0x2d0] sm:$0xff]  ;;  %v1933_v33 = vld [vmem:[#allocation3 + $0x318] sm:$0xff] }
 0x7bb   :  { %2175 = vmatpush1.bf16.msra.mxu0 %v1970_v35  ;;  %v1961_v35 = vld [vmem:[#allocation3 + $0x3f8] sm:$0xff] }
 0x7bc   :  { %2176 = vmatprep.subr.bf16.mxu0 %v1979_v36  ;;  %v1960_v36 = vld [vmem:[#allocation3 + $0x3f0] sm:$0xff]  ;;  %2407 = vmatprep.subr.bf16.mxu1 %v1961_v35 }
 0x7bd   :  { %2408 = vmatpush1.bf16.msra.mxu1 %v1960_v36  ;;  %v1932_v35 = vld [vmem:[#allocation3 + $0x310] sm:$0xff]  ;;  %v1941_v36 = vld [vmem:[#allocation3 + $0x358] sm:$0xff] }
 0x7bf   :  { %2177 = vmatpush1.bf16.msra.mxu0 %v1978_v43  ;;  %v4879_v43 = vpack.c.bf16 %v4859_v50, %v4859_v50  ;;  %v1844_v50 = vld [vmem:[#allocation3 + $0x50] sm:$0xff] }
 0x7c0   :  { %2178 = vmatprep.subr.bf16.mxu0 %v1987_v44  ;;  %v1969_v44 = vld [vmem:[#allocation3 + $0x438] sm:$0xff]  ;;  %2410 = vmatmul.mubr.bf16.vlgmr.msra.gmra.mrb[16].mxu1 %v4869_v27 }
 0x7c1   :  { %2418 = vmatprep.subr.bf16.mxu1 %v1969_v44  ;;  %2450 = vmatprep.mubr.bf16.mxu1 %v4873_v60  ;;  %v1940_v44 = vld [vmem:[#allocation3 + $0x350] sm:$0xff] }
 0x7c2   :  { %2419 = vmatpush1.bf16.msra.mxu1 %v1968_v45  ;;  %v1949_v45 = vld [vmem:[#allocation3 + $0x398] sm:$0xff] }
 0x7c3   :  { %2179 = vmatpush1.bf16.msra.mxu0 %v1986_v47  ;;  %v1845_v47 = vld [vmem:[#allocation3 + $0x58] sm:$0xff] }
 0x7c4   :  { %2180 = vmatprep.subr.bf16.mxu0 %v1995_v38  ;;  %v1977_v38 = vld [vmem:[#allocation3 + $0x478] sm:$0xff] }
 0x7c5   :  { %2420 = vmatprep.subr.bf16.mxu1 %v1977_v38  ;;  %v1948_v38 = vld [vmem:[#allocation3 + $0x390] sm:$0xff] }
 0x7c6   :  { %2421 = vmatpush1.bf16.msra.mxu1 %v1976_v48  ;;  %v1957_v48 = vld [vmem:[#allocation3 + $0x3d8] sm:$0xff] }
 0x7c7   :  { %2181 = vmatpush1.bf16.msra.mxu0 %v1994_v51  ;;  %v1985_v51 = vld [vmem:[#allocation3 + $0x4b8] sm:$0xff] }
 0x7c8   :  { %2182 = vmatprep.subr.bf16.mxu0 %v2003_v52  ;;  %v1984_v52 = vld [vmem:[#allocation3 + $0x4b0] sm:$0xff]  ;;  %2422 = vmatprep.subr.bf16.mxu1 %v1985_v51 }
 0x7c9   :  { %v1956_v51 = vld [vmem:[#allocation3 + $0x3d0] sm:$0xff] }
 0x7ca   :  { %2423 = vmatpush1.bf16.msra.mxu1 %v1984_v52  ;;  %v1965_v52 = vld [vmem:[#allocation3 + $0x418] sm:$0xff] }
 0x7cb   :  { %2183 = vmatpush1.bf16.msra.mxu0 %v2002_v55  ;;  %v1993_v55 = vld [vmem:[#allocation3 + $0x4f8] sm:$0xff] }
 0x7cc   :  { %2184 = vmatprep.subr.bf16.mxu0 %v2011_v56  ;;  %v1992_v56 = vld [vmem:[#allocation3 + $0x4f0] sm:$0xff]  ;;  %2424 = vmatprep.subr.bf16.mxu1 %v1993_v55 }
 0x7cd   :  { %v1972_v55 = vld [vmem:[#allocation3 + $0x450] sm:$0xff] }
 0x7ce   :  { %2425 = vmatpush1.bf16.msra.mxu1 %v1992_v56  ;;  %v1981_v56 = vld [vmem:[#allocation3 + $0x498] sm:$0xff] }
 0x7cf   :  { %2185 = vmatpush1.bf16.msra.mxu0 %v2010_v59  ;;  %v2001_v59 = vld [vmem:[#allocation3 + $0x538] sm:$0xff] }
 0x7d0   :  { %2186 = vmatprep.subr.bf16.mxu0 %v2019_v61  ;;  %v2000_v61 = vld [vmem:[#allocation3 + $0x530] sm:$0xff]  ;;  %2426 = vmatprep.subr.bf16.mxu1 %v2001_v59 }
 0x7d1   :  { %v1988_v59 = vld [vmem:[#allocation3 + $0x4d0] sm:$0xff] }
 0x7d2   :  { %2427 = vmatpush1.bf16.msra.mxu1 %v2000_v61  ;;  %v1997_v61 = vld [vmem:[#allocation3 + $0x518] sm:$0xff] }
 0x7d3   :  { %2187 = vmatpush1.bf16.msra.mxu0 %v2018_v37  ;;  %v2009_v37 = vld [vmem:[#allocation3 + $0x578] sm:$0xff] }
 0x7d4   :  { %2188 = vmatprep.subr.bf16.mxu0 %v2027_v39  ;;  %v2008_v39 = vld [vmem:[#allocation3 + $0x570] sm:$0xff]  ;;  %2428 = vmatprep.subr.bf16.mxu1 %v2009_v37 }
 0x7d5   :  { %v2004_v37 = vld [vmem:[#allocation3 + $0x550] sm:$0xff] }
 0x7d6   :  { %2429 = vmatpush1.bf16.msra.mxu1 %v2008_v39  ;;  %v2013_v39 = vld [vmem:[#allocation3 + $0x598] sm:$0xff] }
 0x7d7   :  { %2189 = vmatpush1.bf16.msra.mxu0 %v2026_v3  ;;  %v2017_v3 = vld [vmem:[#allocation3 + $0x5b8] sm:$0xff] }
 0x7d8   :  { %2190 = vmatprep.subr.bf16.mxu0 %v2035_v5  ;;  %v2016_v5 = vld [vmem:[#allocation3 + $0x5b0] sm:$0xff]  ;;  %2430 = vmatprep.subr.bf16.mxu1 %v2017_v3 }
 0x7d9   :  { %v2020_v3 = vld [vmem:[#allocation3 + $0x5d0] sm:$0xff] }
 0x7da   :  { %2431 = vmatpush1.bf16.msra.mxu1 %v2016_v5  ;;  %v2029_v5 = vld [vmem:[#allocation3 + $0x618] sm:$0xff] }
 0x7db   :  { %2191 = vmatpush1.bf16.msra.mxu0 %v2034_v10  ;;  %v2025_v10 = vld [vmem:[#allocation3 + $0x5f8] sm:$0xff] }
 0x7dc   :  { %2192 = vmatprep.subr.bf16.mxu0 %v2043_v11  ;;  %v2024_v11 = vld [vmem:[#allocation3 + $0x5f0] sm:$0xff]  ;;  %2432 = vmatprep.subr.bf16.mxu1 %v2025_v10 }
 0x7dd   :  { %v2036_v10 = vld [vmem:[#allocation3 + $0x650] sm:$0xff] }
 0x7de   :  { %2433 = vmatpush1.bf16.msra.mxu1 %v2024_v11  ;;  %v2045_v11 = vld [vmem:[#allocation3 + $0x698] sm:$0xff] }
 0x7df   :  { %2193 = vmatpush1.bf16.msra.mxu0 %v2042_v14  ;;  %v2033_v14 = vld [vmem:[#allocation3 + $0x638] sm:$0xff] }
 0x7e0   :  { %2194 = vmatprep.subr.bf16.mxu0 %v2051_v15  ;;  %v2032_v15 = vld [vmem:[#allocation3 + $0x630] sm:$0xff]  ;;  %2434 = vmatprep.subr.bf16.mxu1 %v2033_v14 }
 0x7e1   :  { %v2052_v14 = vld [vmem:[#allocation3 + $0x6d0] sm:$0xff] }
 0x7e2   :  { %2435 = vmatpush1.bf16.msra.mxu1 %v2032_v15  ;;  %v2061_v15 = vld [vmem:[#allocation3 + $0x718] sm:$0xff] }
 0x7e3   :  { %2195 = vmatpush1.bf16.msra.mxu0 %v2050_v18  ;;  %v2041_v18 = vld [vmem:[#allocation3 + $0x678] sm:$0xff] }
 0x7e4   :  { %2196 = vmatprep.subr.bf16.mxu0 %v2059_v19  ;;  %v2040_v19 = vld [vmem:[#allocation3 + $0x670] sm:$0xff]  ;;  %2436 = vmatprep.subr.bf16.mxu1 %v2041_v18 }
 0x7e5   :  { %v2068_v18 = vld [vmem:[#allocation3 + $0x750] sm:$0xff] }
 0x7e6   :  { %2437 = vmatpush1.bf16.msra.mxu1 %v2040_v19  ;;  %v2077_v19 = vld [vmem:[#allocation3 + $0x798] sm:$0xff] }
 0x7e7   :  { %2197 = vmatpush1.bf16.msra.mxu0 %v2058_v21  ;;  %v2049_v21 = vld [vmem:[#allocation3 + $0x6b8] sm:$0xff] }
 0x7e8   :  { %2198 = vmatprep.subr.bf16.mxu0 %v2067_v22  ;;  %v2048_v22 = vld [vmem:[#allocation3 + $0x6b0] sm:$0xff]  ;;  %2438 = vmatprep.subr.bf16.mxu1 %v2049_v21 }
 0x7e9   :  { %v2084_v21 = vld [vmem:[#allocation3 + $0x7d0] sm:$0xff] }
 0x7ea   :  { %2439 = vmatpush1.bf16.msra.mxu1 %v2048_v22  ;;  %v1839_v22 = vld [vmem:[#allocation3 + $0x28] sm:$0xff] }
 0x7eb   :  { %2199 = vmatpush1.bf16.msra.mxu0 %v2066_v29  ;;  %v2057_v29 = vld [vmem:[#allocation3 + $0x6f8] sm:$0xff] }
 0x7ec   :  { %2200 = vmatprep.subr.bf16.mxu0 %v2075_v30  ;;  %v2056_v30 = vld [vmem:[#allocation3 + $0x6f0] sm:$0xff]  ;;  %2440 = vmatprep.subr.bf16.mxu1 %v2057_v29  ;;  %v1846_v29 = vld [vmem:[#allocation3 + $0x60] sm:$0xff] }
 0x7ee   :  { %2441 = vmatpush1.bf16.msra.mxu1 %v2056_v30  ;;  %v1855_v30 = vld [vmem:[#allocation3 + $0xa8] sm:$0xff] }
 0x7ef   :  { %2201 = vmatpush1.bf16.msra.mxu0 %v2074_v31  ;;  %v2065_v31 = vld [vmem:[#allocation3 + $0x738] sm:$0xff] }
 0x7f0   :  { %2202 = vmatprep.subr.bf16.mxu0 %v2083_v34  ;;  %v2064_v34 = vld [vmem:[#allocation3 + $0x730] sm:$0xff]  ;;  %2442 = vmatprep.subr.bf16.mxu1 %v2065_v31  ;;  %v1862_v31 = vld [vmem:[#allocation3 + $0xe0] sm:$0xff] }
 0x7f2   :  { %2443 = vmatpush1.bf16.msra.mxu1 %v2064_v34  ;;  %v1871_v34 = vld [vmem:[#allocation3 + $0x128] sm:$0xff] }
 0x7f3   :  { %2203 = vmatpush1.bf16.msra.mxu0 %v2082_v41  ;;  %v2073_v41 = vld [vmem:[#allocation3 + $0x778] sm:$0xff] }
 0x7f4   :  { %2213 = vmatprep.subr.bf16.mxu0 %v1837_v42  ;;  %v2072_v42 = vld [vmem:[#allocation3 + $0x770] sm:$0xff]  ;;  %2444 = vmatprep.subr.bf16.mxu1 %v2073_v41  ;;  %v1878_v41 = vld [vmem:[#allocation3 + $0x160] sm:$0xff] }
 0x7f6   :  { %2205 = vmatmul.mubr.bf16.vlgmr.msra.gmra.mrb[24].mxu0 %v4879_v43  ;;  %2445 = vmatpush1.bf16.msra.mxu1 %v2072_v42  ;;  %v1887_v42 = vld [vmem:[#allocation3 + $0x1a8] sm:$0xff] }
 0x7f7   :  { %2214 = vmatpush1.bf16.msra.mxu0 %v1836_v46  ;;  %2245 = vmatprep.mubr.bf16.mxu0 %v4863_v54  ;;  %v2081_v46 = vld [vmem:[#allocation3 + $0x7b8] sm:$0xff] }
 0x7f8   :  { %2215 = vmatprep.subr.bf16.mxu0 %v1845_v47  ;;  %v2080_v47 = vld [vmem:[#allocation3 + $0x7b0] sm:$0xff]  ;;  %2446 = vmatprep.subr.bf16.mxu1 %v2081_v46  ;;  %v1903_v46 = vld [vmem:[#allocation3 + $0x228] sm:$0xff] }
 0x7fa   :  { %2447 = vmatpush1.bf16.msra.mxu1 %v2080_v47  ;;  %v1902_v47 = vld [vmem:[#allocation3 + $0x220] sm:$0xff] }
 0x7fb   :  { %2216 = vmatpush1.bf16.msra.mxu0 %v1844_v50  ;;  %v2089_v50 = vld [vmem:[#allocation3 + $0x7f8] sm:$0xff] }
 0x7fc   :  { %2217 = vmatprep.subr.bf16.mxu0 %v1853_v49  ;;  %v2088_v49 = vld [vmem:[#allocation3 + $0x7f0] sm:$0xff]  ;;  %2448 = vmatprep.subr.bf16.mxu1 %v2089_v50  ;;  %v1919_v50 = vld [vmem:[#allocation3 + $0x2a8] sm:$0xff] }
 0x7fe   :  { %2449 = vmatpush1.bf16.msra.mxu1 %v2088_v49  ;;  %v1918_v49 = vld [vmem:[#allocation3 + $0x2a0] sm:$0xff] }
 0x7ff   :  { %2218 = vmatpush1.bf16.msra.mxu0 %v1852_v53  ;;  %v1964_v53 = vld [vmem:[#allocation3 + $0x410] sm:$0xff] }
 0x800   :  { %2219 = vmatprep.subr.bf16.mxu0 %v1861_v0  ;;  %v1973_v0 = vld [vmem:[#allocation3 + $0x458] sm:$0xff] }
 0x801   :  { %2451 = vmatmul.mubr.bf16.vlgmr.msra.gmra.mrb[16].mxu1 %v4879_v43 }
 0x803   :  { %2220 = vmatpush1.bf16.msra.mxu0 %v1860_v57  ;;  %v1980_v57 = vld [vmem:[#allocation3 + $0x490] sm:$0xff] }
 0x804   :  { %2221 = vmatprep.subr.bf16.mxu0 %v1869_v58  ;;  %v1989_v58 = vld [vmem:[#allocation3 + $0x4d8] sm:$0xff] }
 0x807   :  { %2222 = vmatpush1.bf16.msra.mxu0 %v1868_v62  ;;  %v1996_v62 = vld [vmem:[#allocation3 + $0x510] sm:$0xff] }
 0x808   :  { %2223 = vmatprep.subr.bf16.mxu0 %v1877_v63  ;;  %v2005_v63 = vld [vmem:[#allocation3 + $0x558] sm:$0xff] }
 0x80b   :  { %2224 = vmatpush1.bf16.msra.mxu0 %v1876_v1  ;;  %v2012_v1 = vld [vmem:[#allocation3 + $0x590] sm:$0xff] }
 0x80c   :  { %2225 = vmatprep.subr.bf16.mxu0 %v1885_v2  ;;  %v2021_v2 = vld [vmem:[#allocation3 + $0x5d8] sm:$0xff] }
 0x80f   :  { %2226 = vmatpush1.bf16.msra.mxu0 %v1884_v8  ;;  %v2028_v8 = vld [vmem:[#allocation3 + $0x610] sm:$0xff] }
 0x810   :  { %2227 = vmatprep.subr.bf16.mxu0 %v1893_v9  ;;  %v2037_v9 = vld [vmem:[#allocation3 + $0x658] sm:$0xff] }
 0x813   :  { %2228 = vmatpush1.bf16.msra.mxu0 %v1892_v12  ;;  %v2044_v12 = vld [vmem:[#allocation3 + $0x690] sm:$0xff] }
 0x814   :  { %2229 = vmatprep.subr.bf16.mxu0 %v1901_v13  ;;  %v2053_v13 = vld [vmem:[#allocation3 + $0x6d8] sm:$0xff] }
 0x817   :  { %2230 = vmatpush1.bf16.msra.mxu0 %v1900_v16  ;;  %v2060_v16 = vld [vmem:[#allocation3 + $0x710] sm:$0xff] }
 0x818   :  { %2231 = vmatprep.subr.bf16.mxu0 %v1909_v17  ;;  %v2069_v17 = vld [vmem:[#allocation3 + $0x758] sm:$0xff] }
 0x81b   :  { %2232 = vmatpush1.bf16.msra.mxu0 %v1908_v40  ;;  %v2076_v40 = vld [vmem:[#allocation3 + $0x790] sm:$0xff] }
 0x81c   :  { %2233 = vmatprep.subr.bf16.mxu0 %v1917_v20  ;;  %v2085_v20 = vld [vmem:[#allocation3 + $0x7d8] sm:$0xff] }
 0x81f   :  { %2234 = vmatpush1.bf16.msra.mxu0 %v1916_v23  ;;  %v1838_v23 = vld [vmem:[#allocation3 + $0x20] sm:$0xff] }
 0x820   :  { %2235 = vmatprep.subr.bf16.mxu0 %v1925_v24  ;;  %v1847_v24 = vld [vmem:[#allocation3 + $0x68] sm:$0xff] }
 0x823   :  { %2236 = vmatpush1.bf16.msra.mxu0 %v1924_v32  ;;  %v1854_v32 = vld [vmem:[#allocation3 + $0xa0] sm:$0xff] }
 0x824   :  { %2237 = vmatprep.subr.bf16.mxu0 %v1933_v33  ;;  %v1863_v33 = vld [vmem:[#allocation3 + $0xe8] sm:$0xff] }
 0x827   :  { %2238 = vmatpush1.bf16.msra.mxu0 %v1932_v35  ;;  %v1870_v35 = vld [vmem:[#allocation3 + $0x120] sm:$0xff] }
 0x828   :  { %2239 = vmatprep.subr.bf16.mxu0 %v1941_v36  ;;  %v1879_v36 = vld [vmem:[#allocation3 + $0x168] sm:$0xff] }
 0x82b   :  { %2240 = vmatpush1.bf16.msra.mxu0 %v1940_v44  ;;  %v1895_v44 = vld [vmem:[#allocation3 + $0x1e8] sm:$0xff] }
 0x82c   :  { %2241 = vmatprep.subr.bf16.mxu0 %v1949_v45  ;;  %v1894_v45 = vld [vmem:[#allocation3 + $0x1e0] sm:$0xff] }
 0x82f   :  { %2242 = vmatpush1.bf16.msra.mxu0 %v1948_v38  ;;  %v1911_v38 = vld [vmem:[#allocation3 + $0x268] sm:$0xff] }
 0x830   :  { %2243 = vmatprep.subr.bf16.mxu0 %v1957_v48  ;;  %v1910_v48 = vld [vmem:[#allocation3 + $0x260] sm:$0xff] }
 0x833   :  { %2244 = vmatpush1.bf16.msra.mxu0 %v1956_v51  ;;  %v1927_v51 = vld [vmem:[#allocation3 + $0x2e8] sm:$0xff] }
 0x834   :  { %2254 = vmatprep.subr.bf16.mxu0 %v1965_v52  ;;  %v1926_v52 = vld [vmem:[#allocation3 + $0x2e0] sm:$0xff] }
 0x836   :  { %2246 = vmatmul.mubr.bf16.vlgmr.msra.gmra.mrb[28].mxu0 %v4869_v27 }
 0x837   :  { %2255 = vmatpush1.bf16.msra.mxu0 %v1964_v53  ;;  %2286 = vmatprep.mubr.bf16.mxu0 %v4873_v60  ;;  %v1935_v53 = vld [vmem:[#allocation3 + $0x328] sm:$0xff] }
 0x838   :  { %2256 = vmatprep.subr.bf16.mxu0 %v1973_v0  ;;  %v1934_v0 = vld [vmem:[#allocation3 + $0x320] sm:$0xff] }
 0x83b   :  { %2257 = vmatpush1.bf16.msra.mxu0 %v1972_v55  ;;  %v1943_v55 = vld [vmem:[#allocation3 + $0x368] sm:$0xff] }
 0x83c   :  { %2258 = vmatprep.subr.bf16.mxu0 %v1981_v56  ;;  %v1942_v56 = vld [vmem:[#allocation3 + $0x360] sm:$0xff] }
 0x83f   :  { %2259 = vmatpush1.bf16.msra.mxu0 %v1980_v57  ;;  %v1951_v57 = vld [vmem:[#allocation3 + $0x3a8] sm:$0xff] }
 0x840   :  { %2260 = vmatprep.subr.bf16.mxu0 %v1989_v58  ;;  %v1950_v58 = vld [vmem:[#allocation3 + $0x3a0] sm:$0xff] }
 0x843   :  { %2261 = vmatpush1.bf16.msra.mxu0 %v1988_v59  ;;  %v1959_v59 = vld [vmem:[#allocation3 + $0x3e8] sm:$0xff] }
 0x844   :  { %2262 = vmatprep.subr.bf16.mxu0 %v1997_v61  ;;  %v1958_v61 = vld [vmem:[#allocation3 + $0x3e0] sm:$0xff] }
 0x847   :  { %2263 = vmatpush1.bf16.msra.mxu0 %v1996_v62  ;;  %v1967_v62 = vld [vmem:[#allocation3 + $0x428] sm:$0xff] }
 0x848   :  { %2264 = vmatprep.subr.bf16.mxu0 %v2005_v63  ;;  %v1966_v63 = vld [vmem:[#allocation3 + $0x420] sm:$0xff] }
 0x84b   :  { %2265 = vmatpush1.bf16.msra.mxu0 %v2004_v37  ;;  %v1975_v37 = vld [vmem:[#allocation3 + $0x468] sm:$0xff] }
 0x84c   :  { %2266 = vmatprep.subr.bf16.mxu0 %v2013_v39  ;;  %v1974_v39 = vld [vmem:[#allocation3 + $0x460] sm:$0xff] }
 0x84f   :  { %2267 = vmatpush1.bf16.msra.mxu0 %v2012_v1  ;;  %v1983_v1 = vld [vmem:[#allocation3 + $0x4a8] sm:$0xff] }
 0x850   :  { %2268 = vmatprep.subr.bf16.mxu0 %v2021_v2  ;;  %v1982_v2 = vld [vmem:[#allocation3 + $0x4a0] sm:$0xff] }
 0x853   :  { %2269 = vmatpush1.bf16.msra.mxu0 %v2020_v3  ;;  %v1991_v3 = vld [vmem:[#allocation3 + $0x4e8] sm:$0xff] }
 0x854   :  { %2270 = vmatprep.subr.bf16.mxu0 %v2029_v5  ;;  %v1827_v5 = vld [vmem:[#allocation10 + $0x6] ss:$8 sm:$0xf] }
 0x857   :  { %2271 = vmatpush1.bf16.msra.mxu0 %v2028_v8  ;;  %v1828_v8 = vld [vmem:[#allocation10 + $0x6] ss:$8 sm:$0xf0] }
 0x858   :  { %2272 = vmatprep.subr.bf16.mxu0 %v2037_v9  ;;  %v1990_v9 = vld [vmem:[#allocation3 + $0x4e0] sm:$0xff] }
 0x85b   :  { %2273 = vmatpush1.bf16.msra.mxu0 %v2036_v10  ;;  %v1999_v10 = vld [vmem:[#allocation3 + $0x528] sm:$0xff] }
 0x85c   :  { %2274 = vmatprep.subr.bf16.mxu0 %v2045_v11  ;;  %v4892_v11 = vor.u32 %v1828_v8, %v1827_v5 }
 0x85f   :  { %2275 = vmatpush1.bf16.msra.mxu0 %v2044_v12  ;;  %v2007_v12 = vld [vmem:[#allocation3 + $0x568] sm:$0xff] }
 0x860   :  { %2276 = vmatprep.subr.bf16.mxu0 %v2053_v13  ;;  %v2098_v13 = vrot.slane %v4892_v11, %v4730_v28  ;;  %v2030_v28 = vld [vmem:[#allocation3 + $0x620] sm:$0xff] }
 0x863   :  { %2277 = vmatpush1.bf16.msra.mxu0 %v2052_v14  ;;  %v2006_v14 = vld [vmem:[#allocation3 + $0x560] sm:$0xff] }
 0x864   :  { %2278 = vmatprep.subr.bf16.mxu0 %v2061_v15 }
 0x867   :  { %2279 = vmatpush1.bf16.msra.mxu0 %v2060_v16  ;;  %v2015_v16 = vld [vmem:[#allocation3 + $0x5a8] sm:$0xff] }
 0x868   :  { %2280 = vmatprep.subr.bf16.mxu0 %v2069_v17 }
 0x86b   :  { %2281 = vmatpush1.bf16.msra.mxu0 %v2068_v18 }
 0x86c   :  { %2282 = vmatprep.subr.bf16.mxu0 %v2077_v19 }
 0x86f   :  { %2283 = vmatpush1.bf16.msra.mxu0 %v2076_v40 }
 0x870   :  { %2284 = vmatprep.subr.bf16.mxu0 %v2085_v20 }
 0x873   :  { %2285 = vmatpush1.bf16.msra.mxu0 %v2084_v21  ;;  %v2014_v21 = vld [vmem:[#allocation3 + $0x5a0] sm:$0xff] }
 0x874   :  { %2295 = vmatprep.subr.bf16.mxu0 %v1839_v22  ;;  %v2023_v22 = vld [vmem:[#allocation3 + $0x5e8] sm:$0xff] }
 0x876   :  { %2287 = vmatmul.mubr.bf16.vlgmr.msra.gmra.mrb[28].mxu0 %v4879_v43 }
 0x877   :  { %2296 = vmatpush1.bf16.msra.mxu0 %v1838_v23  ;;  %2327 = vmatprep.mubr.bf16.mxu0 %v4863_v54  ;;  %v1886_v54 = vld [vmem:[#allocation3 + $0x1a0] sm:$0xff]  ;;  %v2031_v23 = vld [vmem:[#allocation3 + $0x628] sm:$0xff] }
 0x878   :  { %2297 = vmatprep.subr.bf16.mxu0 %v1847_v24  ;;  %v2039_v24 = vld [vmem:[#allocation3 + $0x668] sm:$0xff] }
 0x87b   :  { %2298 = vmatpush1.bf16.msra.mxu0 %v1846_v29  ;;  %v2038_v29 = vld [vmem:[#allocation3 + $0x660] sm:$0xff] }
 0x87c   :  { %2299 = vmatprep.subr.bf16.mxu0 %v1855_v30  ;;  %v2047_v30 = vld [vmem:[#allocation3 + $0x6a8] sm:$0xff] }
 0x87f   :  { %2300 = vmatpush1.bf16.msra.mxu0 %v1854_v32  ;;  %v2046_v32 = vld [vmem:[#allocation3 + $0x6a0] sm:$0xff] }
 0x880   :  { %2301 = vmatprep.subr.bf16.mxu0 %v1863_v33  ;;  %v2055_v33 = vld [vmem:[#allocation3 + $0x6e8] sm:$0xff] }
 0x883   :  { %2302 = vmatpush1.bf16.msra.mxu0 %v1862_v31  ;;  %v2054_v31 = vld [vmem:[#allocation3 + $0x6e0] sm:$0xff] }
 0x884   :  { %2303 = vmatprep.subr.bf16.mxu0 %v1871_v34  ;;  %v2063_v34 = vld [vmem:[#allocation3 + $0x728] sm:$0xff] }
 0x887   :  { %2304 = vmatpush1.bf16.msra.mxu0 %v1870_v35  ;;  %v2062_v35 = vld [vmem:[#allocation3 + $0x720] sm:$0xff] }
 0x888   :  { %2305 = vmatprep.subr.bf16.mxu0 %v1879_v36  ;;  %v2071_v36 = vld [vmem:[#allocation3 + $0x768] sm:$0xff] }
 0x88b   :  { %2306 = vmatpush1.bf16.msra.mxu0 %v1878_v41  ;;  %v2070_v41 = vld [vmem:[#allocation3 + $0x760] sm:$0xff] }
 0x88c   :  { %2307 = vmatprep.subr.bf16.mxu0 %v1887_v42  ;;  %v2079_v42 = vld [vmem:[#allocation3 + $0x7a8] sm:$0xff] }
 0x88f   :  { %2308 = vmatpush1.bf16.msra.mxu0 %v1886_v54  ;;  %v2078_v54 = vld [vmem:[#allocation3 + $0x7a0] sm:$0xff] }
 0x890   :  { %2309 = vmatprep.subr.bf16.mxu0 %v1895_v44  ;;  %v2087_v44 = vld [vmem:[#allocation3 + $0x7e8] sm:$0xff] }
 0x893   :  { %2310 = vmatpush1.bf16.msra.mxu0 %v1894_v45  ;;  %v2086_v45 = vld [vmem:[#allocation3 + $0x7e0] sm:$0xff] }
 0x894   :  { %2311 = vmatprep.subr.bf16.mxu0 %v1903_v46  ;;  %v2117_v46 = vsub.s32 6, %v4700_v4 }
 0x897   :  { %2312 = vmatpush1.bf16.msra.mxu0 %v1902_v47  ;;  %v2121_v47 = vsub.s32 7, %v4700_v4 }
 0x898   :  { %2313 = vmatprep.subr.bf16.mxu0 %v1911_v38  ;;  %v2118_v38 = vrot.slane %v4892_v11, %v2117_v46 }
 0x89b   :  { %2314 = vmatpush1.bf16.msra.mxu0 %v1910_v48  ;;  %v2122_v48 = vrot.slane %v4892_v11, %v2121_v47 }
 0x89c   :  { %2315 = vmatprep.subr.bf16.mxu0 %v1919_v50 }
 0x89f   :  { %2316 = vmatpush1.bf16.msra.mxu0 %v1918_v49 }
 0x8a0   :  { %2317 = vmatprep.subr.bf16.mxu0 %v1927_v51 }
 0x8a3   :  { %2318 = vmatpush1.bf16.msra.mxu0 %v1926_v52 }
 0x8a4   :  { %2319 = vmatprep.subr.bf16.mxu0 %v1935_v53 }
 0x8a7   :  { %2320 = vmatpush1.bf16.msra.mxu0 %v1934_v0 }
 0x8a8   :  { %2321 = vmatprep.subr.bf16.mxu0 %v1943_v55  ;;  %v2102_v55 = vrot.slane %v4892_v11, %v4842_v6 }
 0x8ab   :  { %2322 = vmatpush1.bf16.msra.mxu0 %v1942_v56 }
 0x8ac   :  { %2323 = vmatprep.subr.bf16.mxu0 %v1951_v57 }
 0x8af   :  { %2324 = vmatpush1.bf16.msra.mxu0 %v1950_v58 }
 0x8b0   :  { %2325 = vmatprep.subr.bf16.mxu0 %v1959_v59 }
 0x8b3   :  { %2326 = vmatpush1.bf16.msra.mxu0 %v1958_v61 }
 0x8b4   :  { %2336 = vmatprep.subr.bf16.mxu0 %v1967_v62 }
 0x8b6   :  { %2328 = vmatmul.mubr.bf16.vlgmr.msra.gmra.mrb[32].mxu0 %v4869_v27  ;;  %v1998_v27 = vld [vmem:[#allocation3 + $0x520] sm:$0xff] }
 0x8b7   :  { %2337 = vmatpush1.bf16.msra.mxu0 %v1966_v63  ;;  %2368 = vmatprep.mubr.bf16.mxu0 %v4873_v60  ;;  %v2094_v60 = vrot.slane %v4892_v11, %v4727_v26  ;;  %v2022_v26 = vld [vmem:[#allocation3 + $0x5e0] sm:$0xff]  ;;  %v2109_v63 = vsub.s32 4, %v4700_v4 }
 0x8b8   :  { %2338 = vmatprep.subr.bf16.mxu0 %v1975_v37  ;;  %v2113_v37 = vsub.s32 5, %v4700_v4 }
 0x8bb   :  { %2339 = vmatpush1.bf16.msra.mxu0 %v1974_v39  ;;  %v2110_v39 = vrot.slane %v4892_v11, %v2109_v63 }
 0x8bc   :  { %2340 = vmatprep.subr.bf16.mxu0 %v1983_v1  ;;  %v2114_v1 = vrot.slane %v4892_v11, %v2113_v37 }
 0x8bf   :  { %2341 = vmatpush1.bf16.msra.mxu0 %v1982_v2 }
 0x8c0   :  { %2342 = vmatprep.subr.bf16.mxu0 %v1991_v3 }
 0x8c3   :  { %2343 = vmatpush1.bf16.msra.mxu0 %v1990_v9 }
 0x8c4   :  { %2344 = vmatprep.subr.bf16.mxu0 %v1999_v10 }
 0x8c7   :  { %2345 = vmatpush1.bf16.msra.mxu0 %v1998_v27 }
 0x8c8   :  { %2346 = vmatprep.subr.bf16.mxu0 %v2007_v12 }
 0x8c9   :  { %v2206_v15 = vpop.f32.mrb[24].mxu0 }
 0x8ca   :  { %v4898_v17 = vadd.f32 %v2206_v15, %v2094_v60  ;;  %v2208_v18 = vpop.f32.mrb[25].mxu0 }
 0x8cb   :  { %v4900_v19 = vadd.f32 %v2208_v18, %v2098_v13  ;;  %v2210_v40 = vpop.f32.mrb[26].mxu0  ;;  %2347 = vmatpush1.bf16.msra.mxu0 %v2006_v14 }
 0x8cc   :  { %5874 = vst [vmem:[#allocation22_spill] sm:$0xff] %v4898_v17  ;;  %v2211_v20 = vpop.f32.mrb[27].mxu0  ;;  %2348 = vmatprep.subr.bf16.mxu0 %v2015_v16 }
 0x8cd   :  { %5875 = vst [vmem:[#allocation23_spill] sm:$0xff] %v4900_v19 }
 0x8cf   :  { %2349 = vmatpush1.bf16.msra.mxu0 %v2014_v21 }
 0x8d0   :  { %2350 = vmatprep.subr.bf16.mxu0 %v2023_v22 }
 0x8d3   :  { %2351 = vmatpush1.bf16.msra.mxu0 %v2022_v26 }
 0x8d4   :  { %2352 = vmatprep.subr.bf16.mxu0 %v2031_v23  ;;  %v2452_v50 = vpop.f32.mrb[16].mxu1 }
 0x8d5   :  { %v4907_v49 = vadd.f32 %v2452_v50, %v2118_v38  ;;  %v2454_v51 = vpop.f32.mrb[17].mxu1 }
 0x8d6   :  { %v4909_v52 = vadd.f32 %v2454_v51, %v2122_v48  ;;  %v2456_v53 = vpop.f32.mrb[18].mxu1 }
 0x8d7   :  { %2353 = vmatpush1.bf16.msra.mxu0 %v2030_v28  ;;  %5876 = vst [vmem:[#allocation24_spill] sm:$0xff] %v4907_v49  ;;  %v2457_v0 = vpop.f32.mrb[19].mxu1 }
 0x8d8   :  { %2354 = vmatprep.subr.bf16.mxu0 %v2039_v24  ;;  %5877 = vst [vmem:[#allocation25_spill] sm:$0xff] %v4909_v52 }
 0x8db   :  { %2355 = vmatpush1.bf16.msra.mxu0 %v2038_v29 }
 0x8dc   :  { %2356 = vmatprep.subr.bf16.mxu0 %v2047_v30 }
 0x8df   :  { %2357 = vmatpush1.bf16.msra.mxu0 %v2046_v32 }
 0x8e0   :  { %2358 = vmatprep.subr.bf16.mxu0 %v2055_v33 }
 0x8e3   :  { %2359 = vmatpush1.bf16.msra.mxu0 %v2054_v31 }
 0x8e4   :  { %2360 = vmatprep.subr.bf16.mxu0 %v2063_v34 }
 0x8e7   :  { %2361 = vmatpush1.bf16.msra.mxu0 %v2062_v35 }
 0x8e8   :  { %2362 = vmatprep.subr.bf16.mxu0 %v2071_v36 }
 0x8eb   :  { %2363 = vmatpush1.bf16.msra.mxu0 %v2070_v41 }
 0x8ec   :  { %2364 = vmatprep.subr.bf16.mxu0 %v2079_v42 }
 0x8ef   :  { %2365 = vmatpush1.bf16.msra.mxu0 %v2078_v54 }
 0x8f0   :  { %2366 = vmatprep.subr.bf16.mxu0 %v2087_v44 }
 0x8f3   :  { %2367 = vmatpush1.bf16.msra.mxu0 %v2086_v45 }
 0x8f6   :  { %2369 = vmatmul.mubr.bf16.vlgmr.msra.gmra.mrb[32].mxu0 %v4879_v43  ;;  %v2106_v43 = vrot.slane %v4892_v11, %v4845_v7 }
 0x949   :  { %v2288_v56 = vpop.f32.mrb[28].mxu0 }
 0x94a   :  { %v4915_v57 = vadd.f32 %v2288_v56, %v2102_v55  ;;  %v2290_v58 = vpop.f32.mrb[29].mxu0 }
 0x94b   :  { %v4917_v59 = vadd.f32 %v2290_v58, %v2106_v43  ;;  %v2292_v61 = vpop.f32.mrb[30].mxu0 }
 0x94c   :  { %5878 = vst [vmem:[#allocation26_spill] sm:$0xff] %v4915_v57  ;;  %v2293_v62 = vpop.f32.mrb[31].mxu0 }
 0x94d   :  { %5879 = vst [vmem:[#allocation27_spill] sm:$0xff] %v4917_v59 }
 0x9c9   :  { %v2370_v6 = vpop.f32.mrb[32].mxu0 }
 0x9ca   :  { %v4923_v2 = vadd.f32 %v2370_v6, %v2110_v39  ;;  %v2372_v7 = vpop.f32.mrb[33].mxu0 }
 0x9cb   :  { %v4925_v3 = vadd.f32 %v2372_v7, %v2114_v1  ;;  %v2374_v5 = vpop.f32.mrb[34].mxu0 }
 0x9cc   :  { %5880 = vst [vmem:[#allocation28_spill] sm:$0xff] %v4923_v2  ;;  %v2375_v8 = vpop.f32.mrb[35].mxu0 }
 0x9cd   :  { %5881 = vst [vmem:[#allocation29_spill] sm:$0xff] %v4925_v3 }
 0x9ce   :  { %4491 = dma.done.wait [#allocation5 + $0x2], 16384 }
 0x9cf   :  { %4492 = vsyncadd [#allocation5 + $0x2], 4294950912  ;;  %2623 = vmatprep.mubr.bf16.mxu0 %v5710_v25  ;;  %2664 = vmatprep.mubr.bf16.mxu1 %v5710_v25  ;;  %v4929_v9 = vld [vmem:[#allocation4 + $0x8] sm:$0xff]  ;;  %v4931_v4 = vld [vmem:[#allocation4 + $0x18] sm:$0xff] }
 0x9d0   :  { %v4933_v10 = vld [vmem:[#allocation4] sm:$0xff]  ;;  %2591 = vmatprep.subr.bf16.mxu0 %v4929_v9  ;;  %2632 = vmatprep.subr.bf16.mxu1 %v4931_v4  ;;  %v4937_v11 = vld [vmem:[#allocation4 + $0x10] sm:$0xff]  ;;  %v4939_v27 = vld [vmem:[#allocation4 + $0x48] sm:$0xff] }
 0x9d1   :  { %v4941_v12 = vld [vmem:[#allocation4 + $0x58] sm:$0xff]  ;;  %2592 = vmatpush1.bf16.msra.mxu0 %v4933_v10  ;;  %2633 = vmatpush1.bf16.msra.mxu1 %v4937_v11  ;;  %v4947_v60 = vld [vmem:[#allocation4 + $0x40] sm:$0xff]  ;;  %v4949_v13 = vld [vmem:[#allocation4 + $0x50] sm:$0xff] }
 0x9d2   :  { %2593 = vmatprep.subr.bf16.mxu0 %v4939_v27  ;;  %2634 = vmatprep.subr.bf16.mxu1 %v4941_v12  ;;  %v4951_v14 = vld [vmem:[#allocation4 + $0x88] sm:$0xff]  ;;  %v4953_v15 = vld [vmem:[#allocation4 + $0x98] sm:$0xff]  ;;  %v4959_v16 = vld [vmem:[#allocation4 + $0x80] sm:$0xff] }
 0x9d3   :  { %v4961_v18 = vld [vmem:[#allocation4 + $0x90] sm:$0xff]  ;;  %v4963_v40 = vld [vmem:[#allocation4 + $0xc8] sm:$0xff]  ;;  %v4965_v20 = vld [vmem:[#allocation4 + $0xd8] sm:$0xff] }
 0x9d4   :  { %v4971_v21 = vld [vmem:[#allocation4 + $0xc0] sm:$0xff]  ;;  %v4973_v22 = vld [vmem:[#allocation4 + $0xd0] sm:$0xff]  ;;  %v4975_v26 = vld [vmem:[#allocation4 + $0x108] sm:$0xff] }
 0x9d5   :  { %2594 = vmatpush1.bf16.msra.mxu0 %v4947_v60  ;;  %2635 = vmatpush1.bf16.msra.mxu1 %v4949_v13  ;;  %v4977_v23 = vld [vmem:[#allocation4 + $0x118] sm:$0xff]  ;;  %v4983_v28 = vld [vmem:[#allocation4 + $0x100] sm:$0xff]  ;;  %v4985_v24 = vld [vmem:[#allocation4 + $0x110] sm:$0xff] }
 0x9d6   :  { %2595 = vmatprep.subr.bf16.mxu0 %v4951_v14  ;;  %2636 = vmatprep.subr.bf16.mxu1 %v4953_v15  ;;  %v4987_v29 = vld [vmem:[#allocation4 + $0x148] sm:$0xff]  ;;  %v4989_v30 = vld [vmem:[#allocation4 + $0x158] sm:$0xff]  ;;  %v4995_v32 = vld [vmem:[#allocation4 + $0x140] sm:$0xff] }
 0x9d7   :  { %v4997_v33 = vld [vmem:[#allocation4 + $0x150] sm:$0xff]  ;;  %v4999_v31 = vld [vmem:[#allocation4 + $0x188] sm:$0xff]  ;;  %v5001_v34 = vld [vmem:[#allocation4 + $0x198] sm:$0xff] }
 0x9d8   :  { %v5007_v35 = vld [vmem:[#allocation4 + $0x180] sm:$0xff]  ;;  %v5009_v36 = vld [vmem:[#allocation4 + $0x190] sm:$0xff]  ;;  %v5011_v41 = vld [vmem:[#allocation4 + $0x1c8] sm:$0xff] }
 0x9d9   :  { %2596 = vmatpush1.bf16.msra.mxu0 %v4959_v16  ;;  %2637 = vmatpush1.bf16.msra.mxu1 %v4961_v18  ;;  %v5013_v42 = vld [vmem:[#allocation4 + $0x1d8] sm:$0xff]  ;;  %v5019_v54 = vld [vmem:[#allocation4 + $0x1c0] sm:$0xff]  ;;  %v5021_v44 = vld [vmem:[#allocation4 + $0x1d0] sm:$0xff] }
 0x9da   :  { %2597 = vmatprep.subr.bf16.mxu0 %v4963_v40  ;;  %2638 = vmatprep.subr.bf16.mxu1 %v4965_v20  ;;  %v5023_v45 = vld [vmem:[#allocation4 + $0x208] sm:$0xff]  ;;  %v5025_v46 = vld [vmem:[#allocation4 + $0x218] sm:$0xff]  ;;  %v5031_v47 = vld [vmem:[#allocation4 + $0x200] sm:$0xff] }
 0x9db   :  { %v5033_v38 = vld [vmem:[#allocation4 + $0x210] sm:$0xff]  ;;  %v5035_v48 = vld [vmem:[#allocation4 + $0x248] sm:$0xff]  ;;  %v5037_v50 = vld [vmem:[#allocation4 + $0x258] sm:$0xff] }
 0x9dc   :  { %5882 = vst [vmem:[#allocation30_spill] sm:$0xff] %v5033_v38  ;;  %5883 = vst [vmem:[#allocation31_spill] sm:$0xff] %v5035_v48  ;;  %v5043_v51 = vld [vmem:[#allocation4 + $0x240] sm:$0xff]  ;;  %v5045_v53 = vld [vmem:[#allocation4 + $0x250] sm:$0xff] }
 0x9dd   :  { %2598 = vmatpush1.bf16.msra.mxu0 %v4971_v21  ;;  %2639 = vmatpush1.bf16.msra.mxu1 %v4973_v22  ;;  %5884 = vst [vmem:[#allocation32_spill] sm:$0xff] %v5037_v50  ;;  %5885 = vst [vmem:[#allocation33_spill] sm:$0xff] %v5043_v51  ;;  %v5047_v0 = vld [vmem:[#allocation4 + $0x288] sm:$0xff]  ;;  %v5049_v55 = vld [vmem:[#allocation4 + $0x298] sm:$0xff] }
 0x9de   :  { %2599 = vmatprep.subr.bf16.mxu0 %v4975_v26  ;;  %2640 = vmatprep.subr.bf16.mxu1 %v4977_v23  ;;  %5886 = vst [vmem:[#allocation34_spill] sm:$0xff] %v5045_v53  ;;  %5887 = vst [vmem:[#allocation35_spill] sm:$0xff] %v5047_v0  ;;  %v5055_v43 = vld [vmem:[#allocation4 + $0x280] sm:$0xff]  ;;  %v5057_v56 = vld [vmem:[#allocation4 + $0x290] sm:$0xff] }
 0x9df   :  { %5888 = vst [vmem:[#allocation36_spill] sm:$0xff] %v5049_v55  ;;  %5889 = vst [vmem:[#allocation37_spill] sm:$0xff] %v5055_v43  ;;  %v5059_v58 = vld [vmem:[#allocation4 + $0x2c8] sm:$0xff]  ;;  %v5061_v61 = vld [vmem:[#allocation4 + $0x2d8] sm:$0xff] }
 0x9e0   :  { %5890 = vst [vmem:[#allocation38_spill] sm:$0xff] %v5057_v56  ;;  %5891 = vst [vmem:[#allocation39_spill] sm:$0xff] %v5059_v58  ;;  %v5063_v62 = vld [vmem:[#allocation4 + $0x2c0] sm:$0xff]  ;;  %v5065_v63 = vld [vmem:[#allocation4 + $0x2d0] sm:$0xff] }
 0x9e1   :  { %2600 = vmatpush1.bf16.msra.mxu0 %v4983_v28  ;;  %2641 = vmatpush1.bf16.msra.mxu1 %v4985_v24  ;;  %5892 = vst [vmem:[#allocation40_spill] sm:$0xff] %v5061_v61  ;;  %5893 = vst [vmem:[#allocation41_spill] sm:$0xff] %v5063_v62  ;;  %v5069_v37 = vld [vmem:[#allocation4 + $0x308] sm:$0xff]  ;;  %v5071_v39 = vld [vmem:[#allocation4 + $0x318] sm:$0xff] }
 0x9e2   :  { %2601 = vmatprep.subr.bf16.mxu0 %v4987_v29  ;;  %2642 = vmatprep.subr.bf16.mxu1 %v4989_v30  ;;  %5894 = vst [vmem:[#allocation42_spill] sm:$0xff] %v5065_v63  ;;  %5895 = vst [vmem:[#allocation43_spill] sm:$0xff] %v5069_v37  ;;  %v5075_v1 = vld [vmem:[#allocation4 + $0x300] sm:$0xff]  ;;  %v5077_v6 = vld [vmem:[#allocation4 + $0x310] sm:$0xff] }
 0x9e3   :  { %5896 = vst [vmem:[#allocation44_spill] sm:$0xff] %v5071_v39  ;;  %5897 = vst [vmem:[#allocation45_spill] sm:$0xff] %v5075_v1  ;;  %v5081_v7 = vld [vmem:[#allocation4 + $0x348] sm:$0xff]  ;;  %v5083_v5 = vld [vmem:[#allocation4 + $0x358] sm:$0xff] }
 0x9e4   :  { %5898 = vst [vmem:[#allocation46_spill] sm:$0xff] %v5077_v6  ;;  %5899 = vst [vmem:[#allocation47_spill] sm:$0xff] %v5081_v7  ;;  %v5087_v8 = vld [vmem:[#allocation4 + $0x340] sm:$0xff]  ;;  %v5089_v25 = vld [vmem:[#allocation4 + $0x350] sm:$0xff] }
 0x9e5   :  { %2602 = vmatpush1.bf16.msra.mxu0 %v4995_v32  ;;  %2643 = vmatpush1.bf16.msra.mxu1 %v4997_v33  ;;  %5900 = vst [vmem:[#allocation48_spill] sm:$0xff] %v5083_v5  ;;  %5901 = vst [vmem:[#allocation49_spill] sm:$0xff] %v5087_v8  ;;  %v5093_v52 = vld [vmem:[#allocation4 + $0x388] sm:$0xff]  ;;  %v5095_v3 = vld [vmem:[#allocation4 + $0x398] sm:$0xff] }
 0x9e6   :  { %2603 = vmatprep.subr.bf16.mxu0 %v4999_v31  ;;  %2644 = vmatprep.subr.bf16.mxu1 %v5001_v34  ;;  %5902 = vst [vmem:[#allocation50_spill] sm:$0xff] %v5089_v25  ;;  %5903 = vst [vmem:[#allocation51_spill] sm:$0xff] %v5093_v52  ;;  %v5103_v49 = vld [vmem:[#allocation4 + $0x380] sm:$0xff]  ;;  %v5105_v2 = vld [vmem:[#allocation4 + $0x390] sm:$0xff] }
 0x9e7   :  { %5904 = vst [vmem:[#allocation52_spill] sm:$0xff] %v5095_v3  ;;  %5905 = vst [vmem:[#allocation53_spill] sm:$0xff] %v5103_v49  ;;  %v5107_v59 = vld [vmem:[#allocation4 + $0x3c8] sm:$0xff]  ;;  %v5109_v19 = vld [vmem:[#allocation4 + $0x3d8] sm:$0xff] }
 0x9e8   :  { %5906 = vst [vmem:[#allocation54_spill] sm:$0xff] %v5105_v2  ;;  %5907 = vst [vmem:[#allocation55_spill] sm:$0xff] %v5107_v59  ;;  %v5115_v57 = vld [vmem:[#allocation4 + $0x3c0] sm:$0xff]  ;;  %v5117_v17 = vld [vmem:[#allocation4 + $0x3d0] sm:$0xff] }
 0x9e9   :  { %2604 = vmatpush1.bf16.msra.mxu0 %v5007_v35  ;;  %2645 = vmatpush1.bf16.msra.mxu1 %v5009_v36  ;;  %5908 = vst [vmem:[#allocation56_spill] sm:$0xff] %v5109_v19  ;;  %5909 = vst [vmem:[#allocation57_spill] sm:$0xff] %v5115_v57 }
 0x9ea   :  { %2605 = vmatprep.subr.bf16.mxu0 %v5011_v41  ;;  %2646 = vmatprep.subr.bf16.mxu1 %v5013_v42  ;;  %5910 = vst [vmem:[#allocation58_spill] sm:$0xff] %v5117_v17 }
 0x9ed   :  { %2606 = vmatpush1.bf16.msra.mxu0 %v5019_v54  ;;  %2647 = vmatpush1.bf16.msra.mxu1 %v5021_v44 }
 0x9ee   :  { %2607 = vmatprep.subr.bf16.mxu0 %v5023_v45  ;;  %2648 = vmatprep.subr.bf16.mxu1 %v5025_v46 }
 0x9f1   :  { %2608 = vmatpush1.bf16.msra.mxu0 %v5031_v47  ;;  %2649 = vmatpush1.bf16.msra.mxu1 %v5033_v38 }
 0x9f2   :  { %2609 = vmatprep.subr.bf16.mxu0 %v5035_v48  ;;  %2650 = vmatprep.subr.bf16.mxu1 %v5037_v50 }
 0x9f5   :  { %2610 = vmatpush1.bf16.msra.mxu0 %v5043_v51  ;;  %2651 = vmatpush1.bf16.msra.mxu1 %v5045_v53 }
 0x9f6   :  { %2611 = vmatprep.subr.bf16.mxu0 %v5047_v0  ;;  %2652 = vmatprep.subr.bf16.mxu1 %v5049_v55 }
 0x9f9   :  { %2612 = vmatpush1.bf16.msra.mxu0 %v5055_v43  ;;  %2653 = vmatpush1.bf16.msra.mxu1 %v5057_v56 }
 0x9fa   :  { %2613 = vmatprep.subr.bf16.mxu0 %v5059_v58  ;;  %2654 = vmatprep.subr.bf16.mxu1 %v5061_v61 }
 0x9fd   :  { %2614 = vmatpush1.bf16.msra.mxu0 %v5063_v62  ;;  %2655 = vmatpush1.bf16.msra.mxu1 %v5065_v63 }
 0x9fe   :  { %2615 = vmatprep.subr.bf16.mxu0 %v5069_v37  ;;  %2656 = vmatprep.subr.bf16.mxu1 %v5071_v39 }
 0xa01   :  { %2616 = vmatpush1.bf16.msra.mxu0 %v5075_v1  ;;  %2657 = vmatpush1.bf16.msra.mxu1 %v5077_v6 }
 0xa02   :  { %2617 = vmatprep.subr.bf16.mxu0 %v5081_v7  ;;  %2658 = vmatprep.subr.bf16.mxu1 %v5083_v5 }
 0xa05   :  { %2618 = vmatpush1.bf16.msra.mxu0 %v5087_v8  ;;  %2659 = vmatpush1.bf16.msra.mxu1 %v5089_v25  ;;  %v5917_v25 = vmov 0  }
 0xa06   :  { %2619 = vmatprep.subr.bf16.mxu0 %v5093_v52  ;;  %2660 = vmatprep.subr.bf16.mxu1 %v5095_v3  ;;  %v5119_v3 = vld [vmem:[#allocation4 + $0x28] sm:$0xff]  ;;  %v5121_v52 = vld [vmem:[#allocation4 + $0x38] sm:$0xff] }
 0xa07   :  { %5911 = vst [vmem:[#allocation59_spill] sm:$0xff] %v5119_v3  ;;  %5912 = vst [vmem:[#allocation60_spill] sm:$0xff] %v5121_v52 }
 0xa09   :  { %2620 = vmatpush1.bf16.msra.mxu0 %v5103_v49  ;;  %2661 = vmatpush1.bf16.msra.mxu1 %v5105_v2  ;;  %v5127_v2 = vld [vmem:[#allocation4 + $0x20] sm:$0xff]  ;;  %v5133_v49 = vld [vmem:[#allocation4 + $0x78] sm:$0xff] }
 0xa0a   :  { %2621 = vmatprep.subr.bf16.mxu0 %v5107_v59  ;;  %2662 = vmatprep.subr.bf16.mxu1 %v5109_v19  ;;  %5913 = vst [vmem:[#allocation61_spill] sm:$0xff] %v5127_v2  ;;  %v5129_v59 = vld [vmem:[#allocation4 + $0x30] sm:$0xff]  ;;  %v5131_v19 = vld [vmem:[#allocation4 + $0x68] sm:$0xff]  ;;  %5916 = vst [vmem:[#allocation64_spill] sm:$0xff] %v5133_v49 }
 0xa0b   :  { %5914 = vst [vmem:[#allocation62_spill] sm:$0xff] %v5129_v59  ;;  %5915 = vst [vmem:[#allocation63_spill] sm:$0xff] %v5131_v19 }
 0xa0d   :  { %2622 = vmatpush1.bf16.msra.mxu0 %v5115_v57  ;;  %2663 = vmatpush1.bf16.msra.mxu1 %v5117_v17  ;;  %v5145_v17 = vld [vmem:[#allocation4 + $0xa8] sm:$0xff]  ;;  %v5147_v57 = vld [vmem:[#allocation4 + $0xb8] sm:$0xff] }
 0xa0e   :  { %2673 = vmatprep.subr.bf16.mxu0 %v5119_v3  ;;  %2714 = vmatprep.subr.bf16.mxu1 %v5121_v52  ;;  %v5141_v52 = vld [vmem:[#allocation4 + $0x60] sm:$0xff]  ;;  %v5143_v3 = vld [vmem:[#allocation4 + $0x70] sm:$0xff]  ;;  %5920 = vst [vmem:[#allocation67_spill] sm:$0xff] %v5145_v17  ;;  %5921 = vst [vmem:[#allocation68_spill] sm:$0xff] %v5147_v57 }
 0xa0f   :  { %5918 = vst [vmem:[#allocation65_spill] sm:$0xff] %v5141_v52  ;;  %5919 = vst [vmem:[#allocation66_spill] sm:$0xff] %v5143_v3 }
 0xa10   :  { %2624 = vmatmul.mubr.bf16.vlgmr.msra.gmra.mrb[36].mxu0 %v5917_v25  ;;  %2665 = vmatmul.mubr.bf16.vlgmr.msra.gmra.mrb[20].mxu1 %v5917_v25 }
 0xa11   :  { %2674 = vmatpush1.bf16.msra.mxu0 %v5127_v2  ;;  %2715 = vmatpush1.bf16.msra.mxu1 %v5129_v59  ;;  %v5159_v59 = vld [vmem:[#allocation4 + $0xe8] sm:$0xff]  ;;  %v5161_v2 = vld [vmem:[#allocation4 + $0xf8] sm:$0xff] }
 0xa12   :  { %2675 = vmatprep.subr.bf16.mxu0 %v5131_v19  ;;  %2716 = vmatprep.subr.bf16.mxu1 %v5133_v49  ;;  %v5155_v49 = vld [vmem:[#allocation4 + $0xa0] sm:$0xff]  ;;  %v5157_v19 = vld [vmem:[#allocation4 + $0xb0] sm:$0xff]  ;;  %5924 = vst [vmem:[#allocation71_spill] sm:$0xff] %v5159_v59  ;;  %5925 = vst [vmem:[#allocation72_spill] sm:$0xff] %v5161_v2 }
 0xa13   :  { %2705 = vmatprep.mubr.bf16.mxu0 %v5917_v25  ;;  %2746 = vmatprep.mubr.bf16.mxu1 %v5917_v25  ;;  %5922 = vst [vmem:[#allocation69_spill] sm:$0xff] %v5155_v49  ;;  %5923 = vst [vmem:[#allocation70_spill] sm:$0xff] %v5157_v19 }
 0xa15   :  { %2676 = vmatpush1.bf16.msra.mxu0 %v5141_v52  ;;  %2717 = vmatpush1.bf16.msra.mxu1 %v5143_v3  ;;  %v5167_v3 = vld [vmem:[#allocation4 + $0xe0] sm:$0xff]  ;;  %v5173_v52 = vld [vmem:[#allocation4 + $0x138] sm:$0xff] }
 0xa16   :  { %2677 = vmatprep.subr.bf16.mxu0 %v5145_v17  ;;  %2718 = vmatprep.subr.bf16.mxu1 %v5147_v57  ;;  %5926 = vst [vmem:[#allocation73_spill] sm:$0xff] %v5167_v3  ;;  %v5169_v17 = vld [vmem:[#allocation4 + $0xf0] sm:$0xff]  ;;  %v5171_v57 = vld [vmem:[#allocation4 + $0x128] sm:$0xff]  ;;  %5929 = vst [vmem:[#allocation76_spill] sm:$0xff] %v5173_v52 }
 0xa17   :  { %5927 = vst [vmem:[#allocation74_spill] sm:$0xff] %v5169_v17  ;;  %5928 = vst [vmem:[#allocation75_spill] sm:$0xff] %v5171_v57 }
 0xa19   :  { %2678 = vmatpush1.bf16.msra.mxu0 %v5155_v49  ;;  %2719 = vmatpush1.bf16.msra.mxu1 %v5157_v19  ;;  %v5179_v19 = vld [vmem:[#allocation4 + $0x120] sm:$0xff]  ;;  %v5185_v49 = vld [vmem:[#allocation4 + $0x178] sm:$0xff] }
 0xa1a   :  { %2679 = vmatprep.subr.bf16.mxu0 %v5159_v59  ;;  %2720 = vmatprep.subr.bf16.mxu1 %v5161_v2  ;;  %5930 = vst [vmem:[#allocation77_spill] sm:$0xff] %v5179_v19  ;;  %v5181_v59 = vld [vmem:[#allocation4 + $0x130] sm:$0xff]  ;;  %v5183_v2 = vld [vmem:[#allocation4 + $0x168] sm:$0xff]  ;;  %5933 = vst [vmem:[#allocation80_spill] sm:$0xff] %v5185_v49 }
 0xa1b   :  { %5931 = vst [vmem:[#allocation78_spill] sm:$0xff] %v5181_v59  ;;  %5932 = vst [vmem:[#allocation79_spill] sm:$0xff] %v5183_v2 }
 0xa1d   :  { %2680 = vmatpush1.bf16.msra.mxu0 %v5167_v3  ;;  %2721 = vmatpush1.bf16.msra.mxu1 %v5169_v17  ;;  %v5191_v17 = vld [vmem:[#allocation4 + $0x160] sm:$0xff]  ;;  %v5197_v3 = vld [vmem:[#allocation4 + $0x1b8] sm:$0xff] }
 0xa1e   :  { %2681 = vmatprep.subr.bf16.mxu0 %v5171_v57  ;;  %2722 = vmatprep.subr.bf16.mxu1 %v5173_v52  ;;  %5934 = vst [vmem:[#allocation81_spill] sm:$0xff] %v5191_v17  ;;  %v5193_v57 = vld [vmem:[#allocation4 + $0x170] sm:$0xff]  ;;  %v5195_v52 = vld [vmem:[#allocation4 + $0x1a8] sm:$0xff]  ;;  %5937 = vst [vmem:[#allocation84_spill] sm:$0xff] %v5197_v3 }
 0xa1f   :  { %5935 = vst [vmem:[#allocation82_spill] sm:$0xff] %v5193_v57  ;;  %5936 = vst [vmem:[#allocation83_spill] sm:$0xff] %v5195_v52 }
 0xa21   :  { %2682 = vmatpush1.bf16.msra.mxu0 %v5179_v19  ;;  %2723 = vmatpush1.bf16.msra.mxu1 %v5181_v59  ;;  %v5203_v59 = vld [vmem:[#allocation4 + $0x1a0] sm:$0xff]  ;;  %v5209_v19 = vld [vmem:[#allocation4 + $0x1f8] sm:$0xff] }
 0xa22   :  { %2683 = vmatprep.subr.bf16.mxu0 %v5183_v2  ;;  %2724 = vmatprep.subr.bf16.mxu1 %v5185_v49  ;;  %5938 = vst [vmem:[#allocation85_spill] sm:$0xff] %v5203_v59  ;;  %v5205_v2 = vld [vmem:[#allocation4 + $0x1b0] sm:$0xff]  ;;  %v5207_v49 = vld [vmem:[#allocation4 + $0x1e8] sm:$0xff]  ;;  %5941 = vst [vmem:[#allocation88_spill] sm:$0xff] %v5209_v19 }
 0xa23   :  { %5939 = vst [vmem:[#allocation86_spill] sm:$0xff] %v5205_v2  ;;  %5940 = vst [vmem:[#allocation87_spill] sm:$0xff] %v5207_v49 }
 0xa25   :  { %2684 = vmatpush1.bf16.msra.mxu0 %v5191_v17  ;;  %2725 = vmatpush1.bf16.msra.mxu1 %v5193_v57  ;;  %v5215_v57 = vld [vmem:[#allocation4 + $0x1e0] sm:$0xff]  ;;  %v5221_v17 = vld [vmem:[#allocation4 + $0x238] sm:$0xff] }
 0xa26   :  { %2685 = vmatprep.subr.bf16.mxu0 %v5195_v52  ;;  %2726 = vmatprep.subr.bf16.mxu1 %v5197_v3  ;;  %5942 = vst [vmem:[#allocation89_spill] sm:$0xff] %v5215_v57  ;;  %v5217_v52 = vld [vmem:[#allocation4 + $0x1f0] sm:$0xff]  ;;  %v5219_v3 = vld [vmem:[#allocation4 + $0x228] sm:$0xff]  ;;  %5945 = vst [vmem:[#allocation92_spill] sm:$0xff] %v5221_v17 }
 0xa27   :  { %5943 = vst [vmem:[#allocation90_spill] sm:$0xff] %v5217_v52  ;;  %5944 = vst [vmem:[#allocation91_spill] sm:$0xff] %v5219_v3 }
 0xa29   :  { %2686 = vmatpush1.bf16.msra.mxu0 %v5203_v59  ;;  %2727 = vmatpush1.bf16.msra.mxu1 %v5205_v2  ;;  %v5227_v2 = vld [vmem:[#allocation4 + $0x220] sm:$0xff]  ;;  %v5233_v59 = vld [vmem:[#allocation4 + $0x278] sm:$0xff] }
 0xa2a   :  { %2687 = vmatprep.subr.bf16.mxu0 %v5207_v49  ;;  %2728 = vmatprep.subr.bf16.mxu1 %v5209_v19  ;;  %5946 = vst [vmem:[#allocation93_spill] sm:$0xff] %v5227_v2  ;;  %v5229_v49 = vld [vmem:[#allocation4 + $0x230] sm:$0xff]  ;;  %v5231_v19 = vld [vmem:[#allocation4 + $0x268] sm:$0xff]  ;;  %5949 = vst [vmem:[#allocation96_spill] sm:$0xff] %v5233_v59 }
 0xa2b   :  { %5947 = vst [vmem:[#allocation94_spill] sm:$0xff] %v5229_v49  ;;  %5948 = vst [vmem:[#allocation95_spill] sm:$0xff] %v5231_v19 }
 0xa2d   :  { %2688 = vmatpush1.bf16.msra.mxu0 %v5215_v57  ;;  %2729 = vmatpush1.bf16.msra.mxu1 %v5217_v52  ;;  %v5239_v52 = vld [vmem:[#allocation4 + $0x260] sm:$0xff]  ;;  %v5245_v57 = vld [vmem:[#allocation4 + $0x2b8] sm:$0xff] }
 0xa2e   :  { %2689 = vmatprep.subr.bf16.mxu0 %v5219_v3  ;;  %2730 = vmatprep.subr.bf16.mxu1 %v5221_v17  ;;  %5950 = vst [vmem:[#allocation97_spill] sm:$0xff] %v5239_v52  ;;  %v5241_v3 = vld [vmem:[#allocation4 + $0x270] sm:$0xff]  ;;  %v5243_v17 = vld [vmem:[#allocation4 + $0x2a8] sm:$0xff]  ;;  %5953 = vst [vmem:[#allocation100_spill] sm:$0xff] %v5245_v57 }
 0xa2f   :  { %5951 = vst [vmem:[#allocation98_spill] sm:$0xff] %v5241_v3  ;;  %5952 = vst [vmem:[#allocation99_spill] sm:$0xff] %v5243_v17 }
 0xa31   :  { %2690 = vmatpush1.bf16.msra.mxu0 %v5227_v2  ;;  %2731 = vmatpush1.bf16.msra.mxu1 %v5229_v49  ;;  %v5251_v49 = vld [vmem:[#allocation4 + $0x2a0] sm:$0xff]  ;;  %v5257_v2 = vld [vmem:[#allocation4 + $0x2f8] sm:$0xff] }
 0xa32   :  { %2691 = vmatprep.subr.bf16.mxu0 %v5231_v19  ;;  %2732 = vmatprep.subr.bf16.mxu1 %v5233_v59  ;;  %5954 = vst [vmem:[#allocation101_spill] sm:$0xff] %v5251_v49  ;;  %v5253_v19 = vld [vmem:[#allocation4 + $0x2b0] sm:$0xff]  ;;  %v5255_v59 = vld [vmem:[#allocation4 + $0x2e8] sm:$0xff]  ;;  %5957 = vst [vmem:[#allocation104_spill] sm:$0xff] %v5257_v2 }
 0xa33   :  { %5955 = vst [vmem:[#allocation102_spill] sm:$0xff] %v5253_v19  ;;  %5956 = vst [vmem:[#allocation103_spill] sm:$0xff] %v5255_v59 }
 0xa35   :  { %2692 = vmatpush1.bf16.msra.mxu0 %v5239_v52  ;;  %2733 = vmatpush1.bf16.msra.mxu1 %v5241_v3  ;;  %v5263_v3 = vld [vmem:[#allocation4 + $0x2e0] sm:$0xff]  ;;  %v5269_v52 = vld [vmem:[#allocation4 + $0x338] sm:$0xff] }
 0xa36   :  { %2693 = vmatprep.subr.bf16.mxu0 %v5243_v17  ;;  %2734 = vmatprep.subr.bf16.mxu1 %v5245_v57  ;;  %5958 = vst [vmem:[#allocation105_spill] sm:$0xff] %v5263_v3  ;;  %v5265_v17 = vld [vmem:[#allocation4 + $0x2f0] sm:$0xff]  ;;  %v5267_v57 = vld [vmem:[#allocation4 + $0x328] sm:$0xff]  ;;  %5961 = vst [vmem:[#allocation108_spill] sm:$0xff] %v5269_v52 }
 0xa37   :  { %5959 = vst [vmem:[#allocation106_spill] sm:$0xff] %v5265_v17  ;;  %5960 = vst [vmem:[#allocation107_spill] sm:$0xff] %v5267_v57 }
 0xa39   :  { %2694 = vmatpush1.bf16.msra.mxu0 %v5251_v49  ;;  %2735 = vmatpush1.bf16.msra.mxu1 %v5253_v19  ;;  %v5275_v19 = vld [vmem:[#allocation4 + $0x320] sm:$0xff]  ;;  %v5281_v49 = vld [vmem:[#allocation4 + $0x378] sm:$0xff] }
 0xa3a   :  { %2695 = vmatprep.subr.bf16.mxu0 %v5255_v59  ;;  %2736 = vmatprep.subr.bf16.mxu1 %v5257_v2  ;;  %5962 = vst [vmem:[#allocation109_spill] sm:$0xff] %v5275_v19  ;;  %v5277_v59 = vld [vmem:[#allocation4 + $0x330] sm:$0xff]  ;;  %v5279_v2 = vld [vmem:[#allocation4 + $0x368] sm:$0xff]  ;;  %5965 = vst [vmem:[#allocation112_spill] sm:$0xff] %v5281_v49 }
 0xa3b   :  { %5963 = vst [vmem:[#allocation110_spill] sm:$0xff] %v5277_v59  ;;  %5964 = vst [vmem:[#allocation111_spill] sm:$0xff] %v5279_v2 }
 0xa3d   :  { %2696 = vmatpush1.bf16.msra.mxu0 %v5263_v3  ;;  %2737 = vmatpush1.bf16.msra.mxu1 %v5265_v17  ;;  %v5287_v17 = vld [vmem:[#allocation4 + $0x360] sm:$0xff]  ;;  %v5293_v3 = vld [vmem:[#allocation4 + $0x3b8] sm:$0xff] }
 0xa3e   :  { %2697 = vmatprep.subr.bf16.mxu0 %v5267_v57  ;;  %2738 = vmatprep.subr.bf16.mxu1 %v5269_v52  ;;  %v5289_v57 = vld [vmem:[#allocation4 + $0x370] sm:$0xff]  ;;  %v5291_v52 = vld [vmem:[#allocation4 + $0x3a8] sm:$0xff] }
 0xa3f   :  { %5966 = vst [vmem:[#allocation113_spill] sm:$0xff] %v5289_v57  ;;  %5967 = vst [vmem:[#allocation114_spill] sm:$0xff] %v5291_v52 }
 0xa41   :  { %2698 = vmatpush1.bf16.msra.mxu0 %v5275_v19  ;;  %2739 = vmatpush1.bf16.msra.mxu1 %v5277_v59  ;;  %v5299_v59 = vld [vmem:[#allocation4 + $0x3a0] sm:$0xff]  ;;  %v5305_v19 = vld [vmem:[#allocation4 + $0x3f8] sm:$0xff] }
 0xa42   :  { %2699 = vmatprep.subr.bf16.mxu0 %v5279_v2  ;;  %2740 = vmatprep.subr.bf16.mxu1 %v5281_v49  ;;  %v5301_v2 = vld [vmem:[#allocation4 + $0x3b0] sm:$0xff]  ;;  %v5303_v49 = vld [vmem:[#allocation4 + $0x3e8] sm:$0xff] }
 0xa45   :  { %2700 = vmatpush1.bf16.msra.mxu0 %v5287_v17  ;;  %2741 = vmatpush1.bf16.msra.mxu1 %v5289_v57  ;;  %v5311_v57 = vld [vmem:[#allocation4 + $0x3e0] sm:$0xff] }
 0xa46   :  { %2701 = vmatprep.subr.bf16.mxu0 %v5291_v52  ;;  %2742 = vmatprep.subr.bf16.mxu1 %v5293_v3  ;;  %v5313_v52 = vld [vmem:[#allocation4 + $0x3f0] sm:$0xff] }
 0xa49   :  { %2702 = vmatpush1.bf16.msra.mxu0 %v5299_v59  ;;  %2743 = vmatpush1.bf16.msra.mxu1 %v5301_v2 }
 0xa4a   :  { %2703 = vmatprep.subr.bf16.mxu0 %v5303_v49  ;;  %2744 = vmatprep.subr.bf16.mxu1 %v5305_v19 }
 0xa4d   :  { %2704 = vmatpush1.bf16.msra.mxu0 %v5311_v57  ;;  %2745 = vmatpush1.bf16.msra.mxu1 %v5313_v52 }
 0xa4e   :  { %2813 = vmatprep.subr.bf16.mxu0 %v4929_v9  ;;  %2854 = vmatprep.subr.bf16.mxu1 %v4931_v4 }
 0xa50   :  { %2706 = vmatmul.mubr.bf16.vlgmr.msra.gmra.mrb[40].mxu0 %v5917_v25  ;;  %2747 = vmatmul.mubr.bf16.vlgmr.msra.gmra.mrb[24].mxu1 %v5917_v25  ;;  %v5968_v25 = vld [vmem:[#allocation50_spill] sm:$0xff] }
 0xa51   :  { %2814 = vmatpush1.bf16.msra.mxu0 %v4933_v10  ;;  %2855 = vmatpush1.bf16.msra.mxu1 %v4937_v11 }
 0xa52   :  { %2815 = vmatprep.subr.bf16.mxu0 %v4939_v27  ;;  %2856 = vmatprep.subr.bf16.mxu1 %v4941_v12 }
 0xa55   :  { %2816 = vmatpush1.bf16.msra.mxu0 %v4947_v60  ;;  %2857 = vmatpush1.bf16.msra.mxu1 %v4949_v13 }
 0xa56   :  { %2817 = vmatprep.subr.bf16.mxu0 %v4951_v14  ;;  %2858 = vmatprep.subr.bf16.mxu1 %v4953_v15 }
 0xa59   :  { %2818 = vmatpush1.bf16.msra.mxu0 %v4959_v16  ;;  %2859 = vmatpush1.bf16.msra.mxu1 %v4961_v18 }
 0xa5a   :  { %2819 = vmatprep.subr.bf16.mxu0 %v4963_v40  ;;  %2860 = vmatprep.subr.bf16.mxu1 %v4965_v20 }
 0xa5d   :  { %2820 = vmatpush1.bf16.msra.mxu0 %v4971_v21  ;;  %2861 = vmatpush1.bf16.msra.mxu1 %v4973_v22 }
 0xa5e   :  { %2821 = vmatprep.subr.bf16.mxu0 %v4975_v26  ;;  %2862 = vmatprep.subr.bf16.mxu1 %v4977_v23 }
 0xa61   :  { %2822 = vmatpush1.bf16.msra.mxu0 %v4983_v28  ;;  %2863 = vmatpush1.bf16.msra.mxu1 %v4985_v24 }
 0xa62   :  { %2823 = vmatprep.subr.bf16.mxu0 %v4987_v29  ;;  %2864 = vmatprep.subr.bf16.mxu1 %v4989_v30 }
 0xa65   :  { %2824 = vmatpush1.bf16.msra.mxu0 %v4995_v32  ;;  %2865 = vmatpush1.bf16.msra.mxu1 %v4997_v33 }
 0xa66   :  { %2825 = vmatprep.subr.bf16.mxu0 %v4999_v31  ;;  %2866 = vmatprep.subr.bf16.mxu1 %v5001_v34 }
 0xa69   :  { %2826 = vmatpush1.bf16.msra.mxu0 %v5007_v35  ;;  %2867 = vmatpush1.bf16.msra.mxu1 %v5009_v36 }
 0xa6a   :  { %2827 = vmatprep.subr.bf16.mxu0 %v5011_v41  ;;  %2868 = vmatprep.subr.bf16.mxu1 %v5013_v42 }
 0xa6d   :  { %2828 = vmatpush1.bf16.msra.mxu0 %v5019_v54  ;;  %2869 = vmatpush1.bf16.msra.mxu1 %v5021_v44 }
 0xa6e   :  { %2829 = vmatprep.subr.bf16.mxu0 %v5023_v45  ;;  %2870 = vmatprep.subr.bf16.mxu1 %v5025_v46 }
 0xa71   :  { %2830 = vmatpush1.bf16.msra.mxu0 %v5031_v47  ;;  %2871 = vmatpush1.bf16.msra.mxu1 %v5033_v38 }
 0xa72   :  { %2831 = vmatprep.subr.bf16.mxu0 %v5035_v48  ;;  %2872 = vmatprep.subr.bf16.mxu1 %v5037_v50 }
 0xa75   :  { %2832 = vmatpush1.bf16.msra.mxu0 %v5043_v51  ;;  %2873 = vmatpush1.bf16.msra.mxu1 %v5045_v53  ;;  %v5981_v53 = vld [vmem:[#allocation23_spill] sm:$0xff] }
 0xa76   :  { %2833 = vmatprep.subr.bf16.mxu0 %v5047_v0  ;;  %2874 = vmatprep.subr.bf16.mxu1 %v5049_v55  ;;  %v5979_v55 = vld [vmem:[#allocation22_spill] sm:$0xff]  ;;  %v5982_v51 = vld [vmem:[#allocation27_spill] sm:$0xff] }
 0xa77   :  { %v5980_v0 = vld [vmem:[#allocation26_spill] sm:$0xff] }
 0xa79   :  { %2834 = vmatpush1.bf16.msra.mxu0 %v5055_v43  ;;  %2875 = vmatpush1.bf16.msra.mxu1 %v5057_v56 }
 0xa7a   :  { %2835 = vmatprep.subr.bf16.mxu0 %v5059_v58  ;;  %2876 = vmatprep.subr.bf16.mxu1 %v5061_v61  ;;  %v5969_v61 = vld [vmem:[#allocation51_spill] sm:$0xff] }
 0xa7d   :  { %2836 = vmatpush1.bf16.msra.mxu0 %v5063_v62  ;;  %2877 = vmatpush1.bf16.msra.mxu1 %v5065_v63  ;;  %v5970_v62 = vld [vmem:[#allocation52_spill] sm:$0xff]  ;;  %v5971_v63 = vld [vmem:[#allocation53_spill] sm:$0xff] }
 0xa7e   :  { %2837 = vmatprep.subr.bf16.mxu0 %v5069_v37  ;;  %2878 = vmatprep.subr.bf16.mxu1 %v5071_v39  ;;  %v5972_v37 = vld [vmem:[#allocation54_spill] sm:$0xff]  ;;  %v5973_v39 = vld [vmem:[#allocation55_spill] sm:$0xff] }
 0xa81   :  { %2838 = vmatpush1.bf16.msra.mxu0 %v5075_v1  ;;  %2879 = vmatpush1.bf16.msra.mxu1 %v5077_v6  ;;  %v5974_v1 = vld [vmem:[#allocation56_spill] sm:$0xff]  ;;  %v5975_v6 = vld [vmem:[#allocation57_spill] sm:$0xff] }
 0xa82   :  { %2839 = vmatprep.subr.bf16.mxu0 %v5081_v7  ;;  %2880 = vmatprep.subr.bf16.mxu1 %v5083_v5  ;;  %v5976_v7 = vld [vmem:[#allocation58_spill] sm:$0xff]  ;;  %v5977_v5 = vld [vmem:[#allocation59_spill] sm:$0xff] }
 0xa85   :  { %2840 = vmatpush1.bf16.msra.mxu0 %v5087_v8  ;;  %2881 = vmatpush1.bf16.msra.mxu1 %v5968_v25  ;;  %v5978_v8 = vld [vmem:[#allocation60_spill] sm:$0xff] }
 0xa86   :  { %2841 = vmatprep.subr.bf16.mxu0 %v5969_v61  ;;  %2882 = vmatprep.subr.bf16.mxu1 %v5970_v62 }
 0xa89   :  { %2842 = vmatpush1.bf16.msra.mxu0 %v5971_v63  ;;  %2883 = vmatpush1.bf16.msra.mxu1 %v5972_v37 }
 0xa8a   :  { %2843 = vmatprep.subr.bf16.mxu0 %v5973_v39  ;;  %2884 = vmatprep.subr.bf16.mxu1 %v5974_v1 }
 0xa8d   :  { %2844 = vmatpush1.bf16.msra.mxu0 %v5975_v6  ;;  %2885 = vmatpush1.bf16.msra.mxu1 %v5976_v7 }
 0xa8e   :  { %2895 = vmatprep.subr.bf16.mxu0 %v5977_v5  ;;  %2936 = vmatprep.subr.bf16.mxu1 %v5978_v8 }
 0xae3   :  { %v2625_v25 = vpop.f32.mrb[36].mxu0  ;;  %v2666_v61 = vpop.f32.mrb[20].mxu1 }
 0xae4   :  { %v2627_v58 = vpop.f32.mrb[37].mxu0  ;;  %v2668_v62 = vpop.f32.mrb[21].mxu1  ;;  %v2755_v39 = vadd.f32 %v5979_v55, %v2625_v25  ;;  %v2757_v1 = vadd.f32 %v5980_v0, %v2666_v61 }
 0xae5   :  { %v2629_v56 = vpop.f32.mrb[38].mxu0  ;;  %v2670_v63 = vpop.f32.mrb[22].mxu1  ;;  %v2756_v6 = vadd.f32 %v5981_v53, %v2627_v58  ;;  %v2758_v7 = vadd.f32 %v5982_v51, %v2668_v62  ;;  %v5986_v53 = vld [vmem:[#allocation25_spill] sm:$0xff] }
 0xae6   :  { %v2630_v43 = vpop.f32.mrb[39].mxu0  ;;  %v2671_v37 = vpop.f32.mrb[23].mxu1  ;;  %v3889_v50 = vmul.f32 -1.442695, %v2755_v39  ;;  %v3891_v5 = vmul.f32 -1.442695, %v2757_v1 }
 0xae7   :  { %v3890_v48 = vmul.f32 -1.442695, %v2756_v6  ;;  %v3892_v8 = vmul.f32 -1.442695, %v2758_v7  ;;  %v5983_v39 = vld [vmem:[#allocation28_spill] sm:$0xff] }
 0xae8   :  { %4161 = vpow2.f32 %v3889_v50  ;;  %v5984_v6 = vld [vmem:[#allocation24_spill] sm:$0xff] }
 0xae9   :  { %4163 = vpow2.f32 %v3891_v5  ;;  %v5985_v5 = vld [vmem:[#allocation29_spill] sm:$0xff] }
 0xaea   :  { %4165 = vpow2.f32 %v3890_v48 }
 0xaeb   :  { %4167 = vpow2.f32 %v3892_v8 }
 0xaf2   :  { %v4162_v56 = vpop.eup %4161 }
 0xaf3   :  { %v4164_v63 = vpop.eup %4163  ;;  %v2769_v38 = vadd.f32 1.0, %v4162_v56 }
 0xaf4   :  { %v4166_v43 = vpop.eup %4165  ;;  %v2781_v25 = vadd.f32 1.0, %v4164_v63 }
 0xaf5   :  { %v4168_v37 = vpop.eup %4167  ;;  %v2770_v55 = vadd.f32 1.0, %v4166_v43  ;;  %4169 = vrcp.f32 %v2769_v38 }
 0xaf6   :  { %v2782_v61 = vadd.f32 1.0, %v4168_v37  ;;  %4171 = vrcp.f32 %v2781_v25 }
 0xaf7   :  { %4173 = vrcp.f32 %v2770_v55 }
 0xaf8   :  { %4175 = vrcp.f32 %v2782_v61 }
 0xaff   :  { %v4170_v55 = vpop.eup %4169 }
 0xb23   :  { %v2707_v58 = vpop.f32.mrb[40].mxu0  ;;  %v2748_v62 = vpop.f32.mrb[24].mxu1 }
 0xb24   :  { %v2759_v1 = vadd.f32 %v5983_v39, %v2707_v58  ;;  %v2761_v50 = vadd.f32 %v5984_v6, %v2748_v62  ;;  %v2709_v7 = vpop.f32.mrb[41].mxu0  ;;  %v2750_v48 = vpop.f32.mrb[25].mxu1 }
 0xb25   :  { %v2760_v8 = vadd.f32 %v5985_v5, %v2709_v7  ;;  %v2762_v51 = vadd.f32 %v5986_v53, %v2750_v48  ;;  %v2711_v56 = vpop.f32.mrb[42].mxu0  ;;  %v2752_v63 = vpop.f32.mrb[26].mxu1 }
 0xb26   :  { %4177 = vtanh.f32 %v2759_v1  ;;  %v3893_v43 = vmul.f32 -1.442695, %v2761_v50  ;;  %v2712_v38 = vpop.f32.mrb[43].mxu0  ;;  %v2753_v37 = vpop.f32.mrb[27].mxu1 }
 0xb27   :  { %4179 = vtanh.f32 %v2760_v8  ;;  %v3894_v25 = vmul.f32 -1.442695, %v2762_v51  ;;  %v4172_v58 = vpop.eup %4171 }
 0xb28   :  { %4181 = vpow2.f32 %v3893_v43  ;;  %v4174_v62 = vpop.eup %4173  ;;  %v2801_v0 = vmul.f32 0.0, %v4172_v58 }
 0xb29   :  { %4183 = vpow2.f32 %v3894_v25  ;;  %v4176_v6 = vpop.eup %4175 }
 0xb2a   :  { %v2802_v48 = vmul.f32 0.0, %v4176_v6 }
 0xb30   :  { %v4178_v39 = vpop.eup %4177 }
 0xb31   :  { %v4180_v61 = vpop.eup %4179  ;;  %v2803_v7 = vmul.f32 %v4178_v39, %v4170_v55 }
 0xb32   :  { %v4182_v5 = vpop.eup %4181  ;;  %v2804_v56 = vmul.f32 %v4180_v61, %v4174_v62  ;;  %v5989_v62 = vld [vmem:[#allocation63_spill] sm:$0xff]  ;;  %v5990_v61 = vld [vmem:[#allocation64_spill] sm:$0xff] }
 0xb33   :  { %v4184_v63 = vpop.eup %4183  ;;  %v5393_v1 = vadd.f32 %v2803_v7, %v2801_v0  ;;  %v2795_v50 = vadd.f32 1.0, %v4182_v5  ;;  %v5987_v0 = vld [vmem:[#allocation61_spill] sm:$0xff]  ;;  %v5988_v5 = vld [vmem:[#allocation62_spill] sm:$0xff] }
 0xb34   :  { %v5395_v38 = vadd.f32 %v2804_v56, %v2802_v48  ;;  %v2796_v51 = vadd.f32 1.0, %v4184_v63  ;;  %v5991_v7 = vld [vmem:[#allocation65_spill] sm:$0xff]  ;;  %v5992_v48 = vld [vmem:[#allocation66_spill] sm:$0xff]  ;;  %v5993_v56 = vld [vmem:[#allocation67_spill] sm:$0xff] }
 0xb35   :  { %4185 = vtanh.f32 %v5393_v1  ;;  %v5994_v63 = vld [vmem:[#allocation68_spill] sm:$0xff] }
 0xb36   :  { %4187 = vrcp.f32 %v2795_v50  ;;  %v5995_v50 = vld [vmem:[#allocation69_spill] sm:$0xff] }
 0xb37   :  { %4189 = vtanh.f32 %v5395_v38 }
 0xb38   :  { %4191 = vrcp.f32 %v2796_v51  ;;  %v5996_v51 = vld [vmem:[#allocation70_spill] sm:$0xff] }
 0xb3f   :  { %v4186_v8 = vpop.eup %4185 }
 0xb40   :  { %v4188_v43 = vpop.eup %4187 }
 0xb41   :  { %v4190_v37 = vpop.eup %4189  ;;  %v2809_v39 = vmul.f32 %v4188_v43, %v4186_v8  ;;  %v5997_v8 = vld [vmem:[#allocation71_spill] sm:$0xff]  ;;  %v5998_v43 = vld [vmem:[#allocation72_spill] sm:$0xff] }
 0xb42   :  { %v4192_v25 = vpop.eup %4191 }
 0xb43   :  { %v2810_v6 = vmul.f32 %v4192_v25, %v4190_v37  ;;  %v5399_v58 = vpack.c.bf16 %v2809_v39, %v2809_v39  ;;  %v5999_v37 = vld [vmem:[#allocation73_spill] sm:$0xff]  ;;  %v6000_v39 = vld [vmem:[#allocation74_spill] sm:$0xff]  ;;  %v6001_v25 = vld [vmem:[#allocation75_spill] sm:$0xff] }
 0xb45   :  { %v2812_v55 = vpack.c.bf16 %v2810_v6, %v2810_v6  ;;  %v6002_v6 = vld [vmem:[#allocation76_spill] sm:$0xff] }
 0xb47   :  { %2845 = vmatprep.mubr.bf16.mxu0 %v2812_v55  ;;  %2886 = vmatprep.mubr.bf16.mxu1 %v2812_v55 }
 0xb48   :  { %2846 = vmatmul.mubr.bf16.vlgmr.msra.gmra.mrb[44].mxu0 %v5399_v58  ;;  %2887 = vmatmul.mubr.bf16.vlgmr.msra.gmra.mrb[28].mxu1 %v5399_v58 }
 0xb49   :  { %2896 = vmatpush1.bf16.msra.mxu0 %v5987_v0  ;;  %2937 = vmatpush1.bf16.msra.mxu1 %v5988_v5 }
 0xb4a   :  { %2927 = vmatprep.mubr.bf16.mxu0 %v2812_v55  ;;  %2968 = vmatprep.mubr.bf16.mxu1 %v2812_v55  ;;  %v6003_v55 = vld [vmem:[#allocation77_spill] sm:$0xff] }
 0xb4b   :  { %2897 = vmatprep.subr.bf16.mxu0 %v5989_v62  ;;  %2938 = vmatprep.subr.bf16.mxu1 %v5990_v61 }
 0xb4d   :  { %2898 = vmatpush1.bf16.msra.mxu0 %v5991_v7  ;;  %2939 = vmatpush1.bf16.msra.mxu1 %v5992_v48 }
 0xb4e   :  { %2899 = vmatprep.subr.bf16.mxu0 %v5993_v56  ;;  %2940 = vmatprep.subr.bf16.mxu1 %v5994_v63  ;;  %v6004_v56 = vld [vmem:[#allocation78_spill] sm:$0xff]  ;;  %v6005_v63 = vld [vmem:[#allocation79_spill] sm:$0xff] }
 0xb51   :  { %2900 = vmatpush1.bf16.msra.mxu0 %v5995_v50  ;;  %2941 = vmatpush1.bf16.msra.mxu1 %v5996_v51  ;;  %v6006_v50 = vld [vmem:[#allocation80_spill] sm:$0xff]  ;;  %v6007_v51 = vld [vmem:[#allocation81_spill] sm:$0xff] }
 0xb52   :  { %2901 = vmatprep.subr.bf16.mxu0 %v5997_v8  ;;  %2942 = vmatprep.subr.bf16.mxu1 %v5998_v43  ;;  %v6008_v8 = vld [vmem:[#allocation82_spill] sm:$0xff]  ;;  %v6009_v43 = vld [vmem:[#allocation83_spill] sm:$0xff] }
 0xb55   :  { %2902 = vmatpush1.bf16.msra.mxu0 %v5999_v37  ;;  %2943 = vmatpush1.bf16.msra.mxu1 %v6000_v39  ;;  %v6010_v37 = vld [vmem:[#allocation84_spill] sm:$0xff]  ;;  %v6011_v39 = vld [vmem:[#allocation85_spill] sm:$0xff] }
 0xb56   :  { %2903 = vmatprep.subr.bf16.mxu0 %v6001_v25  ;;  %2944 = vmatprep.subr.bf16.mxu1 %v6002_v6  ;;  %v6012_v25 = vld [vmem:[#allocation86_spill] sm:$0xff]  ;;  %v6013_v6 = vld [vmem:[#allocation87_spill] sm:$0xff] }
 0xb59   :  { %2904 = vmatpush1.bf16.msra.mxu0 %v6003_v55  ;;  %2945 = vmatpush1.bf16.msra.mxu1 %v6004_v56  ;;  %v6014_v55 = vld [vmem:[#allocation88_spill] sm:$0xff]  ;;  %v6015_v56 = vld [vmem:[#allocation89_spill] sm:$0xff] }
 0xb5a   :  { %2905 = vmatprep.subr.bf16.mxu0 %v6005_v63  ;;  %2946 = vmatprep.subr.bf16.mxu1 %v6006_v50  ;;  %v6016_v63 = vld [vmem:[#allocation90_spill] sm:$0xff]  ;;  %v6017_v50 = vld [vmem:[#allocation91_spill] sm:$0xff] }
 0xb5d   :  { %2906 = vmatpush1.bf16.msra.mxu0 %v6007_v51  ;;  %2947 = vmatpush1.bf16.msra.mxu1 %v6008_v8  ;;  %v6018_v51 = vld [vmem:[#allocation92_spill] sm:$0xff]  ;;  %v6019_v8 = vld [vmem:[#allocation93_spill] sm:$0xff] }
 0xb5e   :  { %2907 = vmatprep.subr.bf16.mxu0 %v6009_v43  ;;  %2948 = vmatprep.subr.bf16.mxu1 %v6010_v37  ;;  %v6020_v43 = vld [vmem:[#allocation94_spill] sm:$0xff]  ;;  %v6021_v37 = vld [vmem:[#allocation95_spill] sm:$0xff] }
 0xb61   :  { %2908 = vmatpush1.bf16.msra.mxu0 %v6011_v39  ;;  %2949 = vmatpush1.bf16.msra.mxu1 %v6012_v25  ;;  %v6022_v39 = vld [vmem:[#allocation96_spill] sm:$0xff]  ;;  %v6023_v25 = vld [vmem:[#allocation97_spill] sm:$0xff] }
 0xb62   :  { %2909 = vmatprep.subr.bf16.mxu0 %v6013_v6  ;;  %2950 = vmatprep.subr.bf16.mxu1 %v6014_v55  ;;  %v6024_v6 = vld [vmem:[#allocation98_spill] sm:$0xff]  ;;  %v6025_v55 = vld [vmem:[#allocation99_spill] sm:$0xff] }
 0xb65   :  { %2910 = vmatpush1.bf16.msra.mxu0 %v6015_v56  ;;  %2951 = vmatpush1.bf16.msra.mxu1 %v6016_v63  ;;  %v6026_v56 = vld [vmem:[#allocation100_spill] sm:$0xff]  ;;  %v6027_v63 = vld [vmem:[#allocation101_spill] sm:$0xff] }
 0xb66   :  { %2911 = vmatprep.subr.bf16.mxu0 %v6017_v50  ;;  %2952 = vmatprep.subr.bf16.mxu1 %v6018_v51  ;;  %v6028_v50 = vld [vmem:[#allocation102_spill] sm:$0xff]  ;;  %v6029_v51 = vld [vmem:[#allocation103_spill] sm:$0xff] }
 0xb69   :  { %2912 = vmatpush1.bf16.msra.mxu0 %v6019_v8  ;;  %2953 = vmatpush1.bf16.msra.mxu1 %v6020_v43  ;;  %v6030_v8 = vld [vmem:[#allocation104_spill] sm:$0xff]  ;;  %v6031_v43 = vld [vmem:[#allocation105_spill] sm:$0xff] }
 0xb6a   :  { %2913 = vmatprep.subr.bf16.mxu0 %v6021_v37  ;;  %2954 = vmatprep.subr.bf16.mxu1 %v6022_v39  ;;  %v6032_v37 = vld [vmem:[#allocation106_spill] sm:$0xff]  ;;  %v6033_v39 = vld [vmem:[#allocation107_spill] sm:$0xff] }
 0xb6d   :  { %2914 = vmatpush1.bf16.msra.mxu0 %v6023_v25  ;;  %2955 = vmatpush1.bf16.msra.mxu1 %v6024_v6  ;;  %v6034_v25 = vld [vmem:[#allocation108_spill] sm:$0xff]  ;;  %v6035_v6 = vld [vmem:[#allocation109_spill] sm:$0xff] }
 0xb6e   :  { %2915 = vmatprep.subr.bf16.mxu0 %v6025_v55  ;;  %2956 = vmatprep.subr.bf16.mxu1 %v6026_v56  ;;  %v6036_v55 = vld [vmem:[#allocation110_spill] sm:$0xff]  ;;  %v6037_v56 = vld [vmem:[#allocation111_spill] sm:$0xff] }
 0xb71   :  { %2916 = vmatpush1.bf16.msra.mxu0 %v6027_v63  ;;  %2957 = vmatpush1.bf16.msra.mxu1 %v6028_v50  ;;  %v6038_v63 = vld [vmem:[#allocation112_spill] sm:$0xff] }
 0xb72   :  { %2917 = vmatprep.subr.bf16.mxu0 %v6029_v51  ;;  %2958 = vmatprep.subr.bf16.mxu1 %v6030_v8  ;;  %v6039_v51 = vld [vmem:[#allocation113_spill] sm:$0xff]  ;;  %v6040_v8 = vld [vmem:[#allocation114_spill] sm:$0xff] }
 0xb75   :  { %2918 = vmatpush1.bf16.msra.mxu0 %v6031_v43  ;;  %2959 = vmatpush1.bf16.msra.mxu1 %v6032_v37 }
 0xb76   :  { %2919 = vmatprep.subr.bf16.mxu0 %v6033_v39  ;;  %2960 = vmatprep.subr.bf16.mxu1 %v6034_v25 }
 0xb79   :  { %2920 = vmatpush1.bf16.msra.mxu0 %v6035_v6  ;;  %2961 = vmatpush1.bf16.msra.mxu1 %v6036_v55 }
 0xb7a   :  { %2921 = vmatprep.subr.bf16.mxu0 %v6037_v56  ;;  %2962 = vmatprep.subr.bf16.mxu1 %v6038_v63 }
 0xb7d   :  { %2922 = vmatpush1.bf16.msra.mxu0 %v5287_v17  ;;  %2963 = vmatpush1.bf16.msra.mxu1 %v6039_v51 }
 0xb7e   :  { %2923 = vmatprep.subr.bf16.mxu0 %v6040_v8  ;;  %2964 = vmatprep.subr.bf16.mxu1 %v5293_v3 }
 0xb81   :  { %2924 = vmatpush1.bf16.msra.mxu0 %v5299_v59  ;;  %2965 = vmatpush1.bf16.msra.mxu1 %v5301_v2 }
 0xb82   :  { %2925 = vmatprep.subr.bf16.mxu0 %v5303_v49  ;;  %2966 = vmatprep.subr.bf16.mxu1 %v5305_v19 }
 0xb85   :  { %2926 = vmatpush1.bf16.msra.mxu0 %v5311_v57  ;;  %2967 = vmatpush1.bf16.msra.mxu1 %v5313_v52 }
 0xb86   :  { %3071 = vmatprep.subr.bf16.mxu0 %v4929_v9  ;;  %3112 = vmatprep.subr.bf16.mxu1 %v4931_v4  ;;  %v6041_v9 = vld [vmem:[#allocation30_spill] sm:$0xff]  ;;  %v6042_v4 = vld [vmem:[#allocation31_spill] sm:$0xff] }
 0xb88   :  { %2928 = vmatmul.mubr.bf16.vlgmr.msra.gmra.mrb[48].mxu0 %v5399_v58  ;;  %2969 = vmatmul.mubr.bf16.vlgmr.msra.gmra.mrb[32].mxu1 %v5399_v58 }
 0xb89   :  { %3072 = vmatpush1.bf16.msra.mxu0 %v4933_v10  ;;  %3113 = vmatpush1.bf16.msra.mxu1 %v4937_v11  ;;  %v6043_v10 = vld [vmem:[#allocation32_spill] sm:$0xff]  ;;  %v6044_v11 = vld [vmem:[#allocation33_spill] sm:$0xff] }
 0xb8a   :  { %3073 = vmatprep.subr.bf16.mxu0 %v4939_v27  ;;  %3114 = vmatprep.subr.bf16.mxu1 %v4941_v12  ;;  %v6045_v27 = vld [vmem:[#allocation34_spill] sm:$0xff]  ;;  %v6046_v12 = vld [vmem:[#allocation35_spill] sm:$0xff] }
 0xb8d   :  { %3074 = vmatpush1.bf16.msra.mxu0 %v4947_v60  ;;  %3115 = vmatpush1.bf16.msra.mxu1 %v4949_v13  ;;  %v6047_v60 = vld [vmem:[#allocation36_spill] sm:$0xff]  ;;  %v6048_v13 = vld [vmem:[#allocation37_spill] sm:$0xff] }
 0xb8e   :  { %3075 = vmatprep.subr.bf16.mxu0 %v4951_v14  ;;  %3116 = vmatprep.subr.bf16.mxu1 %v4953_v15  ;;  %v6049_v14 = vld [vmem:[#allocation38_spill] sm:$0xff]  ;;  %v6050_v15 = vld [vmem:[#allocation39_spill] sm:$0xff] }
 0xb91   :  { %3076 = vmatpush1.bf16.msra.mxu0 %v4959_v16  ;;  %3117 = vmatpush1.bf16.msra.mxu1 %v4961_v18  ;;  %v6051_v16 = vld [vmem:[#allocation40_spill] sm:$0xff]  ;;  %v6052_v18 = vld [vmem:[#allocation41_spill] sm:$0xff] }
 0xb92   :  { %3077 = vmatprep.subr.bf16.mxu0 %v4963_v40  ;;  %3118 = vmatprep.subr.bf16.mxu1 %v4965_v20  ;;  %v6053_v40 = vld [vmem:[#allocation42_spill] sm:$0xff]  ;;  %v6054_v20 = vld [vmem:[#allocation43_spill] sm:$0xff] }
 0xb95   :  { %3078 = vmatpush1.bf16.msra.mxu0 %v4971_v21  ;;  %3119 = vmatpush1.bf16.msra.mxu1 %v4973_v22  ;;  %v6055_v21 = vld [vmem:[#allocation44_spill] sm:$0xff]  ;;  %v6056_v22 = vld [vmem:[#allocation45_spill] sm:$0xff] }
 0xb96   :  { %3079 = vmatprep.subr.bf16.mxu0 %v4975_v26  ;;  %3120 = vmatprep.subr.bf16.mxu1 %v4977_v23  ;;  %v6057_v26 = vld [vmem:[#allocation46_spill] sm:$0xff]  ;;  %v6058_v23 = vld [vmem:[#allocation47_spill] sm:$0xff] }
 0xb99   :  { %3080 = vmatpush1.bf16.msra.mxu0 %v4983_v28  ;;  %3121 = vmatpush1.bf16.msra.mxu1 %v4985_v24  ;;  %v6059_v28 = vld [vmem:[#allocation48_spill] sm:$0xff]  ;;  %v6060_v24 = vld [vmem:[#allocation49_spill] sm:$0xff] }
 0xb9a   :  { %3081 = vmatprep.subr.bf16.mxu0 %v4987_v29  ;;  %3122 = vmatprep.subr.bf16.mxu1 %v4989_v30  ;;  %v6061_v29 = vld [vmem:[#allocation50_spill] sm:$0xff]  ;;  %v6062_v30 = vld [vmem:[#allocation51_spill] sm:$0xff] }
 0xb9d   :  { %3082 = vmatpush1.bf16.msra.mxu0 %v4995_v32  ;;  %3123 = vmatpush1.bf16.msra.mxu1 %v4997_v33  ;;  %v6063_v32 = vld [vmem:[#allocation52_spill] sm:$0xff]  ;;  %v6064_v33 = vld [vmem:[#allocation53_spill] sm:$0xff] }
 0xb9e   :  { %3083 = vmatprep.subr.bf16.mxu0 %v4999_v31  ;;  %3124 = vmatprep.subr.bf16.mxu1 %v5001_v34  ;;  %v6065_v31 = vld [vmem:[#allocation54_spill] sm:$0xff]  ;;  %v6066_v34 = vld [vmem:[#allocation55_spill] sm:$0xff] }
 0xba1   :  { %3084 = vmatpush1.bf16.msra.mxu0 %v5007_v35  ;;  %3125 = vmatpush1.bf16.msra.mxu1 %v5009_v36  ;;  %v6067_v35 = vld [vmem:[#allocation56_spill] sm:$0xff]  ;;  %v6068_v36 = vld [vmem:[#allocation57_spill] sm:$0xff] }
 0xba2   :  { %3085 = vmatprep.subr.bf16.mxu0 %v5011_v41  ;;  %3126 = vmatprep.subr.bf16.mxu1 %v5013_v42  ;;  %v6069_v41 = vld [vmem:[#allocation58_spill] sm:$0xff]  ;;  %v6070_v42 = vld [vmem:[#allocation59_spill] sm:$0xff] }
 0xba5   :  { %3086 = vmatpush1.bf16.msra.mxu0 %v5019_v54  ;;  %3127 = vmatpush1.bf16.msra.mxu1 %v5021_v44  ;;  %v6071_v54 = vld [vmem:[#allocation60_spill] sm:$0xff] }
 0xba6   :  { %3087 = vmatprep.subr.bf16.mxu0 %v5023_v45  ;;  %3128 = vmatprep.subr.bf16.mxu1 %v5025_v46 }
 0xba9   :  { %3088 = vmatpush1.bf16.msra.mxu0 %v5031_v47  ;;  %3129 = vmatpush1.bf16.msra.mxu1 %v6041_v9 }
 0xbaa   :  { %3089 = vmatprep.subr.bf16.mxu0 %v6042_v4  ;;  %3130 = vmatprep.subr.bf16.mxu1 %v6043_v10 }
 0xbad   :  { %3090 = vmatpush1.bf16.msra.mxu0 %v6044_v11  ;;  %3131 = vmatpush1.bf16.msra.mxu1 %v6045_v27  ;;  %v6072_v11 = vld [vmem:[#allocation26_spill] sm:$0xff] }
 0xbae   :  { %3091 = vmatprep.subr.bf16.mxu0 %v6046_v12  ;;  %3132 = vmatprep.subr.bf16.mxu1 %v6047_v60 }
 0xbb1   :  { %3092 = vmatpush1.bf16.msra.mxu0 %v6048_v13  ;;  %3133 = vmatpush1.bf16.msra.mxu1 %v6049_v14  ;;  %v6073_v13 = vld [vmem:[#allocation27_spill] sm:$0xff] }
 0xbb2   :  { %3093 = vmatprep.subr.bf16.mxu0 %v6050_v15  ;;  %3134 = vmatprep.subr.bf16.mxu1 %v6051_v16 }
 0xbb5   :  { %3094 = vmatpush1.bf16.msra.mxu0 %v6052_v18  ;;  %3135 = vmatpush1.bf16.msra.mxu1 %v6053_v40 }
 0xbb6   :  { %3095 = vmatprep.subr.bf16.mxu0 %v6054_v20  ;;  %3136 = vmatprep.subr.bf16.mxu1 %v6055_v21 }
 0xbb9   :  { %3096 = vmatpush1.bf16.msra.mxu0 %v6056_v22  ;;  %3137 = vmatpush1.bf16.msra.mxu1 %v6057_v26  ;;  %v3049_v22 = vrot.slane %v5393_v1, 6 }
 0xbba   :  { %3097 = vmatprep.subr.bf16.mxu0 %v6058_v23  ;;  %3138 = vmatprep.subr.bf16.mxu1 %v6059_v28  ;;  %v3050_v23 = vrot.slane %v5395_v38, 6 }
 0xbbd   :  { %3098 = vmatpush1.bf16.msra.mxu0 %v6060_v24  ;;  %3139 = vmatpush1.bf16.msra.mxu1 %v6061_v29 }
 0xbbe   :  { %3099 = vmatprep.subr.bf16.mxu0 %v6062_v30  ;;  %3140 = vmatprep.subr.bf16.mxu1 %v6063_v32 }
 0xbc1   :  { %3100 = vmatpush1.bf16.msra.mxu0 %v6064_v33  ;;  %3141 = vmatpush1.bf16.msra.mxu1 %v6065_v31  ;;  %v6074_v33 = vld [vmem:[#allocation22_spill] sm:$0xff] }
 0xbc2   :  { %3101 = vmatprep.subr.bf16.mxu0 %v6066_v34  ;;  %3142 = vmatprep.subr.bf16.mxu1 %v6067_v35  ;;  %v6075_v34 = vld [vmem:[#allocation23_spill] sm:$0xff] }
 0xbc5   :  { %3102 = vmatpush1.bf16.msra.mxu0 %v6068_v36  ;;  %3143 = vmatpush1.bf16.msra.mxu1 %v6069_v41 }
 0xbc6   :  { %3153 = vmatprep.subr.bf16.mxu0 %v6070_v42  ;;  %3194 = vmatprep.subr.bf16.mxu1 %v6071_v54 }
 0xc1b   :  { %v2847_v44 = vpop.f32.mrb[44].mxu0  ;;  %v2888_v45 = vpop.f32.mrb[28].mxu1 }
 0xc1c   :  { %v2987_v46 = vrot.slane %v2888_v45, 6  ;;  %v2849_v47 = vpop.f32.mrb[45].mxu0  ;;  %v2890_v58 = vpop.f32.mrb[29].mxu1  ;;  %v2985_v30 = vrot.slane %v2847_v44, 6 }
 0xc1d   :  { %v2988_v9 = vrot.slane %v2890_v58, 6  ;;  %v2851_v4 = vpop.f32.mrb[46].mxu0  ;;  %v2892_v10 = vpop.f32.mrb[30].mxu1  ;;  %v2986_v32 = vrot.slane %v2849_v47, 6 }
 0xc1e   :  { %v3003_v27 = vadd.f32 %v6072_v11, %v2987_v46  ;;  %v2852_v12 = vpop.f32.mrb[47].mxu0  ;;  %v2893_v60 = vpop.f32.mrb[31].mxu1  ;;  %v3001_v31 = vadd.f32 %v6074_v33, %v2985_v30 }
 0xc1f   :  { %v3004_v14 = vadd.f32 %v6073_v13, %v2988_v9  ;;  %v3002_v35 = vadd.f32 %v6075_v34, %v2986_v32  ;;  %v6076_v60 = vld [vmem:[#allocation28_spill] sm:$0xff] }
 0xc20   :  { %v3897_v15 = vmul.f32 -1.442695, %v3003_v27  ;;  %v3895_v36 = vmul.f32 -1.442695, %v3001_v31 }
 0xc21   :  { %v3898_v16 = vmul.f32 -1.442695, %v3004_v14  ;;  %v3896_v41 = vmul.f32 -1.442695, %v3002_v35 }
 0xc22   :  { %4193 = vpow2.f32 %v3897_v15  ;;  %v6077_v15 = vld [vmem:[#allocation24_spill] sm:$0xff] }
 0xc23   :  { %4195 = vpow2.f32 %v3898_v16 }
 0xc2c   :  { %v4194_v18 = vpop.eup %4193 }
 0xc2d   :  { %v3027_v40 = vadd.f32 1.0, %v4194_v18  ;;  %v4196_v20 = vpop.eup %4195 }
 0xc2e   :  { %v3028_v21 = vadd.f32 1.0, %v4196_v20  ;;  %v6078_v20 = vld [vmem:[#allocation29_spill] sm:$0xff] }
 0xc2f   :  { %4197 = vrcp.f32 %v3027_v40 }
 0xc30   :  { %4199 = vrcp.f32 %v3028_v21 }
 0xc31   :  { %4201 = vpow2.f32 %v3895_v36 }
 0xc32   :  { %4203 = vpow2.f32 %v3896_v41 }
 0xc39   :  { %v4198_v26 = vpop.eup %4197 }
 0xc3a   :  { %v3053_v28 = vmul.f32 %v4198_v26, %v3049_v22  ;;  %v4200_v24 = vpop.eup %4199 }
 0xc3b   :  { %v3054_v29 = vmul.f32 %v4200_v24, %v3050_v23  ;;  %v4202_v42 = vpop.eup %4201 }
 0xc3c   :  { %v4204_v54 = vpop.eup %4203  ;;  %v3015_v45 = vadd.f32 1.0, %v4202_v42 }
 0xc3d   :  { %v3016_v1 = vadd.f32 1.0, %v4204_v54 }
 0xc3e   :  { %4205 = vrcp.f32 %v3015_v45 }
 0xc3f   :  { %4207 = vrcp.f32 %v3016_v1 }
 0xc48   :  { %v4206_v24 = vpop.eup %4205 }
 0xc49   :  { %v4208_v30 = vpop.eup %4207 }
 0xc5b   :  { %v2929_v46 = vpop.f32.mrb[48].mxu0  ;;  %v2970_v58 = vpop.f32.mrb[32].mxu1 }
 0xc5c   :  { %v2989_v38 = vrot.slane %v2929_v46, 6  ;;  %v2991_v9 = vrot.slane %v2970_v58, 6  ;;  %v2931_v4 = vpop.f32.mrb[49].mxu0  ;;  %v2972_v10 = vpop.f32.mrb[33].mxu1 }
 0xc5d   :  { %v2990_v44 = vrot.slane %v2931_v4, 6  ;;  %v2992_v47 = vrot.slane %v2972_v10, 6  ;;  %v2933_v27 = vpop.f32.mrb[50].mxu0  ;;  %v2974_v12 = vpop.f32.mrb[34].mxu1 }
 0xc5e   :  { %v3005_v14 = vadd.f32 %v6076_v60, %v2989_v38  ;;  %v3007_v16 = vadd.f32 %v6077_v15, %v2991_v9  ;;  %v2934_v18 = vpop.f32.mrb[51].mxu0  ;;  %v2975_v40 = vpop.f32.mrb[35].mxu1 }
 0xc5f   :  { %v3006_v21 = vadd.f32 %v6078_v20, %v2990_v44  ;;  %v3008_v22 = vadd.f32 %v5986_v53, %v2992_v47  ;;  %v6082_v18 = vld [vmem:[#allocation70_spill] sm:$0xff]  ;;  %v6085_v40 = vld [vmem:[#allocation73_spill] sm:$0xff] }
 0xc60   :  { %4209 = vtanh.f32 %v3005_v14  ;;  %v3899_v26 = vmul.f32 -1.442695, %v3007_v16  ;;  %v6080_v14 = vld [vmem:[#allocation68_spill] sm:$0xff]  ;;  %v6081_v16 = vld [vmem:[#allocation69_spill] sm:$0xff] }
 0xc61   :  { %4211 = vtanh.f32 %v3006_v21  ;;  %v3900_v23 = vmul.f32 -1.442695, %v3008_v22  ;;  %v6090_v21 = vld [vmem:[#allocation78_spill] sm:$0xff]  ;;  %v6091_v22 = vld [vmem:[#allocation79_spill] sm:$0xff] }
 0xc62   :  { %4213 = vpow2.f32 %v3899_v26  ;;  %v6092_v26 = vld [vmem:[#allocation80_spill] sm:$0xff] }
 0xc63   :  { %4215 = vpow2.f32 %v3900_v23  ;;  %v6093_v23 = vld [vmem:[#allocation81_spill] sm:$0xff] }
 0xc6a   :  { %v4210_v32 = vpop.eup %4209 }
 0xc6b   :  { %v4212_v31 = vpop.eup %4211  ;;  %v3055_v35 = vmul.f32 %v4210_v32, %v4206_v24  ;;  %v6094_v24 = vld [vmem:[#allocation82_spill] sm:$0xff]  ;;  %v6096_v32 = vld [vmem:[#allocation84_spill] sm:$0xff] }
 0xc6c   :  { %v4214_v36 = vpop.eup %4213  ;;  %v3056_v41 = vmul.f32 %v4212_v31, %v4208_v30  ;;  %v6095_v30 = vld [vmem:[#allocation83_spill] sm:$0xff]  ;;  %v6097_v31 = vld [vmem:[#allocation85_spill] sm:$0xff] }
 0xc6d   :  { %v4216_v42 = vpop.eup %4215  ;;  %v5543_v54 = vadd.f32 %v3055_v35, %v3053_v28  ;;  %v3041_v45 = vadd.f32 1.0, %v4214_v36  ;;  %v6098_v35 = vld [vmem:[#allocation86_spill] sm:$0xff]  ;;  %v6099_v36 = vld [vmem:[#allocation87_spill] sm:$0xff] }
 0xc6e   :  { %v5545_v1 = vadd.f32 %v3056_v41, %v3054_v29  ;;  %v3042_v46 = vadd.f32 1.0, %v4216_v42  ;;  %v6079_v29 = vld [vmem:[#allocation67_spill] sm:$0xff]  ;;  %v6100_v41 = vld [vmem:[#allocation88_spill] sm:$0xff]  ;;  %v6101_v42 = vld [vmem:[#allocation89_spill] sm:$0xff] }
 0xc6f   :  { %4217 = vtanh.f32 %v5543_v54 }
 0xc70   :  { %4219 = vrcp.f32 %v3041_v45  ;;  %v6102_v45 = vld [vmem:[#allocation90_spill] sm:$0xff] }
 0xc71   :  { %4221 = vtanh.f32 %v5545_v1 }
 0xc72   :  { %4223 = vrcp.f32 %v3042_v46  ;;  %v6103_v46 = vld [vmem:[#allocation91_spill] sm:$0xff] }
 0xc79   :  { %v4218_v58 = vpop.eup %4217 }
 0xc7a   :  { %v4220_v38 = vpop.eup %4219 }
 0xc7b   :  { %v4222_v9 = vpop.eup %4221  ;;  %v3061_v4 = vmul.f32 %v4220_v38, %v4218_v58  ;;  %v6104_v58 = vld [vmem:[#allocation92_spill] sm:$0xff]  ;;  %v6105_v38 = vld [vmem:[#allocation93_spill] sm:$0xff] }
 0xc7c   :  { %v4224_v10 = vpop.eup %4223 }
 0xc7d   :  { %v3062_v44 = vmul.f32 %v4224_v10, %v4222_v9  ;;  %v3063_v47 = vpack.c.bf16 %v3061_v4, %v3061_v4  ;;  %v6106_v9 = vld [vmem:[#allocation94_spill] sm:$0xff]  ;;  %v6107_v4 = vld [vmem:[#allocation95_spill] sm:$0xff]  ;;  %v6108_v10 = vld [vmem:[#allocation96_spill] sm:$0xff] }
 0xc7f   :  { %v3064_v27 = vpack.c.bf16 %v3062_v44, %v3062_v44  ;;  %v5549_v12 = vrot.slane %v3063_v47, 1  ;;  %v6109_v44 = vld [vmem:[#allocation97_spill] sm:$0xff]  ;;  %v6110_v47 = vld [vmem:[#allocation98_spill] sm:$0xff] }
 0xc81   :  { %v3068_v28 = vrot.slane %v3064_v27, 1  ;;  %v6111_v27 = vld [vmem:[#allocation99_spill] sm:$0xff] }
 0xc83   :  { %3103 = vmatprep.mubr.bf16.mxu0 %v3068_v28  ;;  %3144 = vmatprep.mubr.bf16.mxu1 %v3068_v28 }
 0xc84   :  { %3104 = vmatmul.mubr.bf16.vlgmr.msra.gmra.mrb[52].mxu0 %v5549_v12  ;;  %3145 = vmatmul.mubr.bf16.vlgmr.msra.gmra.mrb[36].mxu1 %v5549_v12 }
 0xc85   :  { %3154 = vmatpush1.bf16.msra.mxu0 %v5987_v0  ;;  %3195 = vmatpush1.bf16.msra.mxu1 %v5988_v5  ;;  %v6083_v0 = vld [vmem:[#allocation71_spill] sm:$0xff]  ;;  %v6084_v5 = vld [vmem:[#allocation72_spill] sm:$0xff] }
 0xc86   :  { %3185 = vmatprep.mubr.bf16.mxu0 %v3068_v28  ;;  %3226 = vmatprep.mubr.bf16.mxu1 %v3068_v28  ;;  %v6112_v28 = vld [vmem:[#allocation100_spill] sm:$0xff] }
 0xc87   :  { %3155 = vmatprep.subr.bf16.mxu0 %v5989_v62  ;;  %3196 = vmatprep.subr.bf16.mxu1 %v5990_v61  ;;  %v6086_v62 = vld [vmem:[#allocation74_spill] sm:$0xff]  ;;  %v6087_v61 = vld [vmem:[#allocation75_spill] sm:$0xff] }
 0xc89   :  { %3156 = vmatpush1.bf16.msra.mxu0 %v5991_v7  ;;  %3197 = vmatpush1.bf16.msra.mxu1 %v5992_v48  ;;  %v6088_v7 = vld [vmem:[#allocation76_spill] sm:$0xff]  ;;  %v6089_v48 = vld [vmem:[#allocation77_spill] sm:$0xff] }
 0xc8a   :  { %3157 = vmatprep.subr.bf16.mxu0 %v6079_v29  ;;  %3198 = vmatprep.subr.bf16.mxu1 %v6080_v14  ;;  %v6113_v29 = vld [vmem:[#allocation101_spill] sm:$0xff]  ;;  %v6114_v14 = vld [vmem:[#allocation103_spill] sm:$0xff] }
 0xc8d   :  { %3158 = vmatpush1.bf16.msra.mxu0 %v6081_v16  ;;  %3199 = vmatpush1.bf16.msra.mxu1 %v6082_v18  ;;  %v6115_v16 = vld [vmem:[#allocation104_spill] sm:$0xff]  ;;  %v4309_v18 = vld [vmem:[#allocation4 + $0x148] sm:$0xff] }
 0xc8e   :  { %3159 = vmatprep.subr.bf16.mxu0 %v6083_v0  ;;  %3200 = vmatprep.subr.bf16.mxu1 %v6084_v5  ;;  %v4310_v0 = vld [vmem:[#allocation4 + $0x158] sm:$0xff]  ;;  %v4311_v5 = vld [vmem:[#allocation4 + $0x140] sm:$0xff] }
 0xc91   :  { %3160 = vmatpush1.bf16.msra.mxu0 %v6085_v40  ;;  %3201 = vmatpush1.bf16.msra.mxu1 %v6086_v62  ;;  %v4312_v40 = vld [vmem:[#allocation4 + $0x150] sm:$0xff]  ;;  %v4313_v62 = vld [vmem:[#allocation4 + $0x188] sm:$0xff] }
 0xc92   :  { %3161 = vmatprep.subr.bf16.mxu0 %v6087_v61  ;;  %3202 = vmatprep.subr.bf16.mxu1 %v6088_v7  ;;  %v4314_v61 = vld [vmem:[#allocation4 + $0x198] sm:$0xff]  ;;  %v4315_v7 = vld [vmem:[#allocation4 + $0x180] sm:$0xff] }
 0xc95   :  { %3162 = vmatpush1.bf16.msra.mxu0 %v6089_v48  ;;  %3203 = vmatpush1.bf16.msra.mxu1 %v6090_v21  ;;  %v4316_v48 = vld [vmem:[#allocation4 + $0x190] sm:$0xff]  ;;  %v4317_v21 = vld [vmem:[#allocation4 + $0x1c8] sm:$0xff] }
 0xc96   :  { %3163 = vmatprep.subr.bf16.mxu0 %v6091_v22  ;;  %3204 = vmatprep.subr.bf16.mxu1 %v6092_v26  ;;  %v4318_v22 = vld [vmem:[#allocation4 + $0x1d8] sm:$0xff]  ;;  %v4319_v26 = vld [vmem:[#allocation4 + $0x1c0] sm:$0xff] }
 0xc99   :  { %3164 = vmatpush1.bf16.msra.mxu0 %v6093_v23  ;;  %3205 = vmatpush1.bf16.msra.mxu1 %v6094_v24  ;;  %v4320_v23 = vld [vmem:[#allocation4 + $0x1d0] sm:$0xff]  ;;  %v4321_v24 = vld [vmem:[#allocation4 + $0x208] sm:$0xff] }
 0xc9a   :  { %3165 = vmatprep.subr.bf16.mxu0 %v6095_v30  ;;  %3206 = vmatprep.subr.bf16.mxu1 %v6096_v32  ;;  %v4322_v30 = vld [vmem:[#allocation4 + $0x218] sm:$0xff]  ;;  %v4323_v32 = vld [vmem:[#allocation4 + $0x200] sm:$0xff] }
 0xc9d   :  { %3166 = vmatpush1.bf16.msra.mxu0 %v6097_v31  ;;  %3207 = vmatpush1.bf16.msra.mxu1 %v6098_v35  ;;  %v4324_v31 = vld [vmem:[#allocation4 + $0x210] sm:$0xff]  ;;  %v4325_v35 = vld [vmem:[#allocation4 + $0x248] sm:$0xff] }
 0xc9e   :  { %3167 = vmatprep.subr.bf16.mxu0 %v6099_v36  ;;  %3208 = vmatprep.subr.bf16.mxu1 %v6100_v41  ;;  %v4326_v36 = vld [vmem:[#allocation4 + $0x258] sm:$0xff]  ;;  %v4327_v41 = vld [vmem:[#allocation4 + $0x240] sm:$0xff] }
 0xca1   :  { %3168 = vmatpush1.bf16.msra.mxu0 %v6101_v42  ;;  %3209 = vmatpush1.bf16.msra.mxu1 %v6102_v45  ;;  %v4328_v42 = vld [vmem:[#allocation4 + $0x250] sm:$0xff]  ;;  %v4329_v45 = vld [vmem:[#allocation4 + $0x288] sm:$0xff] }
 0xca2   :  { %3169 = vmatprep.subr.bf16.mxu0 %v6103_v46  ;;  %3210 = vmatprep.subr.bf16.mxu1 %v6104_v58  ;;  %v4330_v46 = vld [vmem:[#allocation4 + $0x298] sm:$0xff]  ;;  %v4331_v58 = vld [vmem:[#allocation4 + $0x280] sm:$0xff] }
 0xca5   :  { %3170 = vmatpush1.bf16.msra.mxu0 %v6105_v38  ;;  %3211 = vmatpush1.bf16.msra.mxu1 %v6106_v9  ;;  %v4332_v38 = vld [vmem:[#allocation4 + $0x290] sm:$0xff]  ;;  %v4333_v9 = vld [vmem:[#allocation4 + $0x2c8] sm:$0xff] }
 0xca6   :  { %3171 = vmatprep.subr.bf16.mxu0 %v6107_v4  ;;  %3212 = vmatprep.subr.bf16.mxu1 %v6108_v10  ;;  %v4334_v4 = vld [vmem:[#allocation4 + $0x2d8] sm:$0xff]  ;;  %v4335_v10 = vld [vmem:[#allocation4 + $0x2c0] sm:$0xff] }
 0xca9   :  { %3172 = vmatpush1.bf16.msra.mxu0 %v6109_v44  ;;  %3213 = vmatpush1.bf16.msra.mxu1 %v6110_v47  ;;  %v4336_v44 = vld [vmem:[#allocation4 + $0x2d0] sm:$0xff]  ;;  %v4337_v47 = vld [vmem:[#allocation4 + $0x308] sm:$0xff] }
 0xcaa   :  { %3173 = vmatprep.subr.bf16.mxu0 %v6111_v27  ;;  %3214 = vmatprep.subr.bf16.mxu1 %v6112_v28  ;;  %v4338_v27 = vld [vmem:[#allocation4 + $0x318] sm:$0xff]  ;;  %v4339_v28 = vld [vmem:[#allocation4 + $0x300] sm:$0xff] }
 0xcad   :  { %3174 = vmatpush1.bf16.msra.mxu0 %v6113_v29  ;;  %3215 = vmatpush1.bf16.msra.mxu1 %v6028_v50  ;;  %v4299_v50 = vld [vmem:[#allocation4 + $0x80] sm:$0xff]  ;;  %v4340_v29 = vld [vmem:[#allocation4 + $0x310] sm:$0xff] }
 0xcae   :  { %3175 = vmatprep.subr.bf16.mxu0 %v6114_v14  ;;  %3216 = vmatprep.subr.bf16.mxu1 %v6115_v16  ;;  %v4341_v14 = vld [vmem:[#allocation4 + $0x348] sm:$0xff]  ;;  %v4342_v16 = vld [vmem:[#allocation4 + $0x358] sm:$0xff] }
 0xcb1   :  { %3176 = vmatpush1.bf16.msra.mxu0 %v6031_v43  ;;  %3217 = vmatpush1.bf16.msra.mxu1 %v6032_v37  ;;  %v4302_v43 = vld [vmem:[#allocation4 + $0xd8] sm:$0xff]  ;;  %v4303_v37 = vld [vmem:[#allocation4 + $0xc0] sm:$0xff] }
 0xcb2   :  { %3177 = vmatprep.subr.bf16.mxu0 %v6033_v39  ;;  %3218 = vmatprep.subr.bf16.mxu1 %v6034_v25  ;;  %v4304_v39 = vld [vmem:[#allocation4 + $0xd0] sm:$0xff]  ;;  %v4305_v25 = vld [vmem:[#allocation4 + $0x108] sm:$0xff] }
 0xcb5   :  { %3178 = vmatpush1.bf16.msra.mxu0 %v6035_v6  ;;  %3219 = vmatpush1.bf16.msra.mxu1 %v6036_v55  ;;  %v4306_v6 = vld [vmem:[#allocation4 + $0x118] sm:$0xff]  ;;  %v4307_v55 = vld [vmem:[#allocation4 + $0x100] sm:$0xff] }
 0xcb6   :  { %3179 = vmatprep.subr.bf16.mxu0 %v6037_v56  ;;  %3220 = vmatprep.subr.bf16.mxu1 %v6038_v63  ;;  %v4289_v56 = vld [vmem:[#allocation4 + $0x8] sm:$0xff]  ;;  %v4298_v63 = vld [vmem:[#allocation4 + $0x98] sm:$0xff] }
 0xcb9   :  { %3180 = vmatpush1.bf16.msra.mxu0 %v5287_v17  ;;  %3221 = vmatpush1.bf16.msra.mxu1 %v6039_v51  ;;  %v4290_v17 = vld [vmem:[#allocation4 + $0x18] sm:$0xff]  ;;  %v4300_v51 = vld [vmem:[#allocation4 + $0x90] sm:$0xff] }
 0xcba   :  { %3181 = vmatprep.subr.bf16.mxu0 %v6040_v8  ;;  %3222 = vmatprep.subr.bf16.mxu1 %v5293_v3  ;;  %v4291_v3 = vld [vmem:[#allocation4] sm:$0xff]  ;;  %v4301_v8 = vld [vmem:[#allocation4 + $0xc8] sm:$0xff] }
 0xcbd   :  { %3182 = vmatpush1.bf16.msra.mxu0 %v5299_v59  ;;  %3223 = vmatpush1.bf16.msra.mxu1 %v5301_v2  ;;  %v4292_v59 = vld [vmem:[#allocation4 + $0x10] sm:$0xff]  ;;  %v4293_v2 = vld [vmem:[#allocation4 + $0x48] sm:$0xff] }
 0xcbe   :  { %3183 = vmatprep.subr.bf16.mxu0 %v5303_v49  ;;  %3224 = vmatprep.subr.bf16.mxu1 %v5305_v19  ;;  %v4294_v49 = vld [vmem:[#allocation4 + $0x58] sm:$0xff]  ;;  %v4295_v19 = vld [vmem:[#allocation4 + $0x40] sm:$0xff] }
 0xcc1   :  { %3184 = vmatpush1.bf16.msra.mxu0 %v5311_v57  ;;  %3225 = vmatpush1.bf16.msra.mxu1 %v5313_v52  ;;  %v4296_v57 = vld [vmem:[#allocation4 + $0x50] sm:$0xff]  ;;  %v4297_v52 = vld [vmem:[#allocation4 + $0x88] sm:$0xff] }
 0xcc2   :  { %3329 = vmatprep.subr.bf16.mxu0 %v4289_v56  ;;  %3370 = vmatprep.subr.bf16.mxu1 %v4290_v17  ;;  %v4343_v56 = vld [vmem:[#allocation4 + $0x340] sm:$0xff]  ;;  %v4344_v17 = vld [vmem:[#allocation4 + $0x350] sm:$0xff] }
 0xcc4   :  { %3186 = vmatmul.mubr.bf16.vlgmr.msra.gmra.mrb[56].mxu0 %v5549_v12  ;;  %3227 = vmatmul.mubr.bf16.vlgmr.msra.gmra.mrb[40].mxu1 %v5549_v12  ;;  %v4308_v12 = vld [vmem:[#allocation4 + $0x110] sm:$0xff] }
 0xcc5   :  { %3330 = vmatpush1.bf16.msra.mxu0 %v4291_v3  ;;  %3371 = vmatpush1.bf16.msra.mxu1 %v4292_v59  ;;  %v4345_v3 = vld [vmem:[#allocation4 + $0x388] sm:$0xff]  ;;  %v4346_v59 = vld [vmem:[#allocation4 + $0x398] sm:$0xff] }
 0xcc6   :  { %3331 = vmatprep.subr.bf16.mxu0 %v4293_v2  ;;  %3372 = vmatprep.subr.bf16.mxu1 %v4294_v49  ;;  %v4347_v2 = vld [vmem:[#allocation4 + $0x380] sm:$0xff]  ;;  %v4348_v49 = vld [vmem:[#allocation4 + $0x390] sm:$0xff] }
 0xcc9   :  { %3332 = vmatpush1.bf16.msra.mxu0 %v4295_v19  ;;  %3373 = vmatpush1.bf16.msra.mxu1 %v4296_v57  ;;  %v4349_v19 = vld [vmem:[#allocation4 + $0x3c8] sm:$0xff]  ;;  %v4350_v57 = vld [vmem:[#allocation4 + $0x3d8] sm:$0xff] }
 0xcca   :  { %3333 = vmatprep.subr.bf16.mxu0 %v4297_v52  ;;  %3374 = vmatprep.subr.bf16.mxu1 %v4298_v63  ;;  %v4351_v52 = vld [vmem:[#allocation4 + $0x3c0] sm:$0xff]  ;;  %v4352_v63 = vld [vmem:[#allocation4 + $0x3d0] sm:$0xff] }
 0xccd   :  { %3334 = vmatpush1.bf16.msra.mxu0 %v4299_v50  ;;  %3375 = vmatpush1.bf16.msra.mxu1 %v4300_v51  ;;  %v4353_v50 = vld [vmem:[#allocation4 + $0x28] sm:$0xff]  ;;  %v4354_v51 = vld [vmem:[#allocation4 + $0x38] sm:$0xff] }
 0xcce   :  { %3335 = vmatprep.subr.bf16.mxu0 %v4301_v8  ;;  %3376 = vmatprep.subr.bf16.mxu1 %v4302_v43 }
 0xcd1   :  { %3336 = vmatpush1.bf16.msra.mxu0 %v4303_v37  ;;  %3377 = vmatpush1.bf16.msra.mxu1 %v4304_v39 }
 0xcd2   :  { %3337 = vmatprep.subr.bf16.mxu0 %v4305_v25  ;;  %3378 = vmatprep.subr.bf16.mxu1 %v4306_v6 }
 0xcd5   :  { %3338 = vmatpush1.bf16.msra.mxu0 %v4307_v55  ;;  %3379 = vmatpush1.bf16.msra.mxu1 %v4308_v12 }
 0xcd6   :  { %3339 = vmatprep.subr.bf16.mxu0 %v4309_v18  ;;  %3380 = vmatprep.subr.bf16.mxu1 %v4310_v0 }
 0xcd9   :  { %3340 = vmatpush1.bf16.msra.mxu0 %v4311_v5  ;;  %3381 = vmatpush1.bf16.msra.mxu1 %v4312_v40 }
 0xcda   :  { %3341 = vmatprep.subr.bf16.mxu0 %v4313_v62  ;;  %3382 = vmatprep.subr.bf16.mxu1 %v4314_v61 }
 0xcdd   :  { %3342 = vmatpush1.bf16.msra.mxu0 %v4315_v7  ;;  %3383 = vmatpush1.bf16.msra.mxu1 %v4316_v48 }
 0xcde   :  { %3343 = vmatprep.subr.bf16.mxu0 %v4317_v21  ;;  %3384 = vmatprep.subr.bf16.mxu1 %v4318_v22 }
 0xce1   :  { %3344 = vmatpush1.bf16.msra.mxu0 %v4319_v26  ;;  %3385 = vmatpush1.bf16.msra.mxu1 %v4320_v23  ;;  %v3307_v26 = vrot.slane %v5543_v54, 6 }
 0xce2   :  { %3345 = vmatprep.subr.bf16.mxu0 %v4321_v24  ;;  %3386 = vmatprep.subr.bf16.mxu1 %v4322_v30  ;;  %v3308_v24 = vrot.slane %v5545_v1, 6 }
 0xce5   :  { %3346 = vmatpush1.bf16.msra.mxu0 %v4323_v32  ;;  %3387 = vmatpush1.bf16.msra.mxu1 %v4324_v31 }
 0xce6   :  { %3347 = vmatprep.subr.bf16.mxu0 %v4325_v35  ;;  %3388 = vmatprep.subr.bf16.mxu1 %v4326_v36 }
 0xce9   :  { %3348 = vmatpush1.bf16.msra.mxu0 %v4327_v41  ;;  %3389 = vmatpush1.bf16.msra.mxu1 %v4328_v42 }
 0xcea   :  { %3349 = vmatprep.subr.bf16.mxu0 %v4329_v45  ;;  %3390 = vmatprep.subr.bf16.mxu1 %v4330_v46 }
 0xced   :  { %3350 = vmatpush1.bf16.msra.mxu0 %v4331_v58  ;;  %3391 = vmatpush1.bf16.msra.mxu1 %v4332_v38 }
 0xcee   :  { %3351 = vmatprep.subr.bf16.mxu0 %v4333_v9  ;;  %3392 = vmatprep.subr.bf16.mxu1 %v4334_v4 }
 0xcf1   :  { %3352 = vmatpush1.bf16.msra.mxu0 %v4335_v10  ;;  %3393 = vmatpush1.bf16.msra.mxu1 %v4336_v44 }
 0xcf2   :  { %3353 = vmatprep.subr.bf16.mxu0 %v4337_v47  ;;  %3394 = vmatprep.subr.bf16.mxu1 %v4338_v27 }
 0xcf5   :  { %3354 = vmatpush1.bf16.msra.mxu0 %v4339_v28  ;;  %3395 = vmatpush1.bf16.msra.mxu1 %v4340_v29 }
 0xcf6   :  { %3355 = vmatprep.subr.bf16.mxu0 %v4341_v14  ;;  %3396 = vmatprep.subr.bf16.mxu1 %v4342_v16 }
 0xcf9   :  { %3356 = vmatpush1.bf16.msra.mxu0 %v4343_v56  ;;  %3397 = vmatpush1.bf16.msra.mxu1 %v4344_v17 }
 0xcfa   :  { %3357 = vmatprep.subr.bf16.mxu0 %v4345_v3  ;;  %3398 = vmatprep.subr.bf16.mxu1 %v4346_v59 }
 0xcfd   :  { %3358 = vmatpush1.bf16.msra.mxu0 %v4347_v2  ;;  %3399 = vmatpush1.bf16.msra.mxu1 %v4348_v49 }
 0xcfe   :  { %3359 = vmatprep.subr.bf16.mxu0 %v4349_v19  ;;  %3400 = vmatprep.subr.bf16.mxu1 %v4350_v57 }
 0xd01   :  { %3360 = vmatpush1.bf16.msra.mxu0 %v4351_v52  ;;  %3401 = vmatpush1.bf16.msra.mxu1 %v4352_v63 }
 0xd02   :  { %3411 = vmatprep.subr.bf16.mxu0 %v4353_v50  ;;  %3452 = vmatprep.subr.bf16.mxu1 %v4354_v51 }
 0xd57   :  { %v3105_v8 = vpop.f32.mrb[52].mxu0  ;;  %v3146_v43 = vpop.f32.mrb[36].mxu1 }
 0xd58   :  { %v3245_v37 = vrot.slane %v3146_v43, 4  ;;  %v3107_v39 = vpop.f32.mrb[53].mxu0  ;;  %v3148_v25 = vpop.f32.mrb[37].mxu1  ;;  %v3243_v35 = vrot.slane %v3105_v8, 4 }
 0xd59   :  { %v3246_v6 = vrot.slane %v3148_v25, 4  ;;  %v3109_v55 = vpop.f32.mrb[54].mxu0  ;;  %v3150_v12 = vpop.f32.mrb[38].mxu1  ;;  %v3244_v36 = vrot.slane %v3107_v39, 4 }
 0xd5a   :  { %v3261_v18 = vadd.f32 %v6072_v11, %v3245_v37  ;;  %v3110_v0 = vpop.f32.mrb[55].mxu0  ;;  %v3151_v5 = vpop.f32.mrb[39].mxu1  ;;  %v3259_v41 = vadd.f32 %v6074_v33, %v3243_v35  ;;  %v4361_v35 = vld [vmem:[#allocation4 + $0xa8] sm:$0xff] }
 0xd5b   :  { %v3262_v40 = vadd.f32 %v6073_v13, %v3246_v6  ;;  %v3260_v42 = vadd.f32 %v6075_v34, %v3244_v36  ;;  %v4362_v36 = vld [vmem:[#allocation4 + $0xb8] sm:$0xff] }
 0xd5c   :  { %v3903_v62 = vmul.f32 -1.442695, %v3261_v18  ;;  %v3901_v45 = vmul.f32 -1.442695, %v3259_v41  ;;  %v4363_v41 = vld [vmem:[#allocation4 + $0xa0] sm:$0xff] }
 0xd5d   :  { %v3904_v61 = vmul.f32 -1.442695, %v3262_v40  ;;  %v3902_v46 = vmul.f32 -1.442695, %v3260_v42  ;;  %v4364_v42 = vld [vmem:[#allocation4 + $0xb0] sm:$0xff] }
 0xd5e   :  { %4225 = vpow2.f32 %v3903_v62 }
 0xd5f   :  { %4227 = vpow2.f32 %v3904_v61 }
 0xd68   :  { %v4226_v7 = vpop.eup %4225 }
 0xd69   :  { %v3285_v48 = vadd.f32 1.0, %v4226_v7  ;;  %v4228_v21 = vpop.eup %4227 }
 0xd6a   :  { %v3286_v22 = vadd.f32 1.0, %v4228_v21 }
 0xd6b   :  { %4229 = vrcp.f32 %v3285_v48 }
 0xd6c   :  { %4231 = vrcp.f32 %v3286_v22 }
 0xd6d   :  { %4233 = vpow2.f32 %v3901_v45  ;;  %v4365_v45 = vld [vmem:[#allocation4 + $0xe8] sm:$0xff] }
 0xd6e   :  { %4235 = vpow2.f32 %v3902_v46  ;;  %v4366_v46 = vld [vmem:[#allocation4 + $0xf8] sm:$0xff] }
 0xd75   :  { %v4230_v23 = vpop.eup %4229 }
 0xd76   :  { %v3311_v30 = vmul.f32 %v4230_v23, %v3307_v26  ;;  %v4232_v32 = vpop.eup %4231  ;;  %v4355_v26 = vld [vmem:[#allocation4 + $0x20] sm:$0xff]  ;;  %v4356_v23 = vld [vmem:[#allocation4 + $0x30] sm:$0xff] }
 0xd77   :  { %v3312_v31 = vmul.f32 %v4232_v32, %v3308_v24  ;;  %v4234_v58 = vpop.eup %4233  ;;  %v4357_v24 = vld [vmem:[#allocation4 + $0x68] sm:$0xff]  ;;  %v4359_v32 = vld [vmem:[#allocation4 + $0x60] sm:$0xff] }
 0xd78   :  { %v4236_v38 = vpop.eup %4235  ;;  %v3273_v9 = vadd.f32 1.0, %v4234_v58  ;;  %v4367_v58 = vld [vmem:[#allocation4 + $0xe0] sm:$0xff] }
 0xd79   :  { %v3274_v54 = vadd.f32 1.0, %v4236_v38  ;;  %v4368_v38 = vld [vmem:[#allocation4 + $0xf0] sm:$0xff] }
 0xd7a   :  { %4237 = vrcp.f32 %v3273_v9  ;;  %v4369_v9 = vld [vmem:[#allocation4 + $0x128] sm:$0xff] }
 0xd7b   :  { %4239 = vrcp.f32 %v3274_v54  ;;  %v4370_v54 = vld [vmem:[#allocation4 + $0x138] sm:$0xff] }
 0xd84   :  { %v4238_v52 = vpop.eup %4237 }
 0xd85   :  { %v4240_v63 = vpop.eup %4239 }
 0xd97   :  { %v3187_v4 = vpop.f32.mrb[56].mxu0  ;;  %v3228_v10 = vpop.f32.mrb[40].mxu1 }
 0xd98   :  { %v3247_v1 = vrot.slane %v3187_v4, 4  ;;  %v3249_v44 = vrot.slane %v3228_v10, 4  ;;  %v3189_v47 = vpop.f32.mrb[57].mxu0  ;;  %v3230_v27 = vpop.f32.mrb[41].mxu1  ;;  %v4371_v4 = vld [vmem:[#allocation4 + $0x120] sm:$0xff]  ;;  %v4372_v10 = vld [vmem:[#allocation4 + $0x130] sm:$0xff] }
 0xd99   :  { %v3248_v28 = vrot.slane %v3189_v47, 4  ;;  %v3250_v29 = vrot.slane %v3230_v27, 4  ;;  %v3191_v14 = vpop.f32.mrb[58].mxu0  ;;  %v3232_v16 = vpop.f32.mrb[42].mxu1  ;;  %v4375_v47 = vld [vmem:[#allocation4 + $0x160] sm:$0xff]  ;;  %v4376_v27 = vld [vmem:[#allocation4 + $0x170] sm:$0xff] }
 0xd9a   :  { %v3263_v56 = vadd.f32 %v6076_v60, %v3247_v1  ;;  %v3265_v17 = vadd.f32 %v6077_v15, %v3249_v44  ;;  %v3192_v3 = vpop.f32.mrb[59].mxu0  ;;  %v3233_v59 = vpop.f32.mrb[43].mxu1  ;;  %v4373_v1 = vld [vmem:[#allocation4 + $0x168] sm:$0xff]  ;;  %v4374_v44 = vld [vmem:[#allocation4 + $0x178] sm:$0xff]  ;;  %v4379_v14 = vld [vmem:[#allocation4 + $0x1a0] sm:$0xff] }
 0xd9b   :  { %v3264_v2 = vadd.f32 %v6078_v20, %v3248_v28  ;;  %v3266_v49 = vadd.f32 %v5986_v53, %v3250_v29  ;;  %v4377_v28 = vld [vmem:[#allocation4 + $0x1a8] sm:$0xff]  ;;  %v4378_v29 = vld [vmem:[#allocation4 + $0x1b8] sm:$0xff]  ;;  %v4380_v16 = vld [vmem:[#allocation4 + $0x1b0] sm:$0xff] }
 0xd9c   :  { %4241 = vtanh.f32 %v3263_v56  ;;  %v3905_v19 = vmul.f32 -1.442695, %v3265_v17  ;;  %v4381_v56 = vld [vmem:[#allocation4 + $0x1e8] sm:$0xff]  ;;  %v4382_v17 = vld [vmem:[#allocation4 + $0x1f8] sm:$0xff]  ;;  %v4383_v3 = vld [vmem:[#allocation4 + $0x1e0] sm:$0xff] }
 0xd9d   :  { %4243 = vtanh.f32 %v3264_v2  ;;  %v3906_v57 = vmul.f32 -1.442695, %v3266_v49  ;;  %v4384_v59 = vld [vmem:[#allocation4 + $0x1f0] sm:$0xff]  ;;  %v4385_v2 = vld [vmem:[#allocation4 + $0x228] sm:$0xff]  ;;  %v4386_v49 = vld [vmem:[#allocation4 + $0x238] sm:$0xff] }
 0xd9e   :  { %4245 = vpow2.f32 %v3905_v19  ;;  %v4387_v19 = vld [vmem:[#allocation4 + $0x220] sm:$0xff] }
 0xd9f   :  { %4247 = vpow2.f32 %v3906_v57  ;;  %v4388_v57 = vld [vmem:[#allocation4 + $0x230] sm:$0xff] }
 0xda6   :  { %v4242_v50 = vpop.eup %4241 }
 0xda7   :  { %v4244_v51 = vpop.eup %4243  ;;  %v3313_v8 = vmul.f32 %v4242_v50, %v4238_v52  ;;  %v4389_v52 = vld [vmem:[#allocation4 + $0x268] sm:$0xff]  ;;  %v4391_v50 = vld [vmem:[#allocation4 + $0x260] sm:$0xff] }
 0xda8   :  { %v4246_v43 = vpop.eup %4245  ;;  %v3314_v37 = vmul.f32 %v4244_v51, %v4240_v63  ;;  %v4390_v63 = vld [vmem:[#allocation4 + $0x278] sm:$0xff]  ;;  %v4392_v51 = vld [vmem:[#allocation4 + $0x270] sm:$0xff] }
 0xda9   :  { %v4248_v39 = vpop.eup %4247  ;;  %v5627_v25 = vadd.f32 %v3313_v8, %v3311_v30  ;;  %v3299_v6 = vadd.f32 1.0, %v4246_v43  ;;  %v4358_v30 = vld [vmem:[#allocation4 + $0x78] sm:$0xff]  ;;  %v4393_v8 = vld [vmem:[#allocation4 + $0x2a8] sm:$0xff] }
 0xdaa   :  { %v5629_v55 = vadd.f32 %v3314_v37, %v3312_v31  ;;  %v3300_v12 = vadd.f32 1.0, %v4248_v39  ;;  %v4360_v31 = vld [vmem:[#allocation4 + $0x70] sm:$0xff]  ;;  %v4394_v43 = vld [vmem:[#allocation4 + $0x2b8] sm:$0xff]  ;;  %v4395_v37 = vld [vmem:[#allocation4 + $0x2a0] sm:$0xff] }
 0xdab   :  { %4249 = vtanh.f32 %v5627_v25  ;;  %v4396_v39 = vld [vmem:[#allocation4 + $0x2b0] sm:$0xff] }
 0xdac   :  { %4251 = vrcp.f32 %v3299_v6  ;;  %v4397_v6 = vld [vmem:[#allocation4 + $0x2e8] sm:$0xff] }
 0xdad   :  { %4253 = vtanh.f32 %v5629_v55 }
 0xdae   :  { %4255 = vrcp.f32 %v3300_v12  ;;  %v4398_v12 = vld [vmem:[#allocation4 + $0x2f8] sm:$0xff] }
 0xdb5   :  { %v4250_v18 = vpop.eup %4249 }
 0xdb6   :  { %v4252_v0 = vpop.eup %4251 }
 0xdb7   :  { %v4254_v5 = vpop.eup %4253  ;;  %v3319_v40 = vmul.f32 %v4252_v0, %v4250_v18  ;;  %v4399_v18 = vld [vmem:[#allocation4 + $0x2e0] sm:$0xff]  ;;  %v4400_v0 = vld [vmem:[#allocation4 + $0x2f0] sm:$0xff] }
 0xdb8   :  { %v4256_v62 = vpop.eup %4255 }
 0xdb9   :  { %v3320_v61 = vmul.f32 %v4256_v62, %v4254_v5  ;;  %v3321_v7 = vpack.c.bf16 %v3319_v40, %v3319_v40  ;;  %v4401_v5 = vld [vmem:[#allocation4 + $0x328] sm:$0xff]  ;;  %v4402_v40 = vld [vmem:[#allocation4 + $0x338] sm:$0xff]  ;;  %v4403_v62 = vld [vmem:[#allocation4 + $0x320] sm:$0xff] }
 0xdbb   :  { %v3322_v48 = vpack.c.bf16 %v3320_v61, %v3320_v61  ;;  %v5633_v22 = vrot.slane %v3321_v7, 2  ;;  %v4404_v61 = vld [vmem:[#allocation4 + $0x330] sm:$0xff]  ;;  %v4405_v7 = vld [vmem:[#allocation4 + $0x368] sm:$0xff] }
 0xdbd   :  { %v3326_v21 = vrot.slane %v3322_v48, 2  ;;  %v4406_v48 = vld [vmem:[#allocation4 + $0x378] sm:$0xff] }
 0xdbf   :  { %3361 = vmatprep.mubr.bf16.mxu0 %v3326_v21  ;;  %3402 = vmatprep.mubr.bf16.mxu1 %v3326_v21 }
 0xdc0   :  { %3362 = vmatmul.mubr.bf16.vlgmr.msra.gmra.mrb[60].mxu0 %v5633_v22  ;;  %3403 = vmatmul.mubr.bf16.vlgmr.msra.gmra.mrb[44].mxu1 %v5633_v22 }
 0xdc1   :  { %3412 = vmatpush1.bf16.msra.mxu0 %v4355_v26  ;;  %3453 = vmatpush1.bf16.msra.mxu1 %v4356_v23  ;;  %v4408_v26 = vld [vmem:[#allocation4 + $0x370] sm:$0xff]  ;;  %v4409_v23 = vld [vmem:[#allocation4 + $0x3a8] sm:$0xff] }
 0xdc2   :  { %3443 = vmatprep.mubr.bf16.mxu0 %v3326_v21  ;;  %3484 = vmatprep.mubr.bf16.mxu1 %v3326_v21  ;;  %v4407_v21 = vld [vmem:[#allocation4 + $0x360] sm:$0xff] }
 0xdc3   :  { %3413 = vmatprep.subr.bf16.mxu0 %v4357_v24  ;;  %3454 = vmatprep.subr.bf16.mxu1 %v4358_v30  ;;  %v4410_v24 = vld [vmem:[#allocation4 + $0x3b8] sm:$0xff]  ;;  %v4411_v30 = vld [vmem:[#allocation4 + $0x3a0] sm:$0xff] }
 0xdc5   :  { %3414 = vmatpush1.bf16.msra.mxu0 %v4359_v32  ;;  %3455 = vmatpush1.bf16.msra.mxu1 %v4360_v31  ;;  %v4412_v32 = vld [vmem:[#allocation4 + $0x3b0] sm:$0xff]  ;;  %v4413_v31 = vld [vmem:[#allocation4 + $0x3e8] sm:$0xff] }
 0xdc6   :  { %3415 = vmatprep.subr.bf16.mxu0 %v4361_v35  ;;  %3456 = vmatprep.subr.bf16.mxu1 %v4362_v36  ;;  %v4414_v35 = vld [vmem:[#allocation4 + $0x3f8] sm:$0xff]  ;;  %v4415_v36 = vld [vmem:[#allocation4 + $0x3e0] sm:$0xff] }
 0xdc9   :  { %3416 = vmatpush1.bf16.msra.mxu0 %v4363_v41  ;;  %3457 = vmatpush1.bf16.msra.mxu1 %v4364_v42  ;;  %v4416_v41 = vld [vmem:[#allocation4 + $0x3f0] sm:$0xff]  ;;  %v4145_v42 = vld [vmem:[%s5703_s3 + $0x40] sm:$0xff]  }
 0xdca   :  { %3417 = vmatprep.subr.bf16.mxu0 %v4365_v45  ;;  %3458 = vmatprep.subr.bf16.mxu1 %v4366_v46  ;;  %v4146_v45 = vld [vmem:[%s5703_s3] sm:$0xff]   ;;  %v4147_v46 = vld [vmem:[%s5703_s3 + $0x48] sm:$0xff]  }
 0xdcd   :  { %3418 = vmatpush1.bf16.msra.mxu0 %v4367_v58  ;;  %3459 = vmatpush1.bf16.msra.mxu1 %v4368_v38  ;;  %v4148_v58 = vld [vmem:[%s5703_s3 + $0x8] sm:$0xff]   ;;  %v4150_v38 = vld [vmem:[%s5703_s3 + $0x10] sm:$0xff]  }
 0xdce   :  { %3419 = vmatprep.subr.bf16.mxu0 %v4369_v9  ;;  %3460 = vmatprep.subr.bf16.mxu1 %v4370_v54  ;;  %v4151_v9 = vld [vmem:[%s5703_s3 + $0x58] sm:$0xff]  }
 0xdcf   :  { %v4152_v54 = vld [vmem:[%s5703_s3 + $0x18] sm:$0xff]  }
 0xdd1   :  { %3420 = vmatpush1.bf16.msra.mxu0 %v4371_v4  ;;  %3461 = vmatpush1.bf16.msra.mxu1 %v4372_v10  ;;  %v4153_v4 = vld [vmem:[%s5703_s3 + $0x60] sm:$0xff]  }
 0xdd2   :  { %3421 = vmatprep.subr.bf16.mxu0 %v4373_v1  ;;  %3462 = vmatprep.subr.bf16.mxu1 %v4374_v44  ;;  %v4154_v10 = vld [vmem:[%s5703_s3 + $0x20] sm:$0xff]   ;;  %v4155_v1 = vld [vmem:[%s5703_s3 + $0x68] sm:$0xff]  }
 0xdd3   :  { %v4156_v44 = vld [vmem:[%s5703_s3 + $0x28] sm:$0xff]  }
 0xdd5   :  { %3422 = vmatpush1.bf16.msra.mxu0 %v4375_v47  ;;  %3463 = vmatpush1.bf16.msra.mxu1 %v4376_v27  ;;  %v4157_v47 = vld [vmem:[%s5703_s3 + $0x70] sm:$0xff]  }
 0xdd6   :  { %3423 = vmatprep.subr.bf16.mxu0 %v4377_v28  ;;  %3464 = vmatprep.subr.bf16.mxu1 %v4378_v29  ;;  %v4158_v27 = vld [vmem:[%s5703_s3 + $0x30] sm:$0xff]   ;;  %v4159_v28 = vld [vmem:[%s5703_s3 + $0x78] sm:$0xff]  }
 0xdd7   :  { %v4160_v29 = vld [vmem:[%s5703_s3 + $0x38] sm:$0xff]  }
 0xdd9   :  { %3424 = vmatpush1.bf16.msra.mxu0 %v4379_v14  ;;  %3465 = vmatpush1.bf16.msra.mxu1 %v4380_v16 }
 0xdda   :  { %3425 = vmatprep.subr.bf16.mxu0 %v4381_v56  ;;  %3466 = vmatprep.subr.bf16.mxu1 %v4382_v17 }
 0xddd   :  { %3426 = vmatpush1.bf16.msra.mxu0 %v4383_v3  ;;  %3467 = vmatpush1.bf16.msra.mxu1 %v4384_v59 }
 0xdde   :  { %3427 = vmatprep.subr.bf16.mxu0 %v4385_v2  ;;  %3468 = vmatprep.subr.bf16.mxu1 %v4386_v49 }
 0xde1   :  { %3428 = vmatpush1.bf16.msra.mxu0 %v4387_v19  ;;  %3469 = vmatpush1.bf16.msra.mxu1 %v4388_v57 }
 0xde2   :  { %3429 = vmatprep.subr.bf16.mxu0 %v4389_v52  ;;  %3470 = vmatprep.subr.bf16.mxu1 %v4390_v63 }
 0xde5   :  { %3430 = vmatpush1.bf16.msra.mxu0 %v4391_v50  ;;  %3471 = vmatpush1.bf16.msra.mxu1 %v4392_v51 }
 0xde6   :  { %3431 = vmatprep.subr.bf16.mxu0 %v4393_v8  ;;  %3472 = vmatprep.subr.bf16.mxu1 %v4394_v43 }
 0xde9   :  { %3432 = vmatpush1.bf16.msra.mxu0 %v4395_v37  ;;  %3473 = vmatpush1.bf16.msra.mxu1 %v4396_v39 }
 0xdea   :  { %3433 = vmatprep.subr.bf16.mxu0 %v4397_v6  ;;  %3474 = vmatprep.subr.bf16.mxu1 %v4398_v12  ;;  %v3565_v6 = vrot.slane %v5627_v25, 6 }
 0xded   :  { %3434 = vmatpush1.bf16.msra.mxu0 %v4399_v18  ;;  %3475 = vmatpush1.bf16.msra.mxu1 %v4400_v0  ;;  %v3566_v18 = vrot.slane %v5629_v55, 6 }
 0xdee   :  { %3435 = vmatprep.subr.bf16.mxu0 %v4401_v5  ;;  %3476 = vmatprep.subr.bf16.mxu1 %v4402_v40 }
 0xdf1   :  { %3436 = vmatpush1.bf16.msra.mxu0 %v4403_v62  ;;  %3477 = vmatpush1.bf16.msra.mxu1 %v4404_v61 }
 0xdf2   :  { %3437 = vmatprep.subr.bf16.mxu0 %v4405_v7  ;;  %3478 = vmatprep.subr.bf16.mxu1 %v4406_v48 }
 0xdf5   :  { %3438 = vmatpush1.bf16.msra.mxu0 %v4407_v21  ;;  %3479 = vmatpush1.bf16.msra.mxu1 %v4408_v26 }
 0xdf6   :  { %3439 = vmatprep.subr.bf16.mxu0 %v4409_v23  ;;  %3480 = vmatprep.subr.bf16.mxu1 %v4410_v24 }
 0xdf9   :  { %3440 = vmatpush1.bf16.msra.mxu0 %v4411_v30  ;;  %3481 = vmatpush1.bf16.msra.mxu1 %v4412_v32 }
 0xdfa   :  { %3441 = vmatprep.subr.bf16.mxu0 %v4413_v31  ;;  %3482 = vmatprep.subr.bf16.mxu1 %v4414_v35 }
 0xdfd   :  { %3442 = vmatpush1.bf16.msra.mxu0 %v4415_v36  ;;  %3483 = vmatpush1.bf16.msra.mxu1 %v4416_v41 }
 0xdfe   :  { %3943 = vmatprep.subr.bf16.mxu0 %v4145_v42 }
 0xe00   :  { %3444 = vmatmul.mubr.bf16.vlgmr.msra.gmra.mrb[64].mxu0 %v5633_v22  ;;  %3485 = vmatmul.mubr.bf16.vlgmr.msra.gmra.mrb[48].mxu1 %v5633_v22  ;;  %v4149_v22 = vld [vmem:[%s5703_s3 + $0x50] sm:$0xff]  }
 0xe01   :  { %3944 = vmatpush3.bf16.msra.mxu0 %v4146_v45 }
 0xe02   :  { %3945 = vmatprep.subr.bf16.mxu0 %v4147_v46 }
 0xe05   :  { %3946 = vmatpush3.bf16.msra.mxu0 %v4148_v58 }
 0xe06   :  { %3947 = vmatprep.subr.bf16.mxu0 %v4149_v22 }
 0xe09   :  { %3948 = vmatpush3.bf16.msra.mxu0 %v4150_v38 }
 0xe0a   :  { %3949 = vmatprep.subr.bf16.mxu0 %v4151_v9 }
 0xe0d   :  { %3950 = vmatpush3.bf16.msra.mxu0 %v4152_v54 }
 0xe0e   :  { %3951 = vmatprep.subr.bf16.mxu0 %v4153_v4 }
 0xe11   :  { %3952 = vmatpush3.bf16.msra.mxu0 %v4154_v10 }
 0xe12   :  { %3953 = vmatprep.subr.bf16.mxu0 %v4155_v1 }
 0xe15   :  { %3954 = vmatpush3.bf16.msra.mxu0 %v4156_v44 }
 0xe16   :  { %3955 = vmatprep.subr.bf16.mxu0 %v4157_v47 }
 0xe19   :  { %3956 = vmatpush3.bf16.msra.mxu0 %v4158_v27 }
 0xe1a   :  { %3957 = vmatprep.subr.bf16.mxu0 %v4159_v28 }
 0xe1d   :  { %3958 = vmatpush3.bf16.msra.mxu0 %v4160_v29 }
 0xe93   :  { %v3363_v14 = vpop.f32.mrb[60].mxu0  ;;  %v3404_v16 = vpop.f32.mrb[44].mxu1 }
 0xe94   :  { %v3503_v56 = vrot.slane %v3404_v16, 2  ;;  %v3365_v17 = vpop.f32.mrb[61].mxu0  ;;  %v3406_v3 = vpop.f32.mrb[45].mxu1  ;;  %v3501_v40 = vrot.slane %v3363_v14, 2 }
 0xe95   :  { %v3504_v59 = vrot.slane %v3406_v3, 2  ;;  %v3367_v2 = vpop.f32.mrb[62].mxu0  ;;  %v3408_v49 = vpop.f32.mrb[46].mxu1 }
 0xe96   :  { %v3519_v19 = vadd.f32 %v6072_v11, %v3503_v56  ;;  %v3368_v57 = vpop.f32.mrb[63].mxu0  ;;  %v3409_v52 = vpop.f32.mrb[47].mxu1  ;;  %v3517_v62 = vadd.f32 %v6074_v33, %v3501_v40 }
 0xe97   :  { %v3520_v63 = vadd.f32 %v6073_v13, %v3504_v59  ;;  %v3502_v13 = vrot.slane %v3365_v17, 2 }
 0xe98   :  { %v3909_v50 = vmul.f32 -1.442695, %v3519_v19  ;;  %v3907_v7 = vmul.f32 -1.442695, %v3517_v62 }
 0xe99   :  { %v3910_v51 = vmul.f32 -1.442695, %v3520_v63  ;;  %v3518_v61 = vadd.f32 %v6075_v34, %v3502_v13  ;;  %v3579_v63 = vld [vmem:[#allocation10 + $0x7] ss:$0 sm:$0xff] }
 0xe9a   :  { %4257 = vpow2.f32 %v3909_v50 }
 0xe9b   :  { %4259 = vpow2.f32 %v3910_v51  ;;  %v3908_v48 = vmul.f32 -1.442695, %v3518_v61 }
 0xea4   :  { %v4258_v8 = vpop.eup %4257 }
 0xea5   :  { %v3543_v43 = vadd.f32 1.0, %v4258_v8  ;;  %v4260_v37 = vpop.eup %4259 }
 0xea6   :  { %v3544_v39 = vadd.f32 1.0, %v4260_v37 }
 0xea7   :  { %4261 = vrcp.f32 %v3543_v43 }
 0xea8   :  { %4263 = vrcp.f32 %v3544_v39 }
 0xea9   :  { %4265 = vpow2.f32 %v3907_v7 }
 0xeaa   :  { %4267 = vpow2.f32 %v3908_v48 }
 0xeb1   :  { %v4262_v12 = vpop.eup %4261 }
 0xeb2   :  { %v3569_v11 = vmul.f32 %v4262_v12, %v3565_v6  ;;  %v4264_v0 = vpop.eup %4263 }
 0xeb3   :  { %v3570_v5 = vmul.f32 %v4264_v0, %v3566_v18  ;;  %v4266_v21 = vpop.eup %4265 }
 0xeb4   :  { %v4268_v26 = vpop.eup %4267  ;;  %v3531_v23 = vadd.f32 1.0, %v4266_v21 }
 0xeb5   :  { %v3532_v25 = vadd.f32 1.0, %v4268_v26 }
 0xeb6   :  { %4269 = vrcp.f32 %v3531_v23 }
 0xeb7   :  { %4271 = vrcp.f32 %v3532_v25 }
 0xec0   :  { %v4270_v4 = vpop.eup %4269 }
 0xec1   :  { %v4272_v10 = vpop.eup %4271 }
 0xed3   :  { %v3445_v24 = vpop.f32.mrb[64].mxu0  ;;  %v3486_v30 = vpop.f32.mrb[48].mxu1 }
 0xed4   :  { %v3505_v55 = vrot.slane %v3445_v24, 2  ;;  %v3507_v32 = vrot.slane %v3486_v30, 2  ;;  %v3447_v31 = vpop.f32.mrb[65].mxu0  ;;  %v3488_v35 = vpop.f32.mrb[49].mxu1 }
 0xed5   :  { %v3506_v36 = vrot.slane %v3447_v31, 2  ;;  %v3508_v41 = vrot.slane %v3488_v35, 2  ;;  %v3449_v42 = vpop.f32.mrb[66].mxu0  ;;  %v3490_v33 = vpop.f32.mrb[50].mxu1 }
 0xed6   :  { %v3521_v34 = vadd.f32 %v6076_v60, %v3505_v55  ;;  %v3523_v45 = vadd.f32 %v6077_v15, %v3507_v32  ;;  %v3450_v46 = vpop.f32.mrb[67].mxu0  ;;  %v3491_v58 = vpop.f32.mrb[51].mxu1 }
 0xed7   :  { %v3522_v22 = vadd.f32 %v6078_v20, %v3506_v36  ;;  %v3524_v38 = vadd.f32 %v5986_v53, %v3508_v41 }
 0xed8   :  { %4273 = vtanh.f32 %v3521_v34  ;;  %v3911_v9 = vmul.f32 -1.442695, %v3523_v45 }
 0xed9   :  { %4275 = vtanh.f32 %v3522_v22  ;;  %v3912_v54 = vmul.f32 -1.442695, %v3524_v38 }
 0xeda   :  { %4277 = vpow2.f32 %v3911_v9 }
 0xedb   :  { %4279 = vpow2.f32 %v3912_v54 }
 0xee2   :  { %v4274_v1 = vpop.eup %4273 }
 0xee3   :  { %v4276_v44 = vpop.eup %4275  ;;  %v3571_v60 = vmul.f32 %v4274_v1, %v4270_v4 }
 0xee4   :  { %v4278_v47 = vpop.eup %4277  ;;  %v3572_v15 = vmul.f32 %v4276_v44, %v4272_v10 }
 0xee5   :  { %v4280_v27 = vpop.eup %4279  ;;  %v3573_v28 = vadd.f32 %v3571_v60, %v3569_v11  ;;  %v3557_v29 = vadd.f32 1.0, %v4278_v47 }
 0xee6   :  { %v3574_v14 = vadd.f32 %v3572_v15, %v3570_v5  ;;  %v3558_v20 = vadd.f32 1.0, %v4280_v27 }
 0xee7   :  { %4281 = vtanh.f32 %v3573_v28 }
 0xee8   :  { %4283 = vrcp.f32 %v3557_v29 }
 0xee9   :  { %4285 = vtanh.f32 %v3574_v14 }
 0xeea   :  { %4287 = vrcp.f32 %v3558_v20 }
 0xef1   :  { %v4282_v53 = vpop.eup %4281 }
 0xef2   :  { %v4284_v16 = vpop.eup %4283 }
 0xef3   :  { %v4286_v56 = vpop.eup %4285  ;;  %v3577_v17 = vmul.f32 %v4284_v16, %v4282_v53 }
 0xef4   :  { %v4288_v3 = vpop.eup %4287 }
 0xef5   :  { %v3578_v59 = vmul.f32 %v4288_v3, %v4286_v56  ;;  %v3580_v2 = vpack.c.bf16 %v3577_v17, %v3577_v17 }
 0xef7   :  { %v3581_v49 = vpack.c.bf16 %v3578_v59, %v3578_v59  ;;  %v3616_v57 = vrot.slane %v3580_v2, 3 }
 0xef9   :  { %v3617_v19 = vrot.slane %v3581_v49, 3 }
 0xefb   :  { %3748 = vmatprep.mubr.bf16.mxu0 %v3617_v19 }
 0xefc   :  { %3749 = vmatmul.mubr.bf16.vlgmr.msra.gmra.mrb[68].mxu0 %v3616_v57 }
 0xfcf   :  { %v3959_v52 = vpop.f32.mrb[68].mxu0 }
 0xfd0   :  { %v3960_v50 = vpop.f32.mrb[69].mxu0 }
 0xfd1   :  { %v3961_v51 = vadd.f32 %v3960_v50, %v3959_v52  ;;  %v3962_v8 = vpop.f32.mrb[70].mxu0 }
 0xfd2   :  { %v3963_v43 = vpop.f32.mrb[71].mxu0 }
 0xfd3   :  { %v3751_v37 = vadd.f32 %v3961_v51, %v3579_v63 }
 0xfd5   :  { %3756 = vst [vmem:[%s5709_s9] sm:$0x3] %v3751_v37 }
 0xfd6   :  { %3761 = vsyncpa [#allocation7], 1 }
 0xfd7   :  { %3762 = vsyncpa [#allocation9], 1 }
 0xfd8   :  { %3763 = vsyncmov [#allocation5] }
 0xfdb   :  { %s3764_s22 = vpop.sfrf %3763 }
 0xfdc   :  { %p3929_p10 = scmp.ne.s32.totalorder %s3764_s22, 0 }
 0xfde   :  { %3768 = shalt.err (%p3929_p10)  }
 0xfdf   :  { %3770 = vsyncmov [#allocation5 + $0x1] }
 0xfe2   :  { %s3771_s23 = vpop.sfrf %3770 }
 0xfe3   :  { %p3930_p11 = scmp.ne.s32.totalorder %s3771_s23, 0 }
 0xfe5   :  { %3775 = shalt.err (%p3930_p11)  }
 0xfe6   :  { %3777 = vsyncmov [#allocation5 + $0x2] }
 0xfe9   :  { %s3778_s25 = vpop.sfrf %3777 }
 0xfea   :  { %p3931_p12 = scmp.ne.s32.totalorder %s3778_s25, 0 }
 0xfec   :  { %3782 = shalt.err (%p3931_p12)  }

</bundles_post_ra>
